<compile_context>
chip_gen: v6e
topology: v6e:2x2x1
jax: 0.10.0
libtpu: 0.0.40
codegen_flags: <defaults>
</compile_context>

<pallas_src>
from functools import partial

import numpy as np
import jax
import jax.numpy as jnp
from jax.experimental import pallas as pl
from jax.experimental.pallas import tpu as pltpu


# ----------------------------------------------------------------------------- helpers
def _outer(a, b):
    """Per-lane tensor product: a:(p,Bm), b:(q,Bm) -> (p*q,Bm), row i*q+j = a[i]*b[j].

    When q is a multiple of 8 (sublane count) build the result as p sublane-aligned
    q-row slabs (row-broadcast multiply + aligned concat), avoiding the
    (p, q, Bm) -> (p*q, Bm) sublane repack.  Otherwise fall back to broadcast+reshape.
    """
    p, bm = a.shape
    q = b.shape[0]
    if q % 8 == 0:
        return jnp.concatenate([a[i:i + 1, :] * b for i in range(p)], axis=0)
    return (a[:, None, :] * b[None, :, :]).reshape(p * q, bm)


# ----------------------------------------------------------------------------- kernel
def _sig_kernel(depth, x_ref, wb_ref, bb_ref, bns_ref, bnb_ref, dt_ref, bl_ref, *rest):
    """x_ref: (C, L*Bm) with columns ordered l*Bm + m;  out_ref: (Dout, Bm).  All fp32.

    wb/bb/bns/bnb are the bottleneck conv + eval-mode BN folded to an affine map,
    zero-padded with one extra output row carrying the signatory time channel
    (that row stays exactly 0; the time increment enters via dt_ref added to deltas).
    """
    wl_refs = rest[:depth]
    out_ref = rest[depth]
    dout, bm = out_ref.shape
    d = wb_ref.shape[0]
    L = x_ref.shape[1] // bm

    # ---- bottleneck 1x1 conv + ReLU + BN(affine) for ALL L time steps in one matmul ----
    h = jnp.dot(wb_ref[...], x_ref[...], preferred_element_type=jnp.float32)    # (d, L*Bm)
    h = jnp.maximum(h + bb_ref[...], 0.0)
    h = h * bns_ref[...] + bnb_ref[...]            # last row identically 0 (time slot)

    # hoisted loop-invariant broadcast of the time-increment column (nonzero last row only)
    dt_b = jnp.broadcast_to(dt_ref[...], (d, bm))

    def point(i):                                  # static, lane-aligned slice (bm % 128 == 0)
        return h[:, i * bm:(i + 1) * bm]

    # ---- step 0: basepoint 0 -> sig = exp(point_0)  (time component of point_0 is 0) ----
    delta = point(0)
    sig = [delta]
    for k in range(2, depth + 1):
        sig.append(_outer(delta * (1.0 / k), sig[-1]))

    # ---- steps 1..L-1: Chen's identity.  exp(delta) level k is folded into the sig_1
    #      cross term: new_sig_k = sig_k + (sig_1 + delta/k) (x) e_{k-1} + sum_{j>=2} sig_j (x) e_{k-j}
    for i in range(1, L):
        delta = point(i) - point(i - 1) + dt_b
        e = [delta]
        for m in range(2, depth):
            e.append(_outer(delta * (1.0 / m), e[-1]))
        new_sig = [sig[0] + delta]
        for k in range(2, depth + 1):
            acc = sig[k - 1] + _outer(sig[0] + delta * (1.0 / k), e[k - 2])
            for j in range(2, k):
                acc = acc + _outer(sig[j - 1], e[k - j - 1])
            new_sig.append(acc)
        sig = new_sig

    # ---- final linear, accumulated per level (no signature-level concatenation) ----
    out = jnp.dot(wl_refs[0][...], sig[0], preferred_element_type=jnp.float32) + bl_ref[...]
    for k in range(1, depth):
        out = out + jnp.dot(wl_refs[k][...], sig[k], preferred_element_type=jnp.float32)
    out_ref[...] = out


# ----------------------------------------------------------------------------- wrapper
def sig_module_forward(x, params, sig_depth, block_m=512):
    N, C, J, T, L = x.shape
    M = N * J * T
    Csig = params["conv_w"].shape[0]
    Dout, sig_ch = params["lin_w"].shape
    d = Csig + 1
    assert sig_ch == sum(d ** k for k in range(1, sig_depth + 1))
    assert L >= 2, "stream too short to take the signature"
    block_m = min(block_m, M)
    assert block_m % 128 == 0 and M % block_m == 0, "stream batch must tile by block_m (x128)"
    grid_m = M // block_m

    # layout: (C, grid_m*L*block_m); column = g*L*block_m + l*block_m + m_local with
    # global stream index m = (n*J + j)*T + t (matches the torch reshape/permute order).
    x_k = (jnp.transpose(x, (1, 0, 2, 3, 4))
           .reshape(C, grid_m, block_m, L)
           .transpose(0, 1, 3, 2)
           .reshape(C, grid_m * L * block_m)
           .astype(jnp.float32))
    # TODO(synk): this rearrangement is one extra HBM round trip of x; having the upstream
    #             producer emit (C, L, M) directly (or allow_input_fusion) would remove it.

    eps = 1e-5
    f32 = jnp.float32
    bn_scale = params["bn_gamma"] / jnp.sqrt(params["bn_var"] + eps)
    bn_shift = params["bn_beta"] - params["bn_mean"] * bn_scale

    # bottleneck conv / BN folded into an affine map, zero-padded with the (zero) time row
    wb = jnp.zeros((d, C), f32).at[:Csig].set(params["conv_w"].astype(f32))
    bb = jnp.zeros((d, 1), f32).at[:Csig, 0].set(params["conv_b"].astype(f32))
    bns = jnp.ones((d, 1), f32).at[:Csig, 0].set(bn_scale.astype(f32))
    bnb = jnp.zeros((d, 1), f32).at[:Csig, 0].set(bn_shift.astype(f32))
    dt = jnp.zeros((d, 1), f32).at[d - 1, 0].set(1.0 / (L - 1))      # time increment / step

    # per-level slices of the final linear weight (avoids in-kernel sig concat)
    lin_w = params["lin_w"].astype(f32)
    wl_levels, off = [], 0
    for k in range(1, sig_depth + 1):
        wl_levels.append(lin_w[:, off:off + d ** k])
        off += d ** k
    bl = params["lin_b"].reshape(Dout, 1).astype(f32)

    lvl_specs = [pl.BlockSpec((Dout, d ** k), lambda i: (0, 0))
                 for k in range(1, sig_depth + 1)]

    flops = M * (2 * d * C * L + 6 * L * sig_ch + 2 * Dout * sig_ch)
    cost = pl.CostEstimate(flops=int(flops), transcendentals=0,
                           bytes_accessed=int(x_k.size * 4 + Dout * M * 4))

    out = pl.pallas_call(
        partial(_sig_kernel, sig_depth),
        out_shape=jax.ShapeDtypeStruct((Dout, M), jnp.float32),
        grid_spec=pltpu.PrefetchScalarGridSpec(
            num_scalar_prefetch=0,
            grid=(grid_m,),
            in_specs=[
                pl.BlockSpec((C, L * block_m), lambda i: (0, i)),
                pl.BlockSpec((d, C), lambda i: (0, 0)),
                pl.BlockSpec((d, 1), lambda i: (0, 0)),
                pl.BlockSpec((d, 1), lambda i: (0, 0)),
                pl.BlockSpec((d, 1), lambda i: (0, 0)),
                pl.BlockSpec((d, 1), lambda i: (0, 0)),
                pl.BlockSpec((Dout, 1), lambda i: (0, 0)),
            ] + lvl_specs,
            out_specs=pl.BlockSpec((Dout, block_m), lambda i: (0, i)),
        ),
        compiler_params=pltpu.CompilerParams(
            dimension_semantics=("parallel",),
            vmem_limit_bytes=48 * 1024 * 1024,
        ),
        cost_estimate=cost,
    )(x_k, wb, bb, bns, bnb, dt, bl, *wl_levels)

    # (Dout, M) -> (N, Dout, J, T)   == torch: reshape(N, J, T, C).permute(0, 3, 1, 2)
    return out.reshape(Dout, N, J, T).transpose(1, 0, 2, 3)


# ----------------------------------------------------------------------------- params
def init_params(key, in_channels, sig_in_channels, out_dimension, sig_depth):
    d = sig_in_channels + 1
    sig_ch = sum(d ** k for k in range(1, sig_depth + 1))
    k = jax.random.split(key, 8)
    params = dict(
        conv_w=0.5 * jax.random.normal(k[0], (sig_in_channels, in_channels), jnp.float32),
        conv_b=0.1 * jax.random.normal(k[1], (sig_in_channels,), jnp.float32),
        bn_gamma=1.0 + 0.1 * jax.random.normal(k[2], (sig_in_channels,), jnp.float32),
        bn_beta=0.1 * jax.random.normal(k[3], (sig_in_channels,), jnp.float32),
        bn_mean=0.1 * jax.random.normal(k[4], (sig_in_channels,), jnp.float32),
        bn_var=jnp.abs(jax.random.normal(k[5], (sig_in_channels,), jnp.float32)) + 0.5,
        lin_w=jax.random.normal(k[6], (out_dimension, sig_ch), jnp.float32) / np.sqrt(sig_ch),
        lin_b=0.1 * jax.random.normal(k[7], (out_dimension,), jnp.float32),
    )
    return params, sig_ch


# ----------------------------------------------------------------------------- reference
def reference_forward(x, params, sig_depth):
    """Pure-JAX reference of the same forward (eval-mode BN)."""
    N, C, J, T, L = x.shape
    eps = 1e-5
    wb, bb = params["conv_w"], params["conv_b"]
    bn_scale = params["bn_gamma"] / jnp.sqrt(params["bn_var"] + eps)
    bn_shift = params["bn_beta"] - params["bn_mean"] * bn_scale

    xp = jnp.transpose(x, (0, 4, 1, 2, 3)).reshape(N * L, C, J, T)
    h = jnp.einsum("oc,ncjt->nojt", wb, xp) + bb[None, :, None, None]
    h = jnp.maximum(h, 0.0)
    h = h * bn_scale[None, :, None, None] + bn_shift[None, :, None, None]

    Csig = wb.shape[0]
    h = h.reshape(N, L, Csig, J, T).transpose(0, 3, 4, 1, 2).reshape(-1, L, Csig)  # (M, L, Csig)
    M = h.shape[0]
    time = jnp.linspace(0.0, 1.0, L, dtype=jnp.float32)
    path = jnp.concatenate(
        [h, jnp.broadcast_to(time[None, :, None], (M, L, 1))], axis=-1)            # (M, L, d)
    d = Csig + 1

    prev = jnp.zeros((M, d), jnp.float32)
    sig = None
    for i in range(L):
        delta = path[:, i, :] - prev
        prev = path[:, i, :]
        e = [delta]
        for k in range(2, sig_depth + 1):
            ek = (e[-1][:, :, None] * delta[:, None, :]).reshape(M, d ** k) / float(k)
            e.append(ek)
        if sig is None:
            sig = e
        else:
            new_sig = []
            for k in range(1, sig_depth + 1):
                acc = sig[k - 1] + e[k - 1]
                for j in range(1, k):
                    acc = acc + (sig[j - 1][:, :, None] * e[k - j - 1][:, None, :]).reshape(M, d ** k)
                new_sig.append(acc)
            sig = new_sig
    sig_flat = jnp.concatenate(sig, axis=-1)
    z = sig_flat @ params["lin_w"].T + params["lin_b"]
    Dout = params["lin_w"].shape[0]
    return z.reshape(N, J, T, Dout).transpose(0, 3, 1, 2)


# ----------------------------------------------------------------------------- main
if __name__ == "__main__":
    # out_dimension == in_channels is required by the module's final reshape
    # (it reshapes N*J*T x out_dim into (N, J, T, C)).
    N, C, J, T, L = 2, 4, 4, 128, 5      # M = N*J*T = 1024 streams, win_size = 5
    sig_in_channels = 3
    sig_depth = 3
    out_dimension = C

    key = jax.random.PRNGKey(0)
    kx, kp = jax.random.split(key)
    x = jax.random.normal(kx, (N, C, J, T, L), jnp.float32)
    params, sig_ch = init_params(kp, C, sig_in_channels, out_dimension, sig_depth)

    # block_m=512 -> grid of 2 parallel steps (even: balanced on v7x's two TensorCores)
    y = sig_module_forward(x, params, sig_depth, block_m=512)
    y = jax.block_until_ready(y)

    y_ref = reference_forward(x, params, sig_depth)
    assert y.shape == (N, out_dimension, J, T)
    np.testing.assert_allclose(np.asarray(y), np.asarray(y_ref), rtol=2e-3, atol=2e-3)
    print("KERNEL_OK")
</pallas_src>

<mosaic_0001>
module attributes {stable_mosaic.version = 11 : i64} {
  func.func @_sig_kernel(%arg0: i32, %arg1: memref<4x2560xf32, #tpu.memory_space<vmem>>, %arg2: memref<4x4xf32, #tpu.memory_space<vmem>>, %arg3: memref<4x1xf32, #tpu.memory_space<vmem>>, %arg4: memref<4x1xf32, #tpu.memory_space<vmem>>, %arg5: memref<4x1xf32, #tpu.memory_space<vmem>>, %arg6: memref<4x1xf32, #tpu.memory_space<vmem>>, %arg7: memref<4x1xf32, #tpu.memory_space<vmem>>, %arg8: memref<4x4xf32, #tpu.memory_space<vmem>>, %arg9: memref<4x16xf32, #tpu.memory_space<vmem>>, %arg10: memref<4x64xf32, #tpu.memory_space<vmem>>, %arg11: memref<4x512xf32, #tpu.memory_space<vmem>>) attributes {dimension_semantics = [#tpu.dimension_semantics<parallel>], iteration_bounds = array<i64: 2>, scalar_prefetch = 0 : i64, scratch_operands = 0 : i64, tpu.core_type = #tpu.core_type<tc>, window_params = [{transform_indices = @transform_0, window_bounds = array<i64: 4, 2560>}, {pipeline_mode = #tpu.pipeline_mode<synchronous>, transform_indices = @transform_1, window_bounds = array<i64: 4, 4>}, {pipeline_mode = #tpu.pipeline_mode<synchronous>, transform_indices = @transform_2, window_bounds = array<i64: 4, 1>}, {pipeline_mode = #tpu.pipeline_mode<synchronous>, transform_indices = @transform_3, window_bounds = array<i64: 4, 1>}, {pipeline_mode = #tpu.pipeline_mode<synchronous>, transform_indices = @transform_4, window_bounds = array<i64: 4, 1>}, {pipeline_mode = #tpu.pipeline_mode<synchronous>, transform_indices = @transform_5, window_bounds = array<i64: 4, 1>}, {pipeline_mode = #tpu.pipeline_mode<synchronous>, transform_indices = @transform_6, window_bounds = array<i64: 4, 1>}, {pipeline_mode = #tpu.pipeline_mode<synchronous>, transform_indices = @transform_7, window_bounds = array<i64: 4, 4>}, {pipeline_mode = #tpu.pipeline_mode<synchronous>, transform_indices = @transform_8, window_bounds = array<i64: 4, 16>}, {pipeline_mode = #tpu.pipeline_mode<synchronous>, transform_indices = @transform_9, window_bounds = array<i64: 4, 64>}, {transform_indices = @transform_10, window_bounds = array<i64: 4, 512>}]} {
    %c0 = arith.constant 0 : index
    %c0_0 = arith.constant 0 : index
    %0 = vector.load %arg2[%c0, %c0_0] : memref<4x4xf32, #tpu.memory_space<vmem>>, vector<4x4xf32>
    %c0_1 = arith.constant 0 : index
    %c0_2 = arith.constant 0 : index
    %1 = vector.load %arg1[%c0_1, %c0_2] : memref<4x2560xf32, #tpu.memory_space<vmem>>, vector<4x2560xf32>
    %cst = arith.constant dense<0.000000e+00> : vector<4x2560xf32>
    %2 = tpu.matmul %0, %1, %cst {dimension_numbers = #tpu.dot_dimension_numbers<[1], [0], [0], [1], [0, 0, 1, 1], [], []>} : vector<4x4xf32>, vector<4x2560xf32>, vector<4x2560xf32> -> vector<4x2560xf32>
    %c0_3 = arith.constant 0 : index
    %c0_4 = arith.constant 0 : index
    %3 = vector.load %arg3[%c0_3, %c0_4] : memref<4x1xf32, #tpu.memory_space<vmem>>, vector<4x1xf32>
    %4 = vector.broadcast %3 : vector<4x1xf32> to vector<4x2560xf32>
    %5 = arith.addf %2, %4 : vector<4x2560xf32>
    %cst_5 = arith.constant 0.000000e+00 : f32
    %6 = vector.broadcast %cst_5 : f32 to vector<4x2560xf32>
    %7 = arith.maximumf %5, %6 : vector<4x2560xf32>
    %c0_6 = arith.constant 0 : index
    %c0_7 = arith.constant 0 : index
    %8 = vector.load %arg4[%c0_6, %c0_7] : memref<4x1xf32, #tpu.memory_space<vmem>>, vector<4x1xf32>
    %9 = vector.broadcast %8 : vector<4x1xf32> to vector<4x2560xf32>
    %10 = arith.mulf %7, %9 : vector<4x2560xf32>
    %c0_8 = arith.constant 0 : index
    %c0_9 = arith.constant 0 : index
    %11 = vector.load %arg5[%c0_8, %c0_9] : memref<4x1xf32, #tpu.memory_space<vmem>>, vector<4x1xf32>
    %12 = vector.broadcast %11 : vector<4x1xf32> to vector<4x2560xf32>
    %13 = arith.addf %10, %12 : vector<4x2560xf32>
    %c0_10 = arith.constant 0 : index
    %c0_11 = arith.constant 0 : index
    %14 = vector.load %arg6[%c0_10, %c0_11] : memref<4x1xf32, #tpu.memory_space<vmem>>, vector<4x1xf32>
    %15 = vector.shape_cast %14 : vector<4x1xf32> to vector<4x1xf32>
    %16 = vector.broadcast %15 : vector<4x1xf32> to vector<4x512xf32>
    %17 = vector.extract_strided_slice %13 {offsets = [0, 0], sizes = [4, 512], strides = [1, 1]} : vector<4x2560xf32> to vector<4x512xf32>
    %cst_12 = arith.constant 5.000000e-01 : f32
    %18 = vector.broadcast %cst_12 : f32 to vector<4x512xf32>
    %19 = arith.mulf %17, %18 : vector<4x512xf32>
    %20 = vector.shape_cast %19 : vector<4x512xf32> to vector<4x1x512xf32>
    %21 = vector.shape_cast %17 : vector<4x512xf32> to vector<1x4x512xf32>
    %22 = vector.broadcast %20 : vector<4x1x512xf32> to vector<4x4x512xf32>
    %23 = vector.broadcast %21 : vector<1x4x512xf32> to vector<4x4x512xf32>
    %24 = arith.mulf %22, %23 : vector<4x4x512xf32>
    %25 = vector.shape_cast %24 : vector<4x4x512xf32> to vector<16x512xf32>
    %cst_13 = arith.constant 0.333333343 : f32
    %26 = vector.broadcast %cst_13 : f32 to vector<4x512xf32>
    %27 = arith.mulf %17, %26 : vector<4x512xf32>
    %28 = vector.extract_strided_slice %27 {offsets = [0, 0], sizes = [1, 512], strides = [1, 1]} : vector<4x512xf32> to vector<1x512xf32>
    %29 = vector.broadcast %28 : vector<1x512xf32> to vector<16x512xf32>
    %30 = arith.mulf %29, %25 : vector<16x512xf32>
    %31 = vector.extract_strided_slice %27 {offsets = [1, 0], sizes = [1, 512], strides = [1, 1]} : vector<4x512xf32> to vector<1x512xf32>
    %32 = vector.broadcast %31 : vector<1x512xf32> to vector<16x512xf32>
    %33 = arith.mulf %32, %25 : vector<16x512xf32>
    %34 = vector.extract_strided_slice %27 {offsets = [2, 0], sizes = [1, 512], strides = [1, 1]} : vector<4x512xf32> to vector<1x512xf32>
    %35 = vector.broadcast %34 : vector<1x512xf32> to vector<16x512xf32>
    %36 = arith.mulf %35, %25 : vector<16x512xf32>
    %37 = vector.extract_strided_slice %27 {offsets = [3, 0], sizes = [1, 512], strides = [1, 1]} : vector<4x512xf32> to vector<1x512xf32>
    %38 = vector.broadcast %37 : vector<1x512xf32> to vector<16x512xf32>
    %39 = arith.mulf %38, %25 : vector<16x512xf32>
    %40 = tpu.concatenate %30, %33, %36, %39 in 0 : vector<16x512xf32>, vector<16x512xf32>, vector<16x512xf32>, vector<16x512xf32> -> vector<64x512xf32>
    %41 = vector.extract_strided_slice %13 {offsets = [0, 512], sizes = [4, 512], strides = [1, 1]} : vector<4x2560xf32> to vector<4x512xf32>
    %42 = vector.extract_strided_slice %13 {offsets = [0, 0], sizes = [4, 512], strides = [1, 1]} : vector<4x2560xf32> to vector<4x512xf32>
    %43 = arith.subf %41, %42 : vector<4x512xf32>
    %44 = arith.addf %43, %16 : vector<4x512xf32>
    %cst_14 = arith.constant 5.000000e-01 : f32
    %45 = vector.broadcast %cst_14 : f32 to vector<4x512xf32>
    %46 = arith.mulf %44, %45 : vector<4x512xf32>
    %47 = vector.shape_cast %46 : vector<4x512xf32> to vector<4x1x512xf32>
    %48 = vector.shape_cast %44 : vector<4x512xf32> to vector<1x4x512xf32>
    %49 = vector.broadcast %47 : vector<4x1x512xf32> to vector<4x4x512xf32>
    %50 = vector.broadcast %48 : vector<1x4x512xf32> to vector<4x4x512xf32>
    %51 = arith.mulf %49, %50 : vector<4x4x512xf32>
    %52 = vector.shape_cast %51 : vector<4x4x512xf32> to vector<16x512xf32>
    %53 = arith.addf %17, %44 : vector<4x512xf32>
    %cst_15 = arith.constant 5.000000e-01 : f32
    %54 = vector.broadcast %cst_15 : f32 to vector<4x512xf32>
    %55 = arith.mulf %44, %54 : vector<4x512xf32>
    %56 = arith.addf %17, %55 : vector<4x512xf32>
    %57 = vector.shape_cast %56 : vector<4x512xf32> to vector<4x1x512xf32>
    %58 = vector.shape_cast %44 : vector<4x512xf32> to vector<1x4x512xf32>
    %59 = vector.broadcast %57 : vector<4x1x512xf32> to vector<4x4x512xf32>
    %60 = vector.broadcast %58 : vector<1x4x512xf32> to vector<4x4x512xf32>
    %61 = arith.mulf %59, %60 : vector<4x4x512xf32>
    %62 = vector.shape_cast %61 : vector<4x4x512xf32> to vector<16x512xf32>
    %63 = arith.addf %25, %62 : vector<16x512xf32>
    %cst_16 = arith.constant 0.333333343 : f32
    %64 = vector.broadcast %cst_16 : f32 to vector<4x512xf32>
    %65 = arith.mulf %44, %64 : vector<4x512xf32>
    %66 = arith.addf %17, %65 : vector<4x512xf32>
    %67 = vector.extract_strided_slice %66 {offsets = [0, 0], sizes = [1, 512], strides = [1, 1]} : vector<4x512xf32> to vector<1x512xf32>
    %68 = vector.broadcast %67 : vector<1x512xf32> to vector<16x512xf32>
    %69 = arith.mulf %68, %52 : vector<16x512xf32>
    %70 = vector.extract_strided_slice %66 {offsets = [1, 0], sizes = [1, 512], strides = [1, 1]} : vector<4x512xf32> to vector<1x512xf32>
    %71 = vector.broadcast %70 : vector<1x512xf32> to vector<16x512xf32>
    %72 = arith.mulf %71, %52 : vector<16x512xf32>
    %73 = vector.extract_strided_slice %66 {offsets = [2, 0], sizes = [1, 512], strides = [1, 1]} : vector<4x512xf32> to vector<1x512xf32>
    %74 = vector.broadcast %73 : vector<1x512xf32> to vector<16x512xf32>
    %75 = arith.mulf %74, %52 : vector<16x512xf32>
    %76 = vector.extract_strided_slice %66 {offsets = [3, 0], sizes = [1, 512], strides = [1, 1]} : vector<4x512xf32> to vector<1x512xf32>
    %77 = vector.broadcast %76 : vector<1x512xf32> to vector<16x512xf32>
    %78 = arith.mulf %77, %52 : vector<16x512xf32>
    %79 = tpu.concatenate %69, %72, %75, %78 in 0 : vector<16x512xf32>, vector<16x512xf32>, vector<16x512xf32>, vector<16x512xf32> -> vector<64x512xf32>
    %80 = arith.addf %40, %79 : vector<64x512xf32>
    %81 = vector.shape_cast %25 : vector<16x512xf32> to vector<16x1x512xf32>
    %82 = vector.shape_cast %44 : vector<4x512xf32> to vector<1x4x512xf32>
    %83 = vector.broadcast %81 : vector<16x1x512xf32> to vector<16x4x512xf32>
    %84 = vector.broadcast %82 : vector<1x4x512xf32> to vector<16x4x512xf32>
    %85 = arith.mulf %83, %84 : vector<16x4x512xf32>
    %86 = vector.shape_cast %85 : vector<16x4x512xf32> to vector<64x512xf32>
    %87 = arith.addf %80, %86 : vector<64x512xf32>
    %88 = vector.extract_strided_slice %13 {offsets = [0, 1024], sizes = [4, 512], strides = [1, 1]} : vector<4x2560xf32> to vector<4x512xf32>
    %89 = vector.extract_strided_slice %13 {offsets = [0, 512], sizes = [4, 512], strides = [1, 1]} : vector<4x2560xf32> to vector<4x512xf32>
    %90 = arith.subf %88, %89 : vector<4x512xf32>
    %91 = arith.addf %90, %16 : vector<4x512xf32>
    %cst_17 = arith.constant 5.000000e-01 : f32
    %92 = vector.broadcast %cst_17 : f32 to vector<4x512xf32>
    %93 = arith.mulf %91, %92 : vector<4x512xf32>
    %94 = vector.shape_cast %93 : vector<4x512xf32> to vector<4x1x512xf32>
    %95 = vector.shape_cast %91 : vector<4x512xf32> to vector<1x4x512xf32>
    %96 = vector.broadcast %94 : vector<4x1x512xf32> to vector<4x4x512xf32>
    %97 = vector.broadcast %95 : vector<1x4x512xf32> to vector<4x4x512xf32>
    %98 = arith.mulf %96, %97 : vector<4x4x512xf32>
    %99 = vector.shape_cast %98 : vector<4x4x512xf32> to vector<16x512xf32>
    %100 = arith.addf %53, %91 : vector<4x512xf32>
    %cst_18 = arith.constant 5.000000e-01 : f32
    %101 = vector.broadcast %cst_18 : f32 to vector<4x512xf32>
    %102 = arith.mulf %91, %101 : vector<4x512xf32>
    %103 = arith.addf %53, %102 : vector<4x512xf32>
    %104 = vector.shape_cast %103 : vector<4x512xf32> to vector<4x1x512xf32>
    %105 = vector.shape_cast %91 : vector<4x512xf32> to vector<1x4x512xf32>
    %106 = vector.broadcast %104 : vector<4x1x512xf32> to vector<4x4x512xf32>
    %107 = vector.broadcast %105 : vector<1x4x512xf32> to vector<4x4x512xf32>
    %108 = arith.mulf %106, %107 : vector<4x4x512xf32>
    %109 = vector.shape_cast %108 : vector<4x4x512xf32> to vector<16x512xf32>
    %110 = arith.addf %63, %109 : vector<16x512xf32>
    %cst_19 = arith.constant 0.333333343 : f32
    %111 = vector.broadcast %cst_19 : f32 to vector<4x512xf32>
    %112 = arith.mulf %91, %111 : vector<4x512xf32>
    %113 = arith.addf %53, %112 : vector<4x512xf32>
    %114 = vector.extract_strided_slice %113 {offsets = [0, 0], sizes = [1, 512], strides = [1, 1]} : vector<4x512xf32> to vector<1x512xf32>
    %115 = vector.broadcast %114 : vector<1x512xf32> to vector<16x512xf32>
    %116 = arith.mulf %115, %99 : vector<16x512xf32>
    %117 = vector.extract_strided_slice %113 {offsets = [1, 0], sizes = [1, 512], strides = [1, 1]} : vector<4x512xf32> to vector<1x512xf32>
    %118 = vector.broadcast %117 : vector<1x512xf32> to vector<16x512xf32>
    %119 = arith.mulf %118, %99 : vector<16x512xf32>
    %120 = vector.extract_strided_slice %113 {offsets = [2, 0], sizes = [1, 512], strides = [1, 1]} : vector<4x512xf32> to vector<1x512xf32>
    %121 = vector.broadcast %120 : vector<1x512xf32> to vector<16x512xf32>
    %122 = arith.mulf %121, %99 : vector<16x512xf32>
    %123 = vector.extract_strided_slice %113 {offsets = [3, 0], sizes = [1, 512], strides = [1, 1]} : vector<4x512xf32> to vector<1x512xf32>
    %124 = vector.broadcast %123 : vector<1x512xf32> to vector<16x512xf32>
    %125 = arith.mulf %124, %99 : vector<16x512xf32>
    %126 = tpu.concatenate %116, %119, %122, %125 in 0 : vector<16x512xf32>, vector<16x512xf32>, vector<16x512xf32>, vector<16x512xf32> -> vector<64x512xf32>
    %127 = arith.addf %87, %126 : vector<64x512xf32>
    %128 = vector.shape_cast %63 : vector<16x512xf32> to vector<16x1x512xf32>
    %129 = vector.shape_cast %91 : vector<4x512xf32> to vector<1x4x512xf32>
    %130 = vector.broadcast %128 : vector<16x1x512xf32> to vector<16x4x512xf32>
    %131 = vector.broadcast %129 : vector<1x4x512xf32> to vector<16x4x512xf32>
    %132 = arith.mulf %130, %131 : vector<16x4x512xf32>
    %133 = vector.shape_cast %132 : vector<16x4x512xf32> to vector<64x512xf32>
    %134 = arith.addf %127, %133 : vector<64x512xf32>
    %135 = vector.extract_strided_slice %13 {offsets = [0, 1536], sizes = [4, 512], strides = [1, 1]} : vector<4x2560xf32> to vector<4x512xf32>
    %136 = vector.extract_strided_slice %13 {offsets = [0, 1024], sizes = [4, 512], strides = [1, 1]} : vector<4x2560xf32> to vector<4x512xf32>
    %137 = arith.subf %135, %136 : vector<4x512xf32>
    %138 = arith.addf %137, %16 : vector<4x512xf32>
    %cst_20 = arith.constant 5.000000e-01 : f32
    %139 = vector.broadcast %cst_20 : f32 to vector<4x512xf32>
    %140 = arith.mulf %138, %139 : vector<4x512xf32>
    %141 = vector.shape_cast %140 : vector<4x512xf32> to vector<4x1x512xf32>
    %142 = vector.shape_cast %138 : vector<4x512xf32> to vector<1x4x512xf32>
    %143 = vector.broadcast %141 : vector<4x1x512xf32> to vector<4x4x512xf32>
    %144 = vector.broadcast %142 : vector<1x4x512xf32> to vector<4x4x512xf32>
    %145 = arith.mulf %143, %144 : vector<4x4x512xf32>
    %146 = vector.shape_cast %145 : vector<4x4x512xf32> to vector<16x512xf32>
    %147 = arith.addf %100, %138 : vector<4x512xf32>
    %cst_21 = arith.constant 5.000000e-01 : f32
    %148 = vector.broadcast %cst_21 : f32 to vector<4x512xf32>
    %149 = arith.mulf %138, %148 : vector<4x512xf32>
    %150 = arith.addf %100, %149 : vector<4x512xf32>
    %151 = vector.shape_cast %150 : vector<4x512xf32> to vector<4x1x512xf32>
    %152 = vector.shape_cast %138 : vector<4x512xf32> to vector<1x4x512xf32>
    %153 = vector.broadcast %151 : vector<4x1x512xf32> to vector<4x4x512xf32>
    %154 = vector.broadcast %152 : vector<1x4x512xf32> to vector<4x4x512xf32>
    %155 = arith.mulf %153, %154 : vector<4x4x512xf32>
    %156 = vector.shape_cast %155 : vector<4x4x512xf32> to vector<16x512xf32>
    %157 = arith.addf %110, %156 : vector<16x512xf32>
    %cst_22 = arith.constant 0.333333343 : f32
    %158 = vector.broadcast %cst_22 : f32 to vector<4x512xf32>
    %159 = arith.mulf %138, %158 : vector<4x512xf32>
    %160 = arith.addf %100, %159 : vector<4x512xf32>
    %161 = vector.extract_strided_slice %160 {offsets = [0, 0], sizes = [1, 512], strides = [1, 1]} : vector<4x512xf32> to vector<1x512xf32>
    %162 = vector.broadcast %161 : vector<1x512xf32> to vector<16x512xf32>
    %163 = arith.mulf %162, %146 : vector<16x512xf32>
    %164 = vector.extract_strided_slice %160 {offsets = [1, 0], sizes = [1, 512], strides = [1, 1]} : vector<4x512xf32> to vector<1x512xf32>
    %165 = vector.broadcast %164 : vector<1x512xf32> to vector<16x512xf32>
    %166 = arith.mulf %165, %146 : vector<16x512xf32>
    %167 = vector.extract_strided_slice %160 {offsets = [2, 0], sizes = [1, 512], strides = [1, 1]} : vector<4x512xf32> to vector<1x512xf32>
    %168 = vector.broadcast %167 : vector<1x512xf32> to vector<16x512xf32>
    %169 = arith.mulf %168, %146 : vector<16x512xf32>
    %170 = vector.extract_strided_slice %160 {offsets = [3, 0], sizes = [1, 512], strides = [1, 1]} : vector<4x512xf32> to vector<1x512xf32>
    %171 = vector.broadcast %170 : vector<1x512xf32> to vector<16x512xf32>
    %172 = arith.mulf %171, %146 : vector<16x512xf32>
    %173 = tpu.concatenate %163, %166, %169, %172 in 0 : vector<16x512xf32>, vector<16x512xf32>, vector<16x512xf32>, vector<16x512xf32> -> vector<64x512xf32>
    %174 = arith.addf %134, %173 : vector<64x512xf32>
    %175 = vector.shape_cast %110 : vector<16x512xf32> to vector<16x1x512xf32>
    %176 = vector.shape_cast %138 : vector<4x512xf32> to vector<1x4x512xf32>
    %177 = vector.broadcast %175 : vector<16x1x512xf32> to vector<16x4x512xf32>
    %178 = vector.broadcast %176 : vector<1x4x512xf32> to vector<16x4x512xf32>
    %179 = arith.mulf %177, %178 : vector<16x4x512xf32>
    %180 = vector.shape_cast %179 : vector<16x4x512xf32> to vector<64x512xf32>
    %181 = arith.addf %174, %180 : vector<64x512xf32>
    %182 = vector.extract_strided_slice %13 {offsets = [0, 2048], sizes = [4, 512], strides = [1, 1]} : vector<4x2560xf32> to vector<4x512xf32>
    %183 = vector.extract_strided_slice %13 {offsets = [0, 1536], sizes = [4, 512], strides = [1, 1]} : vector<4x2560xf32> to vector<4x512xf32>
    %184 = arith.subf %182, %183 : vector<4x512xf32>
    %185 = arith.addf %184, %16 : vector<4x512xf32>
    %cst_23 = arith.constant 5.000000e-01 : f32
    %186 = vector.broadcast %cst_23 : f32 to vector<4x512xf32>
    %187 = arith.mulf %185, %186 : vector<4x512xf32>
    %188 = vector.shape_cast %187 : vector<4x512xf32> to vector<4x1x512xf32>
    %189 = vector.shape_cast %185 : vector<4x512xf32> to vector<1x4x512xf32>
    %190 = vector.broadcast %188 : vector<4x1x512xf32> to vector<4x4x512xf32>
    %191 = vector.broadcast %189 : vector<1x4x512xf32> to vector<4x4x512xf32>
    %192 = arith.mulf %190, %191 : vector<4x4x512xf32>
    %193 = vector.shape_cast %192 : vector<4x4x512xf32> to vector<16x512xf32>
    %194 = arith.addf %147, %185 : vector<4x512xf32>
    %cst_24 = arith.constant 5.000000e-01 : f32
    %195 = vector.broadcast %cst_24 : f32 to vector<4x512xf32>
    %196 = arith.mulf %185, %195 : vector<4x512xf32>
    %197 = arith.addf %147, %196 : vector<4x512xf32>
    %198 = vector.shape_cast %197 : vector<4x512xf32> to vector<4x1x512xf32>
    %199 = vector.shape_cast %185 : vector<4x512xf32> to vector<1x4x512xf32>
    %200 = vector.broadcast %198 : vector<4x1x512xf32> to vector<4x4x512xf32>
    %201 = vector.broadcast %199 : vector<1x4x512xf32> to vector<4x4x512xf32>
    %202 = arith.mulf %200, %201 : vector<4x4x512xf32>
    %203 = vector.shape_cast %202 : vector<4x4x512xf32> to vector<16x512xf32>
    %204 = arith.addf %157, %203 : vector<16x512xf32>
    %cst_25 = arith.constant 0.333333343 : f32
    %205 = vector.broadcast %cst_25 : f32 to vector<4x512xf32>
    %206 = arith.mulf %185, %205 : vector<4x512xf32>
    %207 = arith.addf %147, %206 : vector<4x512xf32>
    %208 = vector.extract_strided_slice %207 {offsets = [0, 0], sizes = [1, 512], strides = [1, 1]} : vector<4x512xf32> to vector<1x512xf32>
    %209 = vector.broadcast %208 : vector<1x512xf32> to vector<16x512xf32>
    %210 = arith.mulf %209, %193 : vector<16x512xf32>
    %211 = vector.extract_strided_slice %207 {offsets = [1, 0], sizes = [1, 512], strides = [1, 1]} : vector<4x512xf32> to vector<1x512xf32>
    %212 = vector.broadcast %211 : vector<1x512xf32> to vector<16x512xf32>
    %213 = arith.mulf %212, %193 : vector<16x512xf32>
    %214 = vector.extract_strided_slice %207 {offsets = [2, 0], sizes = [1, 512], strides = [1, 1]} : vector<4x512xf32> to vector<1x512xf32>
    %215 = vector.broadcast %214 : vector<1x512xf32> to vector<16x512xf32>
    %216 = arith.mulf %215, %193 : vector<16x512xf32>
    %217 = vector.extract_strided_slice %207 {offsets = [3, 0], sizes = [1, 512], strides = [1, 1]} : vector<4x512xf32> to vector<1x512xf32>
    %218 = vector.broadcast %217 : vector<1x512xf32> to vector<16x512xf32>
    %219 = arith.mulf %218, %193 : vector<16x512xf32>
    %220 = tpu.concatenate %210, %213, %216, %219 in 0 : vector<16x512xf32>, vector<16x512xf32>, vector<16x512xf32>, vector<16x512xf32> -> vector<64x512xf32>
    %221 = arith.addf %181, %220 : vector<64x512xf32>
    %222 = vector.shape_cast %157 : vector<16x512xf32> to vector<16x1x512xf32>
    %223 = vector.shape_cast %185 : vector<4x512xf32> to vector<1x4x512xf32>
    %224 = vector.broadcast %222 : vector<16x1x512xf32> to vector<16x4x512xf32>
    %225 = vector.broadcast %223 : vector<1x4x512xf32> to vector<16x4x512xf32>
    %226 = arith.mulf %224, %225 : vector<16x4x512xf32>
    %227 = vector.shape_cast %226 : vector<16x4x512xf32> to vector<64x512xf32>
    %228 = arith.addf %221, %227 : vector<64x512xf32>
    %c0_26 = arith.constant 0 : index
    %c0_27 = arith.constant 0 : index
    %229 = vector.load %arg8[%c0_26, %c0_27] : memref<4x4xf32, #tpu.memory_space<vmem>>, vector<4x4xf32>
    %cst_28 = arith.constant dense<0.000000e+00> : vector<4x512xf32>
    %230 = tpu.matmul %229, %194, %cst_28 {dimension_numbers = #tpu.dot_dimension_numbers<[1], [0], [0], [1], [0, 0, 1, 1], [], []>} : vector<4x4xf32>, vector<4x512xf32>, vector<4x512xf32> -> vector<4x512xf32>
    %c0_29 = arith.constant 0 : index
    %c0_30 = arith.constant 0 : index
    %231 = vector.load %arg7[%c0_29, %c0_30] : memref<4x1xf32, #tpu.memory_space<vmem>>, vector<4x1xf32>
    %232 = vector.broadcast %231 : vector<4x1xf32> to vector<4x512xf32>
    %233 = arith.addf %230, %232 : vector<4x512xf32>
    %c0_31 = arith.constant 0 : index
    %c0_32 = arith.constant 0 : index
    %234 = vector.load %arg9[%c0_31, %c0_32] : memref<4x16xf32, #tpu.memory_space<vmem>>, vector<4x16xf32>
    %cst_33 = arith.constant dense<0.000000e+00> : vector<4x512xf32>
    %235 = tpu.matmul %234, %204, %cst_33 {dimension_numbers = #tpu.dot_dimension_numbers<[1], [0], [0], [1], [0, 0, 1, 1], [], []>} : vector<4x16xf32>, vector<16x512xf32>, vector<4x512xf32> -> vector<4x512xf32>
    %236 = arith.addf %233, %235 : vector<4x512xf32>
    %c0_34 = arith.constant 0 : index
    %c0_35 = arith.constant 0 : index
    %237 = vector.load %arg10[%c0_34, %c0_35] : memref<4x64xf32, #tpu.memory_space<vmem>>, vector<4x64xf32>
    %cst_36 = arith.constant dense<0.000000e+00> : vector<4x512xf32>
    %238 = tpu.matmul %237, %228, %cst_36 {dimension_numbers = #tpu.dot_dimension_numbers<[1], [0], [0], [1], [0, 0, 1, 1], [], []>} : vector<4x64xf32>, vector<64x512xf32>, vector<4x512xf32> -> vector<4x512xf32>
    %239 = arith.addf %236, %238 : vector<4x512xf32>
    %c0_37 = arith.constant 0 : index
    %c0_38 = arith.constant 0 : index
    %240 = vector.load %arg11[%c0_37, %c0_38] : memref<4x512xf32, #tpu.memory_space<vmem>>, vector<4x512xf32>
    tpu.vector_store %arg11[%c0_37, %c0_38], %239 {strides = array<i32>} : memref<4x512xf32, #tpu.memory_space<vmem>>, vector<4x512xf32>,
    return
  }
  func.func @transform_0(%arg0: i32) -> (i32, i32) {
    %c0_i32 = arith.constant 0 : i32
    %c0_i32_0 = arith.constant 0 : i32
    return %c0_i32, %arg0 : i32, i32
  }
  func.func @transform_1(%arg0: i32) -> (i32, i32) {
    %c0_i32 = arith.constant 0 : i32
    %c0_i32_0 = arith.constant 0 : i32
    %c0_i32_1 = arith.constant 0 : i32
    return %c0_i32, %c0_i32_0 : i32, i32
  }
  func.func @transform_2(%arg0: i32) -> (i32, i32) {
    %c0_i32 = arith.constant 0 : i32
    %c0_i32_0 = arith.constant 0 : i32
    %c0_i32_1 = arith.constant 0 : i32
    return %c0_i32, %c0_i32_0 : i32, i32
  }
  func.func @transform_3(%arg0: i32) -> (i32, i32) {
    %c0_i32 = arith.constant 0 : i32
    %c0_i32_0 = arith.constant 0 : i32
    %c0_i32_1 = arith.constant 0 : i32
    return %c0_i32, %c0_i32_0 : i32, i32
  }
  func.func @transform_4(%arg0: i32) -> (i32, i32) {
    %c0_i32 = arith.constant 0 : i32
    %c0_i32_0 = arith.constant 0 : i32
    %c0_i32_1 = arith.constant 0 : i32
    return %c0_i32, %c0_i32_0 : i32, i32
  }
  func.func @transform_5(%arg0: i32) -> (i32, i32) {
    %c0_i32 = arith.constant 0 : i32
    %c0_i32_0 = arith.constant 0 : i32
    %c0_i32_1 = arith.constant 0 : i32
    return %c0_i32, %c0_i32_0 : i32, i32
  }
  func.func @transform_6(%arg0: i32) -> (i32, i32) {
    %c0_i32 = arith.constant 0 : i32
    %c0_i32_0 = arith.constant 0 : i32
    %c0_i32_1 = arith.constant 0 : i32
    return %c0_i32, %c0_i32_0 : i32, i32
  }
  func.func @transform_7(%arg0: i32) -> (i32, i32) {
    %c0_i32 = arith.constant 0 : i32
    %c0_i32_0 = arith.constant 0 : i32
    %c0_i32_1 = arith.constant 0 : i32
    return %c0_i32, %c0_i32_0 : i32, i32
  }
  func.func @transform_8(%arg0: i32) -> (i32, i32) {
    %c0_i32 = arith.constant 0 : i32
    %c0_i32_0 = arith.constant 0 : i32
    %c0_i32_1 = arith.constant 0 : i32
    return %c0_i32, %c0_i32_0 : i32, i32
  }
  func.func @transform_9(%arg0: i32) -> (i32, i32) {
    %c0_i32 = arith.constant 0 : i32
    %c0_i32_0 = arith.constant 0 : i32
    %c0_i32_1 = arith.constant 0 : i32
    return %c0_i32, %c0_i32_0 : i32, i32
  }
  func.func @transform_10(%arg0: i32) -> (i32, i32) {
    %c0_i32 = arith.constant 0 : i32
    %c0_i32_0 = arith.constant 0 : i32
    return %c0_i32, %arg0 : i32, i32
  }
}

</mosaic_0001>

<bundles_post_ra>
// kernel: tpu_custom_call.1
= control target key start
LH: loop header
LB: loop body
LE: loop exit
PB: predicated region body
PF: predicated region fallthrough
CT: control target
= control target key end

     0   :  { %15 = vsyncpa [#allocation3], 0  ;;  %s10351_s0 = inlined_call_operand.hbm [shape: f32[4,5120], index: 0, kind: input, shape index: {}]   ;;  %s10352_s1 = inlined_call_operand.vmem [shape: f32[4,4], index: 1, kind: input, shape index: {}]   ;;  %s10353_s2 = inlined_call_operand.vmem [shape: f32[4,1], index: 2, kind: input, shape index: {}]   ;;  %s10354_s3 = inlined_call_operand.vmem [shape: f32[4,1], index: 3, kind: input, shape index: {}]   ;;  %s10355_s4 = inlined_call_operand.vmem [shape: f32[4,1], index: 4, kind: input, shape index: {}]   ;;  %s10356_s5 = inlined_call_operand.vmem [shape: f32[4,1], index: 5, kind: input, shape index: {}]   ;;  %s10357_s6 = inlined_call_operand.vmem [shape: f32[4,1], index: 6, kind: input, shape index: {}]   ;;  %s10358_s7 = inlined_call_operand.vmem [shape: f32[4,4], index: 7, kind: input, shape index: {}]   ;;  %s10359_s8 = inlined_call_operand.vmem [shape: f32[4,16], index: 8, kind: input, shape index: {}]   ;;  %s10360_s9 = inlined_call_operand.vmem [shape: f32[4,64], index: 9, kind: input, shape index: {}]   ;;  %s10361_s10 = inlined_call_operand.hbm [shape: f32[4,1024], index: 10, kind: output, shape index: {}]  }
   0x1   :  { %17 = vsyncpa [#allocation3 + $0x1], 0 }
   0x2   :  { %18 = vsyncpa [#allocation4], 0 }
   0x3   :  { %20 = vsyncpa [#allocation4 + $0x1], 0  ;;  %s7413_s13 = smov 0   ;;  %s7415_s14 = smov 0  }
   0x4   :  { %s7417_s15 = smov 0   ;;  %s7419_s16 = smov 0  }
   0x5 LB: > { %10602 = sst [smem:[#allocation8_spill]] %s7347_s15  ;;  %s7434_s17 = sadd.s32 4294967295, %s7351_s16   ;;  %s7351_s16 = sphi %s7419_s16, %s11068_s16   ;;  %s7347_s15 = sphi %s7417_s15, %s11070_s15   ;;  %s7343_s14 = sphi %s7415_s14, %s11072_s14   ;;  %s7339_s13 = sphi %s7413_s13, %s11071_s13  }
   0x6   : > { %s6975_s18 = sadd.s32 4294967294, %s7351_s16   ;;  %s7438_s19 = sadd.s32 1, %s7351_s16  }
   0x7   : > { %10603 = sst [smem:[#allocation9_spill]] %s7438_s19  ;;  %s33_s20 = sadd.s32 1, %s7347_s15 }
   0x8   : > { %s30_s21 = ssub.s32 %s7351_s16, %s7438_s19  ;;  %p40_p0 = scmp.ne.s32.totalorder %s7347_s15, %s7343_s14 }
   0x9   : > { %p31_p1 = scmp.eq.s32.totalorder %s30_s21, 0  ;;  %p41_p2 = scmp.eq.s32.totalorder %s7351_s16, 0 }
   0xa   : > { %p46_p3 = scmp.ne.s32.totalorder %s7343_s14, %s7339_s13  ;;  %p47_p4 = scmp.eq.s32.totalorder %s7434_s17, 0 }
   0xb   : > { %s7450_s22 = scalar_select %p31_p1, %s7347_s15, %s33_s20  }
   0xc   : > { %p42_p5 = por %p41_p2, %p40_p0  ;;  %p7452_p6 = por %p47_p4, %p46_p3 }
   0xd   : > { %10604 = sst [smem:[#allocation10_spill]] %s7450_s22  ;;  %p259_p7 = scmp.eq.s32.totalorder %s7434_s17, 1 }
   0xe   : > { %s10605_s23 = scalar_select %p7452_p6, 1, 0 }
   0xf   : > { %p265_p8 = scmp.eq.s32.totalorder %s6975_s18, 1  ;;  %p7210_p10 = scmp.lt.s32.totalorder %s7351_s16, 2 }
  0x10   : > { %p7459_p11 = por %p259_p7, %p40_p0  ;;  %s312_s26 = sand.u32 1, %s7347_s15  }
  0x11   : > { %p7463_p12 = por %p265_p8, %p46_p3  ;;  %s7194_s27 = smul.u32 1280, %s7351_s16 }
  0x12   : > { %s10606_s24 = scalar_select %p7459_p11, 1, 0 }
  0x13   : > { %s10607_s25 = scalar_select %p7463_p12, 1, 0 }
  0x14   : > { %s7196_s28 = smul.u32 80, %s312_s26  ;;  %s7472_s11 = scalar_lea.hbm %s10351_s0, %s7194_s27 }
  0x15   : > { %10608 = sst [smem:[#allocation11_spill]] %s10607_s25  ;;  %p7474_p13 = pnand %p7210_p10, %p42_p5 }
  0x16   : > { %s316_s18 = scalar_lea.vmem [#allocation2], %s7196_s28  ;;  %s313_s21 = scalar_lea.sflag [#allocation3], %s312_s26 }
  0x17   : > { %s324_s20 = sshll.u32 %s316_s18, 4  ;;  %s7259_s22 = scalar_lea.hbm %s7472_s11, 1280  ;;  %s325_s20 = int_to_ptr.vmem [resolvable:$true] %s324_s20 }
  0x18   : > { %p7260_p2 = scmp.ne.s32.totalorder %s7472_s11, %s7259_s22  ;;  %p7261_p3 = pneg %p7474_p13 }
  0x19   : > { %s7264_s30 = scalar_lea.hbm %s10351_s0, 2560  ;;  %p7265_p5 = scmp.lt.s32.totalorder %s7472_s11, %s10351_s0 }
  0x1a   : > { %p7262_p4 = pnand %p7261_p3, %p7260_p2  ;;  %p7266_p8 = scmp.lt.s32.totalorder %s7264_s30, %s7259_s22 }
  0x1c   : > { %p7263_p7 = pneg %p7262_p4  ;;  %p7267_p10 = por %p7266_p8, %p7265_p5 }
  0x1e   : > { %p7268_p9 = pnand %p7267_p10, %p7263_p7 }
  0x20   : > { %7271 = shalt.err (!%p7268_p9)
}
  0x21   : > { %s7272_s28 = scalar_lea.vmem %s325_s20, 1280  ;;  %s7353_s26 = smov [#allocation2]  }
  0x22   : > { %p7273_p0 = scmp.ne.s32.totalorder %s325_s20, %s7272_s28  ;;  %s7277_s18 = sshll.u32 %s7353_s26, 4  ;;  %s7278_s18 = int_to_ptr.vmem [resolvable:$false] %s7277_s18 }
  0x23   : > { %s7279_s25 = scalar_lea.vmem %s7278_s18, 2560  ;;  %p7280_p2 = scmp.lt.s32.totalorder %s325_s20, %s7278_s18 }
  0x24   : > { %p7275_p1 = pnand %p7273_p0, %p7261_p3  ;;  %p7281_p4 = scmp.lt.s32.totalorder %s7279_s25, %s7272_s28 }
  0x26   : > { %p7276_p12 = pneg %p7275_p1  ;;  %p7282_p11 = por %p7281_p4, %p7280_p2 }
  0x28   : > { %p7283_p6 = pnand %p7282_p11, %p7276_p12 }
  0x2a   : > { %7286 = shalt.err (!%p7283_p6)
}
  0x2b   : > { %7205 = dma.hbm_to_vmem [thread:$0]  (!%p7474_p13), %s7472_s11, 1280, %s325_s20, %s313_s21  }
  0x2c   : > { %p10610_p9 = scmp.lt.s32.totalorder %s7351_s16, 3  ;;  %p10611_p7 = scmp.ge.s32.totalorder %s7351_s16, 1 }
  0x2e   : > { %p330_p5 = pnand %p10611_p7, %p10610_p9 }
  0x30   : > { %333 = sbr.rel (%p330_p5) target bundleno = 980 (0x3d4), region = 60 }
  0x35   : > { %s7499_s15 = sand.u32 1, %s7343_s14   ;;  %p10612_p6 = scmp.ne.s32.totalorder %s10605_s23, 0 }
  0x36   : > { %s7197_s19 = smul.u32 80, %s7499_s15  ;;  %s336_s22 = scalar_lea.sflag [#allocation3], %s7499_s15 }
  0x38   : > { %s7503_s25 = scalar_lea.vmem [#allocation2], %s7197_s19 }
  0x39   : > { %7330 = dma.done.wait (%p10612_p6), %s336_s22, 1280  }
  0x3a   : > { %7332 = vsyncadd (%p10612_p6), %s336_s22, 4294966016  ;;  %v10368_v0 = vmov 0.0   ;;  %v7355_v1 = vmov 0   ;;  %v379_v2 = vld [vmem:[%s7503_s25] sm:$0xff]  ;;  %vm419_vm0 = vcmask 1043456   ;;  %v380_v3 = vld [vmem:[%s7503_s25 + $0x8] sm:$0xff]  ;;  %v1261_v30 = vlaneseq }
  0x3b   : > { %524 = vmatprep.mubr.f32.mxu0 %v10368_v0  ;;  %595 = vmatprep.mubr.f32.mxu1 %v10368_v0  ;;  %v405_v4 = vcombine.high %v379_v2, %v379_v2  ;;  %v406_v5 = vcombine.high %v380_v3, %v380_v3  ;;  %v381_v6 = vld [vmem:[%s7503_s25 + $0x10] sm:$0xff]  ;;  %v382_v7 = vld [vmem:[%s7503_s25 + $0x18] sm:$0xff]  ;;  %vm415_vm1 = vcmask 31744   ;;  %v383_v11 = vld [vmem:[%s7503_s25 + $0x20] sm:$0xff]  ;;  %v7356_v28 = vmov 1966171168  }
  0x3c   : > { %7247 = vset.pattern.permute.xlu0 %v7355_v1  ;;  %7248 = vset.pattern.permute.xlu1 %v7355_v1  ;;  %v378_v8 = vld [vmem:[%s10352_s1] sm:$0xf]  ;;  %v407_v9 = vcombine.high %v381_v6, %v381_v6  ;;  %v408_v10 = vcombine.high %v382_v7, %v382_v7  ;;  %v384_v12 = vld [vmem:[%s7503_s25 + $0x28] sm:$0xff]  ;;  %v409_v13 = vcombine.high %v383_v11, %v383_v11  ;;  %v386_v16 = vld [vmem:[%s7503_s25 + $0x38] sm:$0xff]  ;;  %v1259_v29 = vunpack.c.l.s4 %v7356_v28  ;;  %s6980_s21 = sshll.u32 %s7499_s15, 4  ;;  %s7195_s29 = sshll.u32 %s7434_s17, 8 }
  0x3d   : > { %6981 = vmatprep.subr.msk.mxu0 %vm419_vm0, %v405_v4  ;;  %6984 = vmatprep.subr.msk.mxu1 %vm419_vm0, %v406_v5  ;;  %v410_v14 = vcombine.high %v384_v12, %v384_v12  ;;  %v385_v15 = vld [vmem:[%s7503_s25 + $0x30] sm:$0xff]  ;;  %v412_v18 = vcombine.high %v386_v16, %v386_v16  ;;  %v387_v19 = vld [vmem:[%s7503_s25 + $0x40] sm:$0xff]  ;;  %v388_v20 = vld [vmem:[%s7503_s25 + $0x48] sm:$0xff]  ;;  %v7581_v35 = vshrl.u32 %v1261_v30, 7  ;;  %vm6579_vm2 = vcmask 130048   ;;  %s375_s27 = scalar_lea.vmem [#allocation5], %s6980_s21  ;;  %s6903_s18 = scalar_lea.hbm %s10361_s10, %s7195_s29 }
  0x3e   : > { %6982 = vmatpush1.msk.msra.mxu0 %vm419_vm0, %v379_v2  ;;  %6985 = vmatpush1.msk.msra.mxu1 %vm419_vm0, %v380_v3  ;;  %v411_v17 = vcombine.high %v385_v15, %v385_v15  ;;  %v413_v21 = vcombine.high %v387_v19, %v387_v19  ;;  %v414_v22 = vcombine.high %v388_v20, %v388_v20  ;;  %v389_v23 = vld [vmem:[%s10353_s2] sm:$0xf]  ;;  %v1260_v34 = vunpack.c.0.s8 %v1259_v29  ;;  %s6905_s30 = sshll.u32 %s375_s27, 4  ;;  %s6891_s19 = scalar_lea.sflag [#allocation4], %s7499_s15  ;;  %s6906_s30 = int_to_ptr.vmem [resolvable:$true] %s6905_s30 }
  0x3f   : > { %6983 = vmatmul.mubr.msk.f32.vlgmr.msra.gmra.mxu0 %vm415_vm1, %v378_v8  ;;  %6986 = vmatmul.mubr.msk.f32.vlgmr.msra.gmra.mxu1 %vm415_vm1, %v378_v8  ;;  %v1216_v24 = vld [vmem:[%s10355_s4] sm:$0xf]  ;;  %v7591_v47 = vsub.s32 0, %v7581_v35  ;;  %v7602_v58 = vsub.s32 1, %v7581_v35  ;;  %v7605_v59 = vsub.s32 2, %v7581_v35  ;;  %vm6730_vm3 = vcmask 523264  }
  0x40   : > { %6987 = vmatprep.subr.msk.mxu0 %vm419_vm0, %v407_v9  ;;  %6990 = vmatprep.subr.msk.mxu1 %vm419_vm0, %v408_v10  ;;  %v1190_v25 = vld [vmem:[%s10354_s3] sm:$0xf]  ;;  %v7588_v46 = vsub.s32 %v1260_v34, %v7581_v35  ;;  %s7287_s22 = scalar_lea.vmem %s6906_s30, 256  ;;  %p11064_p12 = scmp.ne.s32.totalorder %s10606_s24, 0 }
  0x41   : > { %6988 = vmatpush1.msk.msra.mxu0 %vm419_vm0, %v381_v6  ;;  %6991 = vmatpush1.msk.msra.mxu1 %vm419_vm0, %v382_v7  ;;  %v1242_v26 = vld [vmem:[%s10356_s5] sm:$0xf]  ;;  %p7288_p11 = scmp.ne.s32.totalorder %s6906_s30, %s7287_s22  ;;  %s7357_s25 = smov [#allocation5]  }
  0x42   : > { %666 = vmatprep.mubr.f32.mxu0 %v10368_v0  ;;  %737 = vmatprep.mubr.f32.mxu1 %v10368_v0  ;;  %v6391_v27 = vld [vmem:[%s10357_s6] sm:$0xf]  ;;  %10613 = vst [vmem:[#allocation12_spill] sm:$0xff] %v7588_v46  ;;  %s7291_s23 = sshll.u32 %s7357_s25, 4  ;;  %s7292_s23 = int_to_ptr.vmem [resolvable:$false] %s7291_s23 }
  0x43   : > { %6989 = vmatmul.mubr.msk.f32.vlgmr.msra.gmra.mxu0 %vm415_vm1, %v378_v8  ;;  %6992 = vmatmul.mubr.msk.f32.vlgmr.msra.gmra.mxu1 %vm415_vm1, %v378_v8  ;;  %p7289_p13 = pnand %p7288_p11, %p11064_p12  ;;  %s7293_s17 = scalar_lea.vmem %s7292_s23, 512 }
  0x44   : > { %6993 = vmatprep.subr.msk.mxu0 %vm419_vm0, %v409_v13  ;;  %6996 = vmatprep.subr.msk.mxu1 %vm419_vm0, %v410_v14  ;;  %p7294_p1 = scmp.lt.s32.totalorder %s6906_s30, %s7292_s23  ;;  %p7295_p3 = scmp.lt.s32.totalorder %s7293_s17, %s7287_s22 }
  0x45   : > { %6994 = vmatpush1.msk.msra.mxu0 %vm419_vm0, %v383_v11  ;;  %6997 = vmatpush1.msk.msra.mxu1 %vm419_vm0, %v384_v12  ;;  %p7290_p0 = pneg %p7289_p13 }
  0x46   : > { %808 = vmatprep.mubr.f32.mxu0 %v10368_v0  ;;  %879 = vmatprep.mubr.f32.mxu1 %v10368_v0  ;;  %p7296_p8 = por %p7295_p3, %p7294_p1 }
  0x47   : > { %6995 = vmatmul.mubr.msk.f32.vlgmr.msra.gmra.mxu0 %vm415_vm1, %v378_v8  ;;  %6998 = vmatmul.mubr.msk.f32.vlgmr.msra.gmra.mxu1 %vm415_vm1, %v378_v8 }
  0x48   : > { %6999 = vmatprep.subr.msk.mxu0 %vm419_vm0, %v411_v17  ;;  %7002 = vmatprep.subr.msk.mxu1 %vm419_vm0, %v412_v18  ;;  %p7297_p10 = pnand %p7296_p8, %p7290_p0 }
  0x49   : > { %7000 = vmatpush1.msk.msra.mxu0 %vm419_vm0, %v385_v15  ;;  %7003 = vmatpush1.msk.msra.mxu1 %vm419_vm0, %v386_v16 }
  0x4a   : > { %950 = vmatprep.mubr.f32.mxu0 %v10368_v0  ;;  %1021 = vmatprep.mubr.f32.mxu1 %v10368_v0 }
  0x4b   : > { %7001 = vmatmul.mubr.msk.f32.vlgmr.msra.gmra.mxu0 %vm415_vm1, %v378_v8  ;;  %7004 = vmatmul.mubr.msk.f32.vlgmr.msra.gmra.mxu1 %vm415_vm1, %v378_v8 }
  0x4c   : > { %7005 = vmatprep.subr.msk.mxu0 %vm419_vm0, %v413_v21  ;;  %7008 = vmatprep.subr.msk.mxu1 %vm419_vm0, %v414_v22 }
  0x4d   : > { %7006 = vmatpush1.msk.msra.mxu0 %vm419_vm0, %v387_v19  ;;  %1092 = vmatprep.mubr.f32.mxu0 %v10368_v0 }
  0x4e   : > { %7009 = vmatpush1.msk.msra.mxu1 %vm419_vm0, %v388_v20  ;;  %1163 = vmatprep.mubr.f32.mxu1 %v10368_v0 }
  0x4f   : > { %7007 = vmatmul.mubr.msk.f32.vlgmr.msra.gmra.mxu0 %vm415_vm1, %v378_v8  ;;  %7010 = vmatmul.mubr.msk.f32.vlgmr.msra.gmra.mxu1 %vm415_vm1, %v378_v8 }
  0x50   : > { %392 = vperm.xlu0 %7247, %v389_v23   ;;  %1219 = vperm.xlu1 %7248, %v1216_v24  }
  0x51   : > { %6476 = vmatprep.mubr.f32.mxu0 %v10368_v0  ;;  %6547 = vmatprep.mubr.f32.mxu1 %v10368_v0 }
  0x54   : > { %1193 = vperm.xlu0 %7247, %v1190_v25   ;;  %1245 = vperm.xlu1 %7248, %v1242_v26  }
  0x58   : > { %6394 = vperm.xlu0 %7247, %v6391_v27  }
  0xcb   : > { %v7579_v31 = vpop.permute.xlu0 %392  ;;  %v7597_v53 = vpop.permute.xlu1 %1219 }
  0xcf   : > { %v7593_v50 = vpop.permute.xlu0 %1193 }
  0xff   : > { %v526_v32 = vpop.f32.mrf.mxu0  ;;  %v597_v33 = vpop.f32.mrf.mxu1 }
 0x100   : > { %v527_v36 = vadd.f32 %v526_v32, %v7579_v31  ;;  %v598_v37 = vadd.f32 %v597_v33, %v7579_v31 }
 0x101   : > { %v528_v38 = vpop.f32.mrf.mxu0  ;;  %v599_v39 = vpop.f32.mrf.mxu1 }
 0x102   : > { %v1170_v40 = vmax.f32 %v527_v36, 0.0  ;;  %v1172_v41 = vmax.f32 %v598_v37, 0.0  ;;  %v529_v42 = vadd.f32 %v528_v38, %v7579_v31  ;;  %v600_v43 = vadd.f32 %v599_v39, %v7579_v31 }
 0x103   : > { %v668_v44 = vpop.f32.mrf.mxu0  ;;  %v739_v45 = vpop.f32.mrf.mxu1 }
 0x104   : > { %v1171_v48 = vmax.f32 %v529_v42, 0.0  ;;  %v1173_v49 = vmax.f32 %v600_v43, 0.0  ;;  %v669_v51 = vadd.f32 %v668_v44, %v7579_v31  ;;  %v740_v52 = vadd.f32 %v739_v45, %v7579_v31 }
 0x105   : > { %v670_v54 = vpop.f32.mrf.mxu0  ;;  %v741_v55 = vpop.f32.mrf.mxu1  ;;  %v1196_v56 = vmul.f32 %v7593_v50, %v1170_v40  ;;  %v1198_v57 = vmul.f32 %v7593_v50, %v1172_v41 }
 0x106   : > { %v1174_v60 = vmax.f32 %v669_v51, 0.0  ;;  %v1176_v61 = vmax.f32 %v740_v52, 0.0  ;;  %v671_v62 = vadd.f32 %v670_v54, %v7579_v31  ;;  %v742_v63 = vadd.f32 %v741_v55, %v7579_v31 }
 0x107   : > { %v810_v1 = vpop.f32.mrf.mxu0  ;;  %v7610_v2 = vadd.f32 %v7597_v53, %v1196_v56  ;;  %v881_v3 = vpop.f32.mrf.mxu1  ;;  %v7613_v4 = vadd.f32 %v7597_v53, %v1198_v57  ;;  %v1197_v5 = vmul.f32 %v7593_v50, %v1171_v48  ;;  %v1199_v6 = vmul.f32 %v7593_v50, %v1173_v49 }
 0x108   : > { %v1200_v7 = vmul.f32 %v7593_v50, %v1174_v60  ;;  %v1202_v8 = vmul.f32 %v7593_v50, %v1176_v61  ;;  %v1175_v9 = vmax.f32 %v671_v62, 0.0  ;;  %v1177_v10 = vmax.f32 %v742_v63, 0.0  ;;  %v7647_v49 = vpop.permute.xlu1 %1245 }
 0x109   : > { %10614 = vst [vmem:[#allocation13_spill] sm:$0xff] %v7613_v4  ;;  %v811_v11 = vadd.f32 %v810_v1, %v7579_v31  ;;  %v882_v12 = vadd.f32 %v881_v3, %v7579_v31  ;;  %v812_v13 = vpop.f32.mrf.mxu0  ;;  %v7622_v14 = vadd.f32 %v7597_v53, %v1197_v5  ;;  %v883_v15 = vpop.f32.mrf.mxu1  ;;  %v7625_v16 = vadd.f32 %v7597_v53, %v1199_v6 }
 0x10a   : > { %v1201_v17 = vmul.f32 %v7593_v50, %v1175_v9  ;;  %v1203_v18 = vmul.f32 %v7593_v50, %v1177_v10  ;;  %v1226_v19 = vadd.f32 %v7597_v53, %v1200_v7  ;;  %v1228_v20 = vadd.f32 %v7597_v53, %v1202_v8 }
 0x10b   : > { %v1178_v21 = vmax.f32 %v811_v11, 0.0  ;;  %v1180_v22 = vmax.f32 %v882_v12, 0.0  ;;  %v813_v23 = vadd.f32 %v812_v13, %v7579_v31  ;;  %v884_v24 = vadd.f32 %v883_v15, %v7579_v31  ;;  %v952_v25 = vpop.f32.mrf.mxu0  ;;  %v1023_v26 = vpop.f32.mrf.mxu1 }
 0x10c   : > { %v1534_v27 = vsub.f32 %v1226_v19, %v7610_v2  ;;  %v1536_v28 = vsub.f32 %v1228_v20, %v7613_v4  ;;  %v1227_v29 = vadd.f32 %v7597_v53, %v1201_v17  ;;  %v1229_v30 = vadd.f32 %v7597_v53, %v1203_v18 }
 0x10d   : > { %v1204_v32 = vmul.f32 %v7593_v50, %v1178_v21  ;;  %v1206_v33 = vmul.f32 %v7593_v50, %v1180_v22  ;;  %v1179_v34 = vmax.f32 %v813_v23, 0.0  ;;  %v1181_v36 = vmax.f32 %v884_v24, 0.0  ;;  %v954_v37 = vpop.f32.mrf.mxu0  ;;  %v1025_v38 = vpop.f32.mrf.mxu1 }
 0x10e   : > { %v1535_v39 = vsub.f32 %v1227_v29, %v7622_v14  ;;  %v1537_v40 = vsub.f32 %v1229_v30, %v7625_v16  ;;  %v953_v41 = vadd.f32 %v952_v25, %v7579_v31  ;;  %v1024_v42 = vadd.f32 %v1023_v26, %v7579_v31 }
 0x10f   : > { %v1230_v43 = vadd.f32 %v7597_v53, %v1204_v32  ;;  %v1232_v44 = vadd.f32 %v7597_v53, %v1206_v33  ;;  %v1205_v45 = vmul.f32 %v7593_v50, %v1179_v34  ;;  %v1207_v48 = vmul.f32 %v7593_v50, %v1181_v36  ;;  %v1094_v55 = vpop.f32.mrf.mxu0  ;;  %v1165_v56 = vpop.f32.mrf.mxu1 }
 0x110   : > { %v1182_v51 = vmax.f32 %v953_v41, 0.0  ;;  %v1184_v52 = vmax.f32 %v1024_v42, 0.0  ;;  %v7650_v54 = vadd.f32 %v1534_v27, %v7647_v49  ;;  %v7653_v57 = vsub.s32 3, %v7581_v35 }
 0x111   : > { %v2742_v60 = vsub.f32 %v1230_v43, %v1226_v19  ;;  %v2744_v61 = vsub.f32 %v1232_v44, %v1228_v20  ;;  %v1231_v62 = vadd.f32 %v7597_v53, %v1205_v45  ;;  %v1233_v63 = vadd.f32 %v7597_v53, %v1207_v48  ;;  %v1096_v15 = vpop.f32.mrf.mxu0  ;;  %v1167_v17 = vpop.f32.mrf.mxu1 }
 0x112   : > { %10615 = vst [vmem:[#allocation14_spill] sm:$0xff] %v7650_v54  ;;  %v1208_v1 = vmul.f32 %v7593_v50, %v1182_v51  ;;  %v1210_v3 = vmul.f32 %v7593_v50, %v1184_v52  ;;  %v7660_v5 = vadd.f32 %v1535_v39, %v7647_v49  ;;  %v7663_v6 = vadd.f32 %v1536_v28, %v7647_v49 }
 0x113   : > { %v2743_v7 = vsub.f32 %v1231_v62, %v1227_v29  ;;  %v2745_v8 = vsub.f32 %v1233_v63, %v1229_v30  ;;  %v7666_v35 = vadd.f32 %v1537_v40, %v7647_v49  ;;  %v7669_v9 = vadd.f32 %v2742_v60, %v7647_v49 }
 0x114   : > { %v1234_v10 = vadd.f32 %v7597_v53, %v1208_v1  ;;  %v1236_v11 = vadd.f32 %v7597_v53, %v1210_v3  ;;  %v955_v12 = vadd.f32 %v954_v37, %v7579_v31  ;;  %v1026_v13 = vadd.f32 %v1025_v38, %v7579_v31 }
 0x115   : > { %10616 = vst [vmem:[#allocation15_spill] sm:$0xff] %v7666_v35  ;;  %10617 = vst [vmem:[#allocation16_spill] sm:$0xff] %v7669_v9  ;;  %v7676_v18 = vadd.f32 %v2743_v7, %v7647_v49  ;;  %v7679_v19 = vadd.f32 %v2744_v61, %v7647_v49  ;;  %v1095_v20 = vadd.f32 %v1094_v55, %v7579_v31  ;;  %v7707_v55 = vmul.f32 0.5, %v7669_v9 }
 0x116   : > { %v1166_v21 = vadd.f32 %v1165_v56, %v7579_v31  ;;  %v3958_v22 = vsub.f32 %v1234_v10, %v1230_v43  ;;  %v3960_v23 = vsub.f32 %v1236_v11, %v1232_v44  ;;  %v1183_v24 = vmax.f32 %v955_v12, 0.0 }
 0x117   : > { %10618 = vst [vmem:[#allocation17_spill] sm:$0xff] %v7676_v18  ;;  %v1185_v25 = vmax.f32 %v1026_v13, 0.0  ;;  %v1186_v26 = vmax.f32 %v1095_v20, 0.0  ;;  %v1097_v28 = vadd.f32 %v1096_v15, %v7579_v31  ;;  %v1168_v29 = vadd.f32 %v1167_v17, %v7579_v31 }
 0x118   : > { %v1188_v27 = vmax.f32 %v1166_v21, 0.0  ;;  %v7686_v30 = vadd.f32 %v2745_v8, %v7647_v49  ;;  %v7689_v32 = vadd.f32 %v3958_v22, %v7647_v49  ;;  %v1209_v33 = vmul.f32 %v7593_v50, %v1183_v24 }
 0x119   : > { %v1211_v34 = vmul.f32 %v7593_v50, %v1185_v25  ;;  %v1212_v36 = vmul.f32 %v7593_v50, %v1186_v26  ;;  %v1187_v38 = vmax.f32 %v1097_v28, 0.0  ;;  %v1189_v39 = vmax.f32 %v1168_v29, 0.0 }
 0x11a   : > { %10619 = vst [vmem:[#allocation18_spill] sm:$0xff] %v7686_v30  ;;  %10620 = vst [vmem:[#allocation19_spill] sm:$0xff] %v7689_v32  ;;  %v1214_v37 = vmul.f32 %v7593_v50, %v1188_v27  ;;  %v7696_v40 = vadd.f32 %v3960_v23, %v7647_v49  ;;  %v1235_v31 = vadd.f32 %v7597_v53, %v1209_v33  ;;  %v2751_v56 = vmul.f32 0.5, %v7676_v18 }
 0x11b   : > { %v1237_v41 = vadd.f32 %v7597_v53, %v1211_v34  ;;  %v1705_v42 = vadd.f32 %v7660_v5, %v7622_v14  ;;  %v1238_v43 = vadd.f32 %v7597_v53, %v1212_v36  ;;  %v1213_v45 = vmul.f32 %v7593_v50, %v1187_v38 }
 0x11c   : > { %v1240_v44 = vadd.f32 %v7597_v53, %v1214_v37  ;;  %v1215_v48 = vmul.f32 %v7593_v50, %v1189_v39  ;;  %v3959_v51 = vsub.f32 %v1235_v31, %v1231_v62  ;;  %v2758_v50 = vcombine.low %v7707_v55, %v2751_v56 }
 0x11d   : > { %v3961_v52 = vsub.f32 %v1237_v41, %v1233_v63  ;;  %v5174_v60 = vsub.f32 %v1238_v43, %v1234_v10  ;;  %v1239_v1 = vadd.f32 %v7597_v53, %v1213_v45  ;;  %v2913_v62 = vadd.f32 %v7676_v18, %v1705_v42 }
 0x11e   : > { %v5176_v61 = vsub.f32 %v1240_v44, %v1236_v11  ;;  %v1241_v3 = vadd.f32 %v7597_v53, %v1215_v48  ;;  %v7713_v7 = vadd.f32 %v3959_v51, %v7647_v49  ;;  %v7723_v11 = vadd.f32 %v2751_v56, %v1705_v42 }
 0x11f   : > { %v7716_v8 = vadd.f32 %v3961_v52, %v7647_v49  ;;  %v7721_v63 = vadd.f32 %v5174_v60, %v7647_v49  ;;  %v5175_v12 = vsub.f32 %v1239_v1, %v1235_v31  ;;  %v3095_v53 = vmul.f32 0.33333334, %v7676_v18 }
 0x120   : > { %10621 = vst [vmem:[#allocation20_spill] sm:$0xff] %v7713_v7  ;;  %v5177_v10 = vsub.f32 %v1241_v3, %v1237_v41  ;;  %v7726_v13 = vadd.f32 %v5176_v61, %v7647_v49  ;;  %v7730_v15 = vmul.f32 0.5, %v7689_v32  ;;  %v3967_v17 = vmul.f32 0.5, %v7713_v7 }
 0x121   : > { %10622 = vst [vmem:[#allocation21_spill] sm:$0xff] %v7716_v8  ;;  %10623 = vst [vmem:[#allocation22_spill] sm:$0xff] %v7721_v63  ;;  %v7734_v20 = vadd.f32 %v5175_v12, %v7647_v49  ;;  %v2766_v21 = vrot.slane %v2758_v50, %v7588_v46  ;;  %v4129_v22 = vadd.f32 %v7713_v7, %v2913_v62  ;;  %v4311_v23 = vmul.f32 0.33333334, %v7713_v7 }
 0x122   : > { %v7740_v24 = vadd.f32 %v5177_v10, %v7647_v49  ;;  %v7742_v25 = vadd.f32 %v3095_v53, %v1705_v42  ;;  %v3974_v26 = vcombine.low %v7730_v15, %v3967_v17  ;;  %v7745_v27 = vadd.f32 %v3967_v17, %v2913_v62 }
 0x123   : > { %10624 = vst [vmem:[#allocation23_spill] sm:$0xff] %v7734_v20  ;;  %v5182_v28 = vmul.f32 0.5, %v7721_v63  ;;  %v5183_v29 = vmul.f32 0.5, %v7734_v20  ;;  %v5345_v33 = vadd.f32 %v7734_v20, %v4129_v22  ;;  %v5527_v34 = vmul.f32 0.33333334, %v7734_v20 }
 0x124   : > { %10625 = vst [vmem:[#allocation24_spill] sm:$0xff] %v7740_v24  ;;  %10626 = vst [vmem:[#allocation25_spill] sm:$0xff] %v7742_v25  ;;  %v7751_v36 = vadd.f32 %v4311_v23, %v2913_v62  ;;  %v1707_v49 = vadd.f32 %v7666_v35, %v7625_v16  ;;  %v2752_v37 = vmul.f32 0.5, %v7679_v19  ;;  %v2753_v38 = vmul.f32 0.5, %v7686_v30 }
 0x125   : > { %v3982_v39 = vrot.slane %v3974_v26, %v7588_v46  ;;  %v5190_v31 = vcombine.low %v5182_v28, %v5183_v29  ;;  %v7758_v41 = vadd.f32 %v5183_v29, %v4129_v22  ;;  %7179 = vmatprep.subr.msk.mxu0 %vm419_vm0, %v5345_v33  ;;  %v3097_v42 = vmul.f32 0.33333334, %v7686_v30 }
 0x126   : > { %10627 = vst [vmem:[#allocation26_spill] sm:$0xff] %v7751_v36  ;;  %v7762_v43 = vadd.f32 %v5527_v34, %v4129_v22  ;;  %v2759_v44 = vcombine.low %v2752_v37, %v2753_v38  ;;  %v2915_v45 = vadd.f32 %v7686_v30, %v1707_v49  ;;  %v7765_v48 = vadd.f32 %v2753_v38, %v1707_v49 }
 0x127   : > { %v5198_v51 = vrot.slane %v5190_v31, %v7588_v46  ;;  %v3968_v52 = vmul.f32 0.5, %v7696_v40  ;;  %v3969_v56 = vmul.f32 0.5, %v7716_v8  ;;  %v4313_v60 = vmul.f32 0.33333334, %v7716_v8 }
 0x128   : > { %10628 = vst [vmem:[#allocation27_spill] sm:$0xff] %v7762_v43  ;;  %v2773_v61 = vrot.slane %v2759_v44, %v7588_v46  ;;  %v4131_v1 = vadd.f32 %v7716_v8, %v2915_v45  ;;  %v5184_v3 = vmul.f32 0.5, %v7726_v13  ;;  %v5185_v50 = vmul.f32 0.5, %v7740_v24 }
 0x129   : > { %v7775_v62 = vadd.f32 %v3097_v42, %v1707_v49  ;;  %v3975_v12 = vcombine.low %v3968_v52, %v3969_v56  ;;  %v4135_v10 = vadd.f32 %v3969_v56, %v2915_v45  ;;  %v5529_v53 = vmul.f32 0.33333334, %v7740_v24 }
 0x12a   : > { %v2774_v17 = vcombine.low %v2766_v21, %v2773_v61  ;;  %v2775_v22 = vcombine.high %v2766_v21, %v2773_v61  ;;  %v5191_v23 = vcombine.low %v5184_v3, %v5185_v50  ;;  %v5347_v26 = vadd.f32 %v7740_v24, %v4131_v1 }
 0x12b   : > { %10629 = vst [vmem:[#allocation28_spill] sm:$0xff] %v7775_v62  ;;  %v3989_v29 = vrot.slane %v3975_v12, %v7588_v46  ;;  %v7780_v33 = vadd.f32 %v4313_v60, %v2915_v45  ;;  %v7782_v34 = vadd.f32 %v5185_v50, %v4131_v1  ;;  %v7786_v38 = vadd.f32 %v7650_v54, %v7610_v2 }
 0x12c   : > { %v7789_v49 = vrot.slane %v2774_v17, %v7588_v46  ;;  %v7792_v31 = vrot.slane %v2775_v22, %v7588_v46  ;;  %v5205_v21 = vrot.slane %v5191_v23, %v7588_v46  ;;  %v7795_v42 = vadd.f32 %v5529_v53, %v4131_v1  ;;  %7182 = vmatprep.subr.msk.mxu1 %vm419_vm0, %v5347_v26 }
 0x12d   : > { %10630 = vst [vmem:[#allocation29_spill] sm:$0xff] %v7780_v33  ;;  %10631 = vst [vmem:[#allocation30_spill] sm:$0xff] %v7786_v38  ;;  %v3990_v44 = vcombine.low %v3982_v39, %v3989_v29  ;;  %v3991_v45 = vcombine.high %v3982_v39, %v3989_v29  ;;  %v7800_v56 = vadd.f32 %v7669_v9, %v7786_v38  ;;  %v5526_v12 = vmul.f32 0.33333334, %v7721_v63 }
 0x12e   : > { %10632 = vst [vmem:[#allocation31_spill] sm:$0xff] %v7789_v49  ;;  %10633 = vst [vmem:[#allocation32_spill] sm:$0xff] %v7792_v31  ;;  %v2916_v60 = vadd.f32 %v7707_v55, %v7786_v38  ;;  %v5206_v61 = vcombine.low %v5198_v51, %v5205_v21  ;;  %v5207_v50 = vcombine.high %v5198_v51, %v5205_v21  ;;  %v5528_v22 = vmul.f32 0.33333334, %v7726_v13 }
 0x12f   : > { %10634 = vst [vmem:[#allocation33_spill] sm:$0xff] %v7795_v42  ;;  %10635 = vst [vmem:[#allocation34_spill] sm:$0xff] %v7800_v56  ;;  %v7807_v17 = vadd.f32 %v7663_v6, %v7613_v4  ;;  %v7810_v1 = vrot.slane %v3990_v44, %v7588_v46  ;;  %v4128_v53 = vadd.f32 %v7689_v32, %v7800_v56 }
 0x130   : > { %v2924_v39 = vcombine.low %v2916_v60, %v7723_v11  ;;  %v7817_v55 = vrot.slane %v3991_v45, %v7588_v46  ;;  %v7820_v51 = vrot.slane %v5206_v61, %v7588_v46  ;;  %v4132_v23 = vadd.f32 %v7730_v15, %v7800_v56  ;;  %v6390_v45 = vld [vmem:[%s10358_s7] sm:$0xf] }
 0x131   : > { %10636 = vst [vmem:[#allocation35_spill] sm:$0xff] %v7807_v17  ;;  %10637 = vst [vmem:[#allocation36_spill] sm:$0xff] %v7810_v1  ;;  %v7826_v26 = vadd.f32 %v7679_v19, %v7807_v17  ;;  %v7829_v11 = vrot.slane %v5207_v50, %v7588_v46  ;;  %v5344_v21 = vadd.f32 %v7721_v63, %v4128_v53  ;;  %v1249_v56 = vmul.f32 0.5, %v7622_v14 }
 0x132   : > { %10638 = vst [vmem:[#allocation37_spill] sm:$0xff] %v7817_v55  ;;  %10639 = vst [vmem:[#allocation38_spill] sm:$0xff] %v7820_v51  ;;  %v7832_v29 = vrot.slane %v2924_v39, %v7588_v46  ;;  %v5348_v44 = vadd.f32 %v5182_v28, %v4128_v53  ;;  %v4140_v60 = vcombine.low %v4132_v23, %v7745_v27  ;;  %v1248_v28 = vmul.f32 0.5, %v7610_v2 }
 0x133   : > { %10640 = vst [vmem:[#allocation39_spill] sm:$0xff] %v7826_v26  ;;  %10641 = vst [vmem:[#allocation40_spill] sm:$0xff] %v7829_v11  ;;  %v2918_v15 = vadd.f32 %v2752_v37, %v7807_v17  ;;  %v4130_v61 = vadd.f32 %v7696_v40, %v7826_v26  ;;  %v4134_v50 = vadd.f32 %v3968_v52, %v7826_v26  ;;  %7180 = vmatpush1.msk.msra.mxu0 %vm419_vm0, %v5344_v21  ;;  %v10643_v21 = vmov 0.0  }
 0x134   : > { %v5356_v0 = vcombine.low %v5348_v44, %v7758_v41  ;;  %v7844_v39 = vadd.f32 %v5526_v12, %v4128_v53  ;;  %v4148_v38 = vrot.slane %v4140_v60, %v7588_v46  ;;  %7181 = vmatmul.mubr.msk.f32.vlgmr.msra.gmra.mxu0 %vm415_vm1, %v6390_v45  ;;  %v1250_v12 = vmul.f32 0.5, %v7613_v4 }
 0x135   : > { %v2925_v27 = vcombine.low %v2918_v15, %v7765_v48  ;;  %v4141_v37 = vcombine.low %v4134_v50, %v4135_v10  ;;  %v5346_v23 = vadd.f32 %v7726_v13, %v4130_v61  ;;  %v5350_v41 = vadd.f32 %v5184_v3, %v4130_v61  ;;  %6647 = vmatprep.mubr.f32.mxu0 %v10643_v21 }
 0x136   : > { %10642 = vst [vmem:[#allocation41_spill] sm:$0xff] %v7844_v39  ;;  %v5364_v52 = vrot.slane %v5356_v0, %v7588_v46  ;;  %v1251_v53 = vmul.f32 0.5, %v7625_v16  ;;  %v7859_v26 = vadd.f32 %v5528_v22, %v4130_v61  ;;  %v1256_v48 = vcombine.low %v1248_v28, %v1249_v56 }
 0x137   : > { %v2939_v44 = vrot.slane %v2925_v27, %v7588_v46  ;;  %v4155_v60 = vrot.slane %v4141_v37, %v7588_v46  ;;  %7183 = vmatpush1.msk.msra.mxu1 %vm419_vm0, %v5346_v23  ;;  %v5357_v10 = vcombine.low %v5350_v41, %v7782_v34  ;;  %v1542_v3 = vmul.f32 0.5, %v7650_v54 }
 0x138   : > { %10644 = vst [vmem:[#allocation42_spill] sm:$0xff] %v7859_v26  ;;  %7184 = vmatmul.mubr.msk.f32.vlgmr.msra.gmra.mxu1 %vm415_vm1, %v6390_v45  ;;  %v1257_v0 = vcombine.low %v1250_v12, %v1251_v53  ;;  %v1543_v15 = vmul.f32 0.5, %v7660_v5  ;;  %v1544_v37 = vmul.f32 0.5, %v7663_v6  ;;  %v1264_v56 = vrot.slane %v1256_v48, %v7588_v46 }
 0x139   : > { %v2940_v50 = vcombine.low %v7832_v29, %v2939_v44  ;;  %v4156_v17 = vcombine.low %v4148_v38, %v4155_v60  ;;  %v4157_v27 = vcombine.high %v4148_v38, %v4155_v60  ;;  %6718 = vmatprep.mubr.f32.mxu1 %v10643_v21  ;;  %v5371_v22 = vrot.slane %v5357_v10, %v7588_v46 }
 0x13a   : > { %v1271_v34 = vrot.slane %v1257_v0, %v7588_v46  ;;  %v1545_v45 = vmul.f32 0.5, %v7666_v35  ;;  %v2941_v61 = vcombine.high %v7832_v29, %v2939_v44  ;;  %v1550_v38 = vcombine.low %v1542_v3, %v1543_v15 }
 0x13b   : > { %v7875_v28 = vrot.slane %v4156_v17, %v7588_v46  ;;  %v7878_v23 = vrot.slane %v4157_v27, %v7588_v46  ;;  %v5372_v41 = vcombine.low %v5364_v52, %v5371_v22  ;;  %v5373_v12 = vcombine.high %v5364_v52, %v5371_v22 }
 0x13c   : > { %v1272_v53 = vcombine.low %v1264_v56, %v1271_v34  ;;  %v1273_v60 = vcombine.high %v1264_v56, %v1271_v34  ;;  %v1551_v10 = vcombine.low %v1544_v37, %v1545_v45  ;;  %v7881_v48 = vrot.slane %v1550_v38, %v7588_v46 }
 0x13d   : > { %10645 = vst [vmem:[#allocation43_spill] sm:$0xff] %v7875_v28  ;;  %10646 = vst [vmem:[#allocation44_spill] sm:$0xff] %v7878_v23  ;;  %v1708_v0 = vadd.f32 %v1542_v3, %v7610_v2  ;;  %v1709_v26 = vadd.f32 %v1543_v15, %v7622_v14  ;;  %v7886_v29 = vrot.slane %v5372_v41, %v7588_v46 }
 0x13e   : > { %10647 = vst [vmem:[#allocation45_spill] sm:$0xff] %v7881_v48  ;;  %v7889_v17 = vrot.slane %v1272_v53, %v7588_v46  ;;  %v7892_v44 = vrot.slane %v1273_v60, %v7588_v46  ;;  %v1710_v52 = vadd.f32 %v1544_v37, %v7613_v4  ;;  %v7896_v27 = vrot.slane %v5373_v12, %v7588_v46 }
 0x13f   : > { %10648 = vst [vmem:[#allocation46_spill] sm:$0xff] %v7886_v29  ;;  %v1711_v22 = vadd.f32 %v1545_v45, %v7625_v16  ;;  %v1716_v56 = vcombine.low %v1708_v0, %v1709_v26  ;;  %v7900_v3 = vrot.slane %v2940_v50, %v7588_v46  ;;  %v7911_v38 = vrot.slane %v1551_v10, %v7588_v46 }
 0x140   : > { %10649 = vst [vmem:[#allocation47_spill] sm:$0xff] %v7896_v27  ;;  %v7904_v15 = vcombine.high %v7889_v17, %v7889_v17  ;;  %v7908_v34 = vcombine.high %v7892_v44, %v7892_v44  ;;  %v7914_v37 = vrot.slane %v2941_v61, %v7588_v46  ;;  %v7923_v45 = vcombine.high %v7875_v28, %v7875_v28 }
 0x141   : > { %10650 = vst [vmem:[#allocation48_spill] sm:$0xff] %v7911_v38  ;;  %v1717_v41 = vcombine.low %v1710_v52, %v1711_v22  ;;  %v1724_v26 = vrot.slane %v1716_v56, %v7588_v46  ;;  %v7919_v50 = vcombine.high %v7900_v3, %v7900_v3 }
 0x142   : > { %v1325_v12 = vrot.slane %v7904_v15, %v7591_v47  ;;  %v1329_v53 = vrot.slane %v7904_v15, %v7602_v58  ;;  %v1341_v61 = vrot.slane %v7908_v34, %v7591_v47  ;;  %v1345_v60 = vrot.slane %v7908_v34, %v7602_v58 }
 0x143   : > { %v1731_v10 = vrot.slane %v1717_v41, %v7588_v46  ;;  %v7936_v0 = vcombine.high %v7914_v37, %v7914_v37  ;;  %v2993_v52 = vrot.slane %v7919_v50, %v7591_v47  ;;  %v2997_v22 = vrot.slane %v7919_v50, %v7602_v58 }
 0x144   : > { %v1378_v56 = vmul.f32 %v1325_v12, %v7610_v2  ;;  %v1379_v39 = vmul.f32 %v1329_v53, %v7622_v14  ;;  %v1382_v42 = vmul.f32 %v1341_v61, %v7610_v2  ;;  %v1383_v33 = vmul.f32 %v1345_v60, %v7622_v14 }
 0x145   : > { %v1732_v62 = vcombine.low %v1724_v26, %v1731_v10  ;;  %v1733_v41 = vcombine.high %v1724_v26, %v1731_v10  ;;  %v3009_v43 = vrot.slane %v7936_v0, %v7591_v47  ;;  %v3013_v11 = vrot.slane %v7936_v0, %v7602_v58 }
 0x146   : > { %v1406_v51 = vcombine.low %v1378_v56, %v1379_v39  ;;  %v7950_v36 = vcombine.low %v1378_v56, %v1382_v42  ;;  %v7952_v55 = vcombine.low %v1379_v39, %v1383_v33  ;;  %v7956_v12 = vcombine.high %v7878_v23, %v7878_v23 }
 0x147   : > { %v7959_v53 = vrot.slane %v1732_v62, %v7588_v46  ;;  %v7962_v26 = vrot.slane %v1733_v41, %v7588_v46  ;;  %v3046_v61 = vmul.f32 %v2993_v52, %v7669_v9  ;;  %v3047_v60 = vmul.f32 %v2997_v22, %v7676_v18 }
 0x148   : > { %10651 = vst [vmem:[#allocation49_spill] sm:$0xff] %v7950_v36  ;;  %10652 = vst [vmem:[#allocation50_spill] sm:$0xff] %v7952_v55  ;;  %v1408_v10 = vcombine.low %v1382_v42, %v1383_v33  ;;  %v7967_v56 = vrot.slane %v1406_v51, %v7588_v46  ;;  %v3050_v39 = vmul.f32 %v3009_v43, %v7669_v9 }
 0x149   : > { %v3051_v36 = vmul.f32 %v3013_v11, %v7676_v18  ;;  %v7973_v1 = vcombine.high %v7959_v53, %v7959_v53  ;;  %v7977_v62 = vcombine.high %v7962_v26, %v7962_v26  ;;  %v3074_v41 = vcombine.low %v3046_v61, %v3047_v60 }
 0x14a   : > { %v4209_v52 = vrot.slane %v7923_v45, %v7591_v47  ;;  %v4213_v42 = vrot.slane %v7923_v45, %v7602_v58  ;;  %v4225_v43 = vrot.slane %v7956_v12, %v7591_v47  ;;  %v4229_v11 = vrot.slane %v7956_v12, %v7602_v58 }
 0x14b   : > { %v3076_v33 = vcombine.low %v3050_v39, %v3051_v36  ;;  %v1785_v22 = vrot.slane %v7973_v1, %v7591_v47  ;;  %v1789_v25 = vrot.slane %v7973_v1, %v7602_v58  ;;  %v1801_v61 = vrot.slane %v7977_v62, %v7591_v47 }
 0x14c   : > { %v1805_v36 = vrot.slane %v7977_v62, %v7602_v58  ;;  %v4262_v60 = vmul.f32 %v4209_v52, %v7689_v32  ;;  %v4263_v39 = vmul.f32 %v4213_v42, %v7713_v7  ;;  %v4266_v31 = vmul.f32 %v4225_v43, %v7689_v32 }
 0x14d   : > { %v4267_v49 = vmul.f32 %v4229_v11, %v7713_v7  ;;  %v1838_v21 = vmul.f32 %v1785_v22, %v7650_v54  ;;  %v1839_v55 = vmul.f32 %v1789_v25, %v7660_v5  ;;  %v1842_v48 = vmul.f32 %v1801_v61, %v7650_v54 }
 0x14e   : > { %v1843_v38 = vmul.f32 %v1805_v36, %v7660_v5  ;;  %v4290_v23 = vcombine.low %v4262_v60, %v4263_v39  ;;  %v8005_v18 = vcombine.high %v7886_v29, %v7886_v29  ;;  %v8009_v52 = vcombine.high %v7896_v27, %v7896_v27 }
 0x14f   : > { %v4292_v28 = vcombine.low %v4266_v31, %v4267_v49  ;;  %v1866_v42 = vcombine.low %v1838_v21, %v1839_v55  ;;  %v1333_v11 = vrot.slane %v7904_v15, %v7605_v59  ;;  %v1337_v25 = vrot.slane %v7904_v15, %v7653_v57 }
 0x150   : > { %v1868_v43 = vcombine.low %v1842_v48, %v1843_v38  ;;  %v5425_v22 = vrot.slane %v8005_v18, %v7591_v47  ;;  %v5429_v49 = vrot.slane %v8005_v18, %v7602_v58  ;;  %v5441_v31 = vrot.slane %v8009_v52, %v7591_v47 }
 0x151   : > { %v5445_v61 = vrot.slane %v8009_v52, %v7602_v58  ;;  %v1882_v55 = vadd.f32 %v1866_v42, %v1406_v51  ;;  %v1349_v48 = vrot.slane %v7908_v34, %v7605_v59  ;;  %v1353_v15 = vrot.slane %v7908_v34, %v7653_v57 }
 0x152   : > { %v1884_v21 = vadd.f32 %v1868_v43, %v1408_v10  ;;  %v5478_v38 = vmul.f32 %v5425_v22, %v7721_v63  ;;  %v5479_v36 = vmul.f32 %v5429_v49, %v7734_v20  ;;  %v5482_v60 = vmul.f32 %v5441_v31, %v7721_v63 }
 0x153   : > { %v5483_v39 = vmul.f32 %v5445_v61, %v7734_v20  ;;  %v8032_v27 = vrot.slane %v1408_v10, %v7588_v46  ;;  %v3090_v29 = vadd.f32 %v3074_v41, %v1882_v55  ;;  %v8035_v42 = vrot.slane %v1882_v55, %v7588_v46 }
 0x154   : > { %v3092_v51 = vadd.f32 %v3076_v33, %v1884_v21  ;;  %v5506_v43 = vcombine.low %v5478_v38, %v5479_v36  ;;  %v1380_v34 = vmul.f32 %v1333_v11, %v7613_v4  ;;  %v1381_v22 = vmul.f32 %v1337_v25, %v7625_v16 }
 0x155   : > { %v5508_v7 = vcombine.low %v5482_v60, %v5483_v39  ;;  %v8040_v49 = vrot.slane %v1884_v21, %v7588_v46  ;;  %v4306_v31 = vadd.f32 %v4290_v23, %v3090_v29  ;;  %v8043_v61 = vrot.slane %v3090_v29, %v7588_v46 }
 0x156   : > { %v4308_v63 = vadd.f32 %v4292_v28, %v3092_v51  ;;  %v1384_v10 = vmul.f32 %v1349_v48, %v7613_v4  ;;  %v1385_v41 = vmul.f32 %v1353_v15, %v7625_v16  ;;  %v1407_v33 = vcombine.low %v1380_v34, %v1381_v22 }
 0x157   : > { %v1793_v55 = vrot.slane %v7973_v1, %v7605_v59  ;;  %v8050_v11 = vrot.slane %v3092_v51, %v7588_v46  ;;  %v8052_v25 = vadd.f32 %v5506_v43, %v4306_v31  ;;  %v8057_v28 = vrot.slane %v4306_v31, %v7588_v46 }
 0x158   : > { %v8054_v21 = vadd.f32 %v5508_v7, %v4308_v63  ;;  %v1409_v23 = vcombine.low %v1384_v10, %v1385_v41  ;;  %v8059_v29 = vcombine.low %v1380_v34, %v1384_v10  ;;  %v8061_v48 = vcombine.low %v1381_v22, %v1385_v41 }
 0x159   : > { %v1797_v15 = vrot.slane %v7973_v1, %v7653_v57  ;;  %v1809_v36 = vrot.slane %v7977_v62, %v7605_v59  ;;  %v1813_v7 = vrot.slane %v7977_v62, %v7653_v57  ;;  %v1840_v60 = vmul.f32 %v1793_v55, %v7663_v6 }
 0x15a   : > { %10653 = vst [vmem:[#allocation51_spill] sm:$0xff] %v8059_v29  ;;  %10654 = vst [vmem:[#allocation52_spill] sm:$0xff] %v8061_v48  ;;  %v6568_v38 = vcombine.high %v8052_v25, %v8054_v21  ;;  %v2115_v51 = vrot.slane %v1407_v33, %v7588_v46  ;;  %v2147_v43 = vrot.slane %v1409_v23, %v7588_v46 }
 0x15b   : > { %v1841_v39 = vmul.f32 %v1797_v15, %v7666_v35  ;;  %v3001_v1 = vrot.slane %v7919_v50, %v7605_v59  ;;  %v1844_v34 = vmul.f32 %v1809_v36, %v7663_v6  ;;  %v1845_v22 = vmul.f32 %v1813_v7, %v7666_v35 }
 0x15c   : > { %6611 = vmatprep.subr.mxu0 %v6568_v38  ;;  %v3005_v31 = vrot.slane %v7919_v50, %v7653_v57  ;;  %v3017_v62 = vrot.slane %v7936_v0, %v7605_v59  ;;  %v2116_v41 = vcombine.low %v7967_v56, %v2115_v51  ;;  %v2117_v55 = vcombine.high %v7967_v56, %v2115_v51 }
 0x15d   : > { %v1867_v10 = vcombine.low %v1840_v60, %v1841_v39  ;;  %v2148_v15 = vcombine.low %v8032_v27, %v2147_v43  ;;  %v8087_v29 = vrot.slane %v4308_v63, %v7588_v46  ;;  %v1869_v38 = vcombine.low %v1844_v34, %v1845_v22 }
 0x15e   : > { %v3021_v36 = vrot.slane %v7936_v0, %v7653_v57  ;;  %v3048_v7 = vmul.f32 %v3001_v1, %v7679_v19  ;;  %v8093_v48 = vrot.slane %v2116_v41, %v7588_v46  ;;  %v8096_v60 = vrot.slane %v2117_v55, %v7588_v46 }
 0x15f   : > { %v1883_v50 = vadd.f32 %v1867_v10, %v1407_v33  ;;  %v2149_v56 = vcombine.high %v8032_v27, %v2147_v43  ;;  %v1885_v39 = vadd.f32 %v1869_v38, %v1409_v23  ;;  %v8100_v51 = vrot.slane %v2148_v15, %v7588_v46 }
 0x160   : > { %10655 = vst [vmem:[#allocation53_spill] sm:$0xff] %v8093_v48  ;;  %10656 = vst [vmem:[#allocation54_spill] sm:$0xff] %v8096_v60  ;;  %v3049_v63 = vmul.f32 %v3005_v31, %v7686_v30  ;;  %v3052_v34 = vmul.f32 %v3017_v62, %v7679_v19  ;;  %v3053_v0 = vmul.f32 %v3021_v36, %v7686_v30 }
 0x161   : > { %v3331_v33 = vrot.slane %v1883_v50, %v7588_v46  ;;  %v4217_v1 = vrot.slane %v7923_v45, %v7605_v59  ;;  %v4221_v22 = vrot.slane %v7923_v45, %v7653_v57  ;;  %v3363_v27 = vrot.slane %v1885_v39, %v7588_v46 }
 0x162   : > { %v3075_v10 = vcombine.low %v3048_v7, %v3049_v63  ;;  %v4233_v23 = vrot.slane %v7956_v12, %v7605_v59  ;;  %v4237_v43 = vrot.slane %v7956_v12, %v7653_v57  ;;  %v3077_v31 = vcombine.low %v3052_v34, %v3053_v0 }
 0x163   : > { %v3332_v62 = vcombine.low %v8035_v42, %v3331_v33  ;;  %v3333_v41 = vcombine.high %v8035_v42, %v3331_v33  ;;  %v4264_v55 = vmul.f32 %v4217_v1, %v7696_v40  ;;  %v8119_v15 = vrot.slane %v2149_v56, %v7588_v46 }
 0x164   : > { %v3091_v45 = vadd.f32 %v3075_v10, %v1883_v50  ;;  %v3364_v38 = vcombine.low %v8040_v49, %v3363_v27  ;;  %v4265_v36 = vmul.f32 %v4221_v22, %v7716_v8  ;;  %v3093_v7 = vadd.f32 %v3077_v31, %v1885_v39 }
 0x165   : > { %v8124_v63 = vrot.slane %v3332_v62, %v7588_v46  ;;  %v3365_v12 = vcombine.high %v8040_v49, %v3363_v27  ;;  %v4268_v34 = vmul.f32 %v4233_v23, %v7696_v40  ;;  %v8129_v42 = vrot.slane %v3333_v41, %v7588_v46 }
 0x166   : > { %v8132_v0 = vrot.slane %v3364_v38, %v7588_v46  ;;  %v4269_v50 = vmul.f32 %v4237_v43, %v7716_v8  ;;  %v4291_v56 = vcombine.low %v4264_v55, %v4265_v36  ;;  %v4547_v33 = vrot.slane %v3091_v45, %v7588_v46 }
 0x167   : > { %10657 = vst [vmem:[#allocation55_spill] sm:$0xff] %v8124_v63  ;;  %10658 = vst [vmem:[#allocation56_spill] sm:$0xff] %v8129_v42  ;;  %v4579_v39 = vrot.slane %v3093_v7, %v7588_v46  ;;  %v5433_v1 = vrot.slane %v8005_v18, %v7605_v59  ;;  %v5437_v49 = vrot.slane %v8005_v18, %v7653_v57  ;;  %v10672_v63 = vld [vmem:[#allocation44_spill] sm:$0xff] }
 0x168   : > { %v4293_v22 = vcombine.low %v4268_v34, %v4269_v50  ;;  %v4307_v10 = vadd.f32 %v4291_v56, %v3091_v45  ;;  %v5449_v27 = vrot.slane %v8009_v52, %v7605_v59  ;;  %v5453_v23 = vrot.slane %v8009_v52, %v7653_v57 }
 0x169   : > { %v8146_v43 = vrot.slane %v3365_v12, %v7588_v46  ;;  %v4548_v31 = vcombine.low %v8043_v61, %v4547_v33  ;;  %v4549_v62 = vcombine.high %v8043_v61, %v4547_v33  ;;  %v4580_v41 = vcombine.low %v8050_v11, %v4579_v39 }
 0x16a   : > { %v4309_v55 = vadd.f32 %v4293_v22, %v3093_v7  ;;  %v5480_v18 = vmul.f32 %v5433_v1, %v7726_v13  ;;  %v5481_v45 = vmul.f32 %v5437_v49, %v7740_v24  ;;  %v5484_v38 = vmul.f32 %v5449_v27, %v7726_v13 }
 0x16b   : > { %10659 = vst [vmem:[#allocation57_spill] sm:$0xff] %v8146_v43  ;;  %v8155_v36 = vrot.slane %v4548_v31, %v7588_v46  ;;  %v8158_v52 = vrot.slane %v4549_v62, %v7588_v46  ;;  %v4581_v12 = vcombine.high %v8050_v11, %v4579_v39  ;;  %v8162_v34 = vrot.slane %v4580_v41, %v7588_v46 }
 0x16c   : > { %v5485_v61 = vmul.f32 %v5453_v23, %v7740_v24  ;;  %v5507_v7 = vcombine.low %v5480_v18, %v5481_v45  ;;  %v5763_v50 = vrot.slane %v4307_v10, %v7588_v46  ;;  %v5795_v56 = vrot.slane %v4309_v55, %v7588_v46 }
 0x16d   : > { %10660 = vst [vmem:[#allocation58_spill] sm:$0xff] %v8155_v36  ;;  %10661 = vst [vmem:[#allocation59_spill] sm:$0xff] %v8158_v52  ;;  %v6567_v33 = vcombine.low %v8052_v25, %v8054_v21  ;;  %v1293_v1 = vrot.slane %v7889_v17, %v7591_v47  ;;  %v1297_v49 = vrot.slane %v7889_v17, %v7602_v58 }
 0x16e   : > { %10662 = vst [vmem:[#allocation60_spill] sm:$0xff] %v8162_v34  ;;  %v1309_v11 = vrot.slane %v7892_v44, %v7591_v47  ;;  %v5509_v39 = vcombine.low %v5484_v38, %v5485_v61  ;;  %v5523_v22 = vadd.f32 %v5507_v7, %v4307_v10  ;;  %v5764_v27 = vcombine.low %v8057_v28, %v5763_v50 }
 0x16f   : > { %v5765_v23 = vcombine.high %v8057_v28, %v5763_v50  ;;  %v5796_v31 = vcombine.low %v8087_v29, %v5795_v56  ;;  %v5797_v62 = vcombine.high %v8087_v29, %v5795_v56  ;;  %6612 = vmatpush1.msra.mxu0 %v6567_v33  ;;  %v1313_v25 = vrot.slane %v7892_v44, %v7602_v58 }
 0x170   : > { %v1370_v21 = vmul.f32 %v1293_v1, %v7610_v2  ;;  %v8183_v41 = vrot.slane %v4581_v12, %v7588_v46  ;;  %v5525_v18 = vadd.f32 %v5509_v39, %v4309_v55  ;;  %v8186_v10 = vrot.slane %v5764_v27, %v7588_v46 }
 0x171   : > { %v1371_v45 = vmul.f32 %v1297_v49, %v7622_v14  ;;  %v8190_v28 = vrot.slane %v5765_v23, %v7588_v46  ;;  %v8193_v29 = vrot.slane %v5796_v31, %v7588_v46  ;;  %v1374_v38 = vmul.f32 %v1309_v11, %v7610_v2 }
 0x172   : > { %10663 = vst [vmem:[#allocation61_spill] sm:$0xff] %v8183_v41  ;;  %10664 = vst [vmem:[#allocation62_spill] sm:$0xff] %v8186_v10  ;;  %v1375_v61 = vmul.f32 %v1313_v25, %v7622_v14  ;;  %v6570_v7 = vcombine.high %v5523_v22, %v5525_v18  ;;  %v6569_v50 = vcombine.low %v5523_v22, %v5525_v18 }
 0x173   : > { %10665 = vst [vmem:[#allocation63_spill] sm:$0xff] %v8190_v28  ;;  %10666 = vst [vmem:[#allocation64_spill] sm:$0xff] %v8193_v29  ;;  %v1402_v12 = vcombine.low %v1370_v21, %v1371_v45  ;;  %v1753_v55 = vrot.slane %v7959_v53, %v7591_v47  ;;  %v8200_v56 = vrot.slane %v5797_v62, %v7588_v46 }
 0x174   : > { %v8202_v33 = vcombine.low %v1370_v21, %v1374_v38  ;;  %v8204_v1 = vcombine.low %v1371_v45, %v1375_v61  ;;  %v1757_v49 = vrot.slane %v7959_v53, %v7602_v58  ;;  %6682 = vmatprep.subr.mxu1 %v6570_v7  ;;  %v1404_v11 = vcombine.low %v1374_v38, %v1375_v61 }
 0x175   : > { %10667 = vst [vmem:[#allocation65_spill] sm:$0xff] %v8200_v56  ;;  %v1769_v39 = vrot.slane %v7962_v26, %v7591_v47  ;;  %v1773_v22 = vrot.slane %v7962_v26, %v7602_v58  ;;  %v1830_v27 = vmul.f32 %v1753_v55, %v7650_v54  ;;  %6683 = vmatpush1.msra.mxu1 %v6569_v50  ;;  %v10670_v50 = vld [vmem:[#allocation17_spill] sm:$0xff] }
 0x176   : > { %10668 = vst [vmem:[#allocation66_spill] sm:$0xff] %v8202_v33  ;;  %10669 = vst [vmem:[#allocation67_spill] sm:$0xff] %v8204_v1  ;;  %v1831_v23 = vmul.f32 %v1757_v49, %v7660_v5  ;;  %v8215_v31 = vrot.slane %v1402_v12, %v7588_v46  ;;  %v2961_v62 = vrot.slane %v7900_v3, %v7591_v47  ;;  %v10671_v49 = vld [vmem:[#allocation43_spill] sm:$0xff] }
 0x177   : > { %v2965_v25 = vrot.slane %v7900_v3, %v7602_v58  ;;  %v1834_v21 = vmul.f32 %v1769_v39, %v7650_v54  ;;  %v1835_v18 = vmul.f32 %v1773_v22, %v7660_v5  ;;  %v2977_v45 = vrot.slane %v7914_v37, %v7591_v47 }
 0x178   : > { %v2981_v38 = vrot.slane %v7914_v37, %v7602_v58  ;;  %v1862_v61 = vcombine.low %v1830_v27, %v1831_v23  ;;  %v3038_v7 = vmul.f32 %v2961_v62, %v7669_v9  ;;  %v4177_v28 = vrot.slane %v10671_v49, %v7591_v47 }
 0x179   : > { %v3039_v55 = vmul.f32 %v2965_v25, %v10670_v50  ;;  %v1864_v10 = vcombine.low %v1834_v21, %v1835_v18  ;;  %v3042_v52 = vmul.f32 %v2977_v45, %v7669_v9  ;;  %v4181_v22 = vrot.slane %v10671_v49, %v7602_v58  ;;  %v10673_v21 = vld [vmem:[#allocation20_spill] sm:$0xff] }
 0x17a   : > { %v3043_v39 = vmul.f32 %v2981_v38, %v10670_v50  ;;  %v1878_v36 = vadd.f32 %v1862_v61, %v1402_v12  ;;  %v4193_v27 = vrot.slane %v10672_v63, %v7591_v47  ;;  %v4197_v23 = vrot.slane %v10672_v63, %v7602_v58 }
 0x17b   : > { %v3070_v42 = vcombine.low %v3038_v7, %v3039_v55  ;;  %v1880_v62 = vadd.f32 %v1864_v10, %v1404_v11  ;;  %v4254_v60 = vmul.f32 %v4177_v28, %v7689_v32  ;;  %v4255_v18 = vmul.f32 %v4181_v22, %v10673_v21  ;;  %v10674_v10 = vld [vmem:[#allocation46_spill] sm:$0xff] }
 0x17c   : > { %v3072_v25 = vcombine.low %v3042_v52, %v3043_v39  ;;  %v8242_v45 = vrot.slane %v1404_v11, %v7588_v46  ;;  %v4258_v48 = vmul.f32 %v4193_v27, %v7689_v32  ;;  %v4259_v12 = vmul.f32 %v4197_v23, %v10673_v21 }
 0x17d   : > { %v3086_v38 = vadd.f32 %v3070_v42, %v1878_v36  ;;  %v8247_v7 = vrot.slane %v1878_v36, %v7588_v46  ;;  %v4286_v55 = vcombine.low %v4254_v60, %v4255_v18  ;;  %v5393_v52 = vrot.slane %v10674_v10, %v7591_v47  ;;  %v10675_v42 = vld [vmem:[#allocation47_spill] sm:$0xff]  ;;  %v10676_v36 = vld [vmem:[#allocation22_spill] sm:$0xff] }
 0x17e   : > { %v3088_v61 = vadd.f32 %v3072_v25, %v1880_v62  ;;  %v8252_v28 = vrot.slane %v1880_v62, %v7588_v46  ;;  %v4288_v39 = vcombine.low %v4258_v48, %v4259_v12  ;;  %v5397_v11 = vrot.slane %v10674_v10, %v7602_v58 }
 0x17f   : > { %v5409_v22 = vrot.slane %v10675_v42, %v7591_v47  ;;  %v4302_v27 = vadd.f32 %v4286_v55, %v3086_v38  ;;  %v8259_v23 = vrot.slane %v3086_v38, %v7588_v46  ;;  %v5413_v60 = vrot.slane %v10675_v42, %v7602_v58 }
 0x180   : > { %v5470_v25 = vmul.f32 %v5393_v52, %v10676_v36  ;;  %v8265_v18 = vrot.slane %v3088_v61, %v7588_v46  ;;  %v5471_v48 = vmul.f32 %v5397_v11, %v7734_v20  ;;  %v1301_v12 = vrot.slane %v7889_v17, %v7605_v59 }
 0x181   : > { %v5474_v62 = vmul.f32 %v5409_v22, %v10676_v36  ;;  %v4304_v33 = vadd.f32 %v4288_v39, %v3088_v61  ;;  %v5475_v55 = vmul.f32 %v5413_v60, %v7734_v20  ;;  %v1305_v38 = vrot.slane %v7889_v17, %v7653_v57 }
 0x182   : > { %v1317_v1 = vrot.slane %v7892_v44, %v7605_v59  ;;  %v5502_v52 = vcombine.low %v5470_v25, %v5471_v48  ;;  %v8277_v32 = vrot.slane %v4302_v27, %v7588_v46  ;;  %v1321_v11 = vrot.slane %v7892_v44, %v7653_v57 }
 0x183   : > { %v1372_v22 = vmul.f32 %v1301_v12, %v7613_v4  ;;  %v5504_v36 = vcombine.low %v5474_v62, %v5475_v55  ;;  %v1373_v61 = vmul.f32 %v1305_v38, %v7625_v16  ;;  %v1761_v17 = vrot.slane %v7959_v53, %v7605_v59 }
 0x184   : > { %10677 = vst [vmem:[#allocation17_spill] sm:$0xff] %v8277_v32  ;;  %v1376_v39 = vmul.f32 %v1317_v1, %v7613_v4  ;;  %v8286_v60 = vadd.f32 %v5502_v52, %v4302_v27  ;;  %v1377_v25 = vmul.f32 %v1321_v11, %v7625_v16  ;;  %v1765_v48 = vrot.slane %v7959_v53, %v7653_v57 }
 0x185   : > { %v1777_v44 = vrot.slane %v7962_v26, %v7605_v59  ;;  %v8293_v9 = vadd.f32 %v5504_v36, %v4304_v33  ;;  %v1403_v62 = vcombine.low %v1372_v22, %v1373_v61  ;;  %v1781_v1 = vrot.slane %v7962_v26, %v7653_v57 }
 0x186   : > { %v8295_v12 = vcombine.low %v1372_v22, %v1376_v39  ;;  %v1405_v55 = vcombine.low %v1376_v39, %v1377_v25  ;;  %v8299_v38 = vcombine.low %v1373_v61, %v1377_v25  ;;  %v1832_v27 = vmul.f32 %v1761_v17, %v7663_v6 }
 0x187   : > { %v1833_v52 = vmul.f32 %v1765_v48, %v7666_v35  ;;  %v6564_v53 = vcombine.high %v8286_v60, %v8293_v9  ;;  %v1836_v11 = vmul.f32 %v1777_v44, %v7663_v6  ;;  %v1837_v36 = vmul.f32 %v1781_v1, %v7666_v35 }
 0x188   : > { %10678 = vst [vmem:[#allocation43_spill] sm:$0xff] %v8295_v12  ;;  %10679 = vst [vmem:[#allocation44_spill] sm:$0xff] %v8299_v38  ;;  %v2051_v22 = vrot.slane %v1403_v62, %v7588_v46  ;;  %v2083_v4 = vrot.slane %v1405_v55, %v7588_v46  ;;  %v2969_v26 = vrot.slane %v7900_v3, %v7605_v59 }
 0x189   : > { %v1863_v12 = vcombine.low %v1832_v27, %v1833_v52  ;;  %v2973_v61 = vrot.slane %v7900_v3, %v7653_v57  ;;  %6613 = vmatprep.subr.mxu0 %v6564_v53  ;;  %v1865_v39 = vcombine.low %v1836_v11, %v1837_v36  ;;  %v2985_v48 = vrot.slane %v7914_v37, %v7605_v59 }
 0x18a   : > { %v2052_v17 = vcombine.low %v8215_v31, %v2051_v22  ;;  %v2053_v25 = vcombine.high %v8215_v31, %v2051_v22  ;;  %v2084_v1 = vcombine.low %v8242_v45, %v2083_v4  ;;  %v2085_v27 = vcombine.high %v8242_v45, %v2083_v4 }
 0x18b   : > { %v1879_v44 = vadd.f32 %v1863_v12, %v1403_v62  ;;  %v2989_v52 = vrot.slane %v7914_v37, %v7653_v57  ;;  %v8322_v38 = vrot.slane %v4304_v33, %v7588_v46  ;;  %v1881_v3 = vadd.f32 %v1865_v39, %v1405_v55 }
 0x18c   : > { %v8325_v53 = vrot.slane %v2052_v17, %v7588_v46  ;;  %v3040_v31 = vmul.f32 %v2969_v26, %v7679_v19  ;;  %v8329_v11 = vrot.slane %v2053_v25, %v7588_v46  ;;  %v8332_v62 = vrot.slane %v2084_v1, %v7588_v46 }
 0x18d   : > { %v3041_v4 = vmul.f32 %v2973_v61, %v7686_v30  ;;  %v3044_v45 = vmul.f32 %v2985_v48, %v7679_v19  ;;  %v3045_v37 = vmul.f32 %v2989_v52, %v7686_v30  ;;  %v3267_v33 = vrot.slane %v1879_v44, %v7588_v46 }
 0x18e   : > { %10680 = vst [vmem:[#allocation46_spill] sm:$0xff] %v8325_v53  ;;  %10681 = vst [vmem:[#allocation47_spill] sm:$0xff] %v8329_v11  ;;  %v3299_v12 = vrot.slane %v1881_v3, %v7588_v46  ;;  %v4185_v55 = vrot.slane %v10671_v49, %v7605_v59  ;;  %v4189_v22 = vrot.slane %v10671_v49, %v7653_v57 }
 0x18f   : > { %10682 = vst [vmem:[#allocation68_spill] sm:$0xff] %v8332_v62  ;;  %v3071_v36 = vcombine.low %v3040_v31, %v3041_v4  ;;  %v4201_v26 = vrot.slane %v10672_v63, %v7605_v59  ;;  %v4205_v61 = vrot.slane %v10672_v63, %v7653_v57  ;;  %v3073_v39 = vcombine.low %v3044_v45, %v3045_v37 }
 0x190   : > { %v3268_v17 = vcombine.low %v8247_v7, %v3267_v33  ;;  %v3269_v25 = vcombine.high %v8247_v7, %v3267_v33  ;;  %v3300_v48 = vcombine.low %v8252_v28, %v3299_v12  ;;  %v3301_v52 = vcombine.high %v8252_v28, %v3299_v12 }
 0x191   : > { %v3087_v1 = vadd.f32 %v3071_v36, %v1879_v44  ;;  %v4256_v31 = vmul.f32 %v4185_v55, %v7696_v40  ;;  %v4257_v49 = vmul.f32 %v4189_v22, %v7716_v8  ;;  %v8354_v4 = vrot.slane %v2085_v27, %v7588_v46 }
 0x192   : > { %v3089_v11 = vadd.f32 %v3073_v39, %v1881_v3  ;;  %v8357_v63 = vrot.slane %v3268_v17, %v7588_v46  ;;  %v8360_v45 = vrot.slane %v3269_v25, %v7588_v46  ;;  %v8363_v7 = vrot.slane %v3300_v48, %v7588_v46 }
 0x193   : > { %10683 = vst [vmem:[#allocation69_spill] sm:$0xff] %v8354_v4  ;;  %v4260_v44 = vmul.f32 %v4201_v26, %v7696_v40  ;;  %v4261_v28 = vmul.f32 %v4205_v61, %v7716_v8  ;;  %v4287_v37 = vcombine.low %v4256_v31, %v4257_v49  ;;  %v4483_v33 = vrot.slane %v3087_v1, %v7588_v46 }
 0x194   : > { %10684 = vst [vmem:[#allocation70_spill] sm:$0xff] %v8357_v63  ;;  %10685 = vst [vmem:[#allocation71_spill] sm:$0xff] %v8360_v45  ;;  %v4515_v27 = vrot.slane %v3089_v11, %v7588_v46  ;;  %v5401_v3 = vrot.slane %v10674_v10, %v7605_v59  ;;  %v5405_v12 = vrot.slane %v10674_v10, %v7653_v57 }
 0x195   : > { %10686 = vst [vmem:[#allocation72_spill] sm:$0xff] %v8363_v7  ;;  %v4289_v55 = vcombine.low %v4260_v44, %v4261_v28  ;;  %v4303_v36 = vadd.f32 %v4287_v37, %v3087_v1  ;;  %v5417_v22 = vrot.slane %v10675_v42, %v7605_v59  ;;  %v5421_v26 = vrot.slane %v10675_v42, %v7653_v57  ;;  %v10709_v7 = vld [vmem:[#allocation37_spill] sm:$0xff] }
 0x196   : > { %v4484_v61 = vcombine.low %v8259_v23, %v4483_v33  ;;  %v4485_v39 = vcombine.high %v8259_v23, %v4483_v33  ;;  %v4516_v17 = vcombine.low %v8265_v18, %v4515_v27  ;;  %v4517_v25 = vcombine.high %v8265_v18, %v4515_v27  ;;  %v6554_v33 = vld [vmem:[%s10359_s8] sm:$0xf] }
 0x197   : > { %v4305_v48 = vadd.f32 %v4289_v55, %v3089_v11  ;;  %v5472_v31 = vmul.f32 %v5401_v3, %v7726_v13  ;;  %v5473_v10 = vmul.f32 %v5405_v12, %v7740_v24  ;;  %v5476_v1 = vmul.f32 %v5417_v22, %v7726_v13  ;;  %v10693_v3 = vld [vmem:[#allocation48_spill] sm:$0xff]  ;;  %v10694_v12 = vld [vmem:[#allocation45_spill] sm:$0xff] }
 0x198   : > { %v8385_v49 = vrot.slane %v3301_v52, %v7588_v46  ;;  %v8388_v42 = vrot.slane %v4484_v61, %v7588_v46  ;;  %v8391_v44 = vrot.slane %v4485_v39, %v7588_v46  ;;  %v8394_v23 = vrot.slane %v4516_v17, %v7588_v46 }
 0x199   : > { %v5477_v18 = vmul.f32 %v5421_v26, %v7740_v24  ;;  %v5503_v11 = vcombine.low %v5472_v31, %v5473_v10  ;;  %v8398_v28 = vrot.slane %v4303_v36, %v7588_v46  ;;  %v5731_v37 = vrot.slane %v4305_v48, %v7588_v46 }
 0x19a   : > { %10687 = vst [vmem:[#allocation73_spill] sm:$0xff] %v8385_v49  ;;  %10688 = vst [vmem:[#allocation74_spill] sm:$0xff] %v8388_v42  ;;  %v6563_v52 = vcombine.low %v8286_v60, %v8293_v9  ;;  %v8407_v27 = vmul.f32 0.33333334, %v7622_v14  ;;  %v1566_v55 = vcombine.low %v10694_v12, %v10693_v3  ;;  %v1567_v31 = vcombine.high %v10694_v12, %v10693_v3  ;;  %v10704_v42 = vld [vmem:[#allocation25_spill] sm:$0xff]  ;;  %v10707_v49 = vld [vmem:[#allocation36_spill] sm:$0xff] }
 0x19b   : > { %10689 = vst [vmem:[#allocation75_spill] sm:$0xff] %v8391_v44  ;;  %10690 = vst [vmem:[#allocation76_spill] sm:$0xff] %v8394_v23  ;;  %v5505_v22 = vcombine.low %v5476_v1, %v5477_v18  ;;  %v5519_v26 = vadd.f32 %v5503_v11, %v4303_v36  ;;  %v5700_v61 = vcombine.low %v8277_v32, %v8398_v28 }
 0x19c   : > { %10691 = vst [vmem:[#allocation77_spill] sm:$0xff] %v8398_v28  ;;  %10692 = vst [vmem:[#allocation78_spill] sm:$0xff] %v8407_v27  ;;  %v5732_v9 = vcombine.low %v8322_v38, %v5731_v37  ;;  %v5733_v60 = vcombine.high %v8322_v38, %v5731_v37  ;;  %6614 = vmatpush1.msra.mxu0 %v6563_v52  ;;  %v8419_v17 = vrot.slane %v8407_v27, %v7653_v57  ;;  %v10699_v37 = vld [vmem:[#allocation50_spill] sm:$0xff] }
 0x19d   : > { %v8424_v36 = vrot.slane %v4517_v25, %v7588_v46  ;;  %v5521_v10 = vadd.f32 %v5505_v22, %v4305_v48  ;;  %v8427_v1 = vrot.slane %v5700_v61, %v7588_v46  ;;  %7185 = vmatmul.mubr.msk.f32.vlgmr.msra.gmra.mxu0 %vm6579_vm2, %v6554_v33  ;;  %v8431_v18 = vrot.slane %v1566_v55, %v7588_v46 }
 0x19e   : > { %v8434_v38 = vrot.slane %v5732_v9, %v7588_v46  ;;  %v8437_v11 = vrot.slane %v5733_v60, %v7588_v46  ;;  %v1531_v52 = vmul.f32 %v10699_v37, %v8419_v17  ;;  %v8442_v25 = vrot.slane %v1567_v31, %v7588_v46  ;;  %v10701_v31 = vld [vmem:[#allocation31_spill] sm:$0xff] }
 0x19f   : > { %10695 = vst [vmem:[#allocation48_spill] sm:$0xff] %v8424_v36  ;;  %10696 = vst [vmem:[#allocation45_spill] sm:$0xff] %v8427_v1  ;;  %v10700_v48 = vmov 0.0   ;;  %v6566_v3 = vcombine.high %v5519_v26, %v5521_v10  ;;  %v6565_v12 = vcombine.low %v5519_v26, %v5521_v10  ;;  %v8447_v55 = vcombine.high %v8431_v18, %v8431_v18  ;;  %v10703_v1 = vld [vmem:[#allocation32_spill] sm:$0xff] }
 0x1a0   : > { %10697 = vst [vmem:[#allocation79_spill] sm:$0xff] %v8434_v38  ;;  %10698 = vst [vmem:[#allocation80_spill] sm:$0xff] %v8437_v11  ;;  %6798 = vmatprep.mubr.f32.mxu0 %v10700_v48  ;;  %v1887_v22 = vmul.f32 0.33333334, %v7660_v5  ;;  %v8452_v61 = vcombine.high %v8442_v25, %v8442_v25  ;;  %v8456_v9 = vcombine.high %v8100_v51, %v8100_v51 }
 0x1a1   : > { %v8460_v60 = vcombine.high %v8119_v15, %v8119_v15  ;;  %v8464_v26 = vcombine.high %v10701_v31, %v10701_v31  ;;  %6684 = vmatprep.subr.mxu1 %v6566_v3  ;;  %v1623_v10 = vrot.slane %v8447_v55, %v7602_v58  ;;  %v8473_v44 = vcombine.high %v10703_v1, %v10703_v1 }
 0x1a2   : > { %v8469_v39 = vadd.f32 %v1887_v22, %v7622_v14  ;;  %v8477_v45 = vrot.slane %v10704_v42, %v7653_v57  ;;  %6685 = vmatpush1.msra.mxu1 %v6565_v12  ;;  %v1639_v63 = vrot.slane %v8452_v61, %v7602_v58  ;;  %v2397_v3 = vrot.slane %v8456_v9, %v7602_v58 }
 0x1a3   : > { %v2413_v53 = vrot.slane %v8460_v60, %v7602_v58  ;;  %v2831_v14 = vrot.slane %v8464_v26, %v7602_v58  ;;  %7186 = vmatmul.mubr.msk.f32.vlgmr.msra.gmra.mxu1 %vm6579_vm2, %v6554_v33  ;;  %v1673_v22 = vmul.f32 %v1623_v10, %v7660_v5  ;;  %v2847_v12 = vrot.slane %v8473_v44, %v7602_v58 }
 0x1a4   : > { %10702 = vst [vmem:[#allocation31_spill] sm:$0xff] %v8469_v39  ;;  %10705 = vst [vmem:[#allocation32_spill] sm:$0xff] %v8477_v45  ;;  %v8491_v28 = vrot.slane %v8469_v39, %v7653_v57  ;;  %v8497_v32 = vcombine.high %v8132_v0, %v8132_v0  ;;  %v1677_v46 = vmul.f32 %v1639_v63, %v7660_v5  ;;  %6869 = vmatprep.mubr.f32.mxu1 %v10700_v48  ;;  %v10710_v48 = vld [vmem:[#allocation26_spill] sm:$0xff] }
 0x1a5   : > { %v2543_v11 = vmul.f32 %v2397_v3, %v7660_v5  ;;  %v2547_v38 = vmul.f32 %v2413_v53, %v7660_v5  ;;  %v2881_v33 = vmul.f32 %v2831_v14, %v10670_v50  ;;  %v2885_v10 = vmul.f32 %v2847_v12, %v10670_v50  ;;  %v10713_v39 = vld [vmem:[#allocation38_spill] sm:$0xff] }
 0x1a6   : > { %10706 = vst [vmem:[#allocation81_spill] sm:$0xff] %v8491_v28  ;;  %v8507_v36 = vcombine.high %v8146_v43, %v8146_v43  ;;  %v3613_v23 = vrot.slane %v8497_v32, %v7602_v58  ;;  %v8513_v63 = vcombine.high %v10707_v49, %v10707_v49  ;;  %v8515_v3 = vcombine.low %v1673_v22, %v1677_v46 }
 0x1a7   : > { %v7056_v53 = vcombine.low %v2543_v11, %v2547_v38  ;;  %v8519_v14 = vcombine.high %v10709_v7, %v10709_v7  ;;  %v8523_v12 = vrot.slane %v10710_v48, %v7653_v57  ;;  %v8525_v4 = vcombine.low %v2881_v33, %v2885_v10 }
 0x1a8   : > { %10708 = vst [vmem:[#allocation82_spill] sm:$0xff] %v8515_v3  ;;  %v3629_v62 = vrot.slane %v8507_v36, %v7602_v58  ;;  %v3759_v42 = vmul.f32 %v3613_v23, %v10670_v50  ;;  %v4047_v46 = vrot.slane %v8513_v63, %v7602_v58  ;;  %v2003_v38 = vmul.f32 %v8515_v3, %v8491_v28  ;;  %v10714_v28 = vld [vmem:[#allocation40_spill] sm:$0xff] }
 0x1a9   : > { %10711 = vst [vmem:[#allocation83_spill] sm:$0xff] %v8523_v12  ;;  %10712 = vst [vmem:[#allocation84_spill] sm:$0xff] %v8525_v4  ;;  %v4063_v11 = vrot.slane %v8519_v14, %v7602_v58  ;;  %v8538_v22 = vcombine.high %v8162_v34, %v8162_v34  ;;  %v8542_v33 = vcombine.high %v8183_v41, %v8183_v41 }
 0x1aa   : > { %v3211_v23 = vmul.f32 %v8525_v4, %v8477_v45  ;;  %v3763_v10 = vmul.f32 %v3629_v62, %v10670_v50  ;;  %v4097_v48 = vmul.f32 %v4047_v46, %v10673_v21  ;;  %v8550_v3 = vcombine.high %v10713_v39, %v10713_v39  ;;  %v10715_v46 = vld [vmem:[#allocation27_spill] sm:$0xff] }
 0x1ab   : > { %v2035_v37 = vadd.f32 %v2003_v38, %v1531_v52  ;;  %v4101_v27 = vmul.f32 %v4063_v11, %v10673_v21  ;;  %v4829_v34 = vrot.slane %v8538_v22, %v7602_v58  ;;  %v4845_v41 = vrot.slane %v8542_v33, %v7602_v58 }
 0x1ac   : > { %v7096_v7 = vcombine.low %v3759_v42, %v3763_v10  ;;  %v8559_v4 = vcombine.high %v10714_v28, %v10714_v28  ;;  %v5263_v62 = vrot.slane %v8550_v3, %v7602_v58  ;;  %v8565_v39 = vrot.slane %v10715_v46, %v7653_v57 }
 0x1ad   : > { %v2739_v52 = vadd.f32 %v7056_v53, %v2035_v37  ;;  %v8567_v38 = vcombine.low %v4097_v48, %v4101_v27  ;;  %v4975_v11 = vmul.f32 %v4829_v34, %v10673_v21  ;;  %v4979_v45 = vmul.f32 %v4845_v41, %v10673_v21 }
 0x1ae   : > { %v5279_v42 = vrot.slane %v8559_v4, %v7602_v58  ;;  %v5313_v10 = vmul.f32 %v5263_v62, %v7734_v20  ;;  %v8576_v28 = vcombine.high %v8193_v29, %v8193_v29  ;;  %v8580_v46 = vcombine.high %v8200_v56, %v8200_v56 }
 0x1af   : > { %10716 = vst [vmem:[#allocation85_spill] sm:$0xff] %v8567_v38  ;;  %v3243_v37 = vadd.f32 %v3211_v23, %v2739_v52  ;;  %v4427_v27 = vmul.f32 %v8567_v38, %v8523_v12  ;;  %v7136_v34 = vcombine.low %v4975_v11, %v4979_v45  ;;  %v8585_v41 = vmul.f32 0.33333334, %v7625_v16 }
 0x1b0   : > { %v5317_v53 = vmul.f32 %v5279_v42, %v7734_v20  ;;  %v6045_v48 = vrot.slane %v8576_v28, %v7602_v58  ;;  %v6061_v62 = vrot.slane %v8580_v46, %v7602_v58  ;;  %v1631_v56 = vrot.slane %v8447_v55, %v7653_v57 }
 0x1b1   : > { %10717 = vst [vmem:[#allocation86_spill] sm:$0xff] %v8585_v41  ;;  %v3955_v29 = vadd.f32 %v7096_v7, %v3243_v37  ;;  %v8596_v23 = vrot.slane %v8585_v41, %v7653_v57  ;;  %v1647_v45 = vrot.slane %v8452_v61, %v7653_v57  ;;  %v1889_v52 = vmul.f32 0.33333334, %v7666_v35  ;;  %v10719_v7 = vld [vmem:[#allocation52_spill] sm:$0xff] }
 0x1b2   : > { %v8601_v11 = vcombine.low %v5313_v10, %v5317_v53  ;;  %v6191_v42 = vmul.f32 %v6045_v48, %v7734_v20  ;;  %v6195_v38 = vmul.f32 %v6061_v62, %v7734_v20  ;;  %v1675_v12 = vmul.f32 %v1631_v56, %v7666_v35 }
 0x1b3   : > { %v4459_v21 = vadd.f32 %v4427_v27, %v3955_v29  ;;  %v1533_v37 = vmul.f32 %v10719_v7, %v8596_v23  ;;  %v1679_v41 = vmul.f32 %v1647_v45, %v7666_v35  ;;  %v8610_v49 = vadd.f32 %v1889_v52, %v7625_v16  ;;  %v10723_v52 = vld [vmem:[#allocation28_spill] sm:$0xff] }
 0x1b4   : > { %10718 = vst [vmem:[#allocation87_spill] sm:$0xff] %v8601_v11  ;;  %v5643_v43 = vmul.f32 %v8601_v11, %v8565_v39  ;;  %v7176_v10 = vcombine.low %v6191_v42, %v6195_v38  ;;  %v2405_v53 = vrot.slane %v8456_v9, %v7653_v57  ;;  %v2421_v48 = vrot.slane %v8460_v60, %v7653_v57 }
 0x1b5   : > { %10720 = vst [vmem:[#allocation88_spill] sm:$0xff] %v8610_v49  ;;  %v5171_v56 = vadd.f32 %v7136_v34, %v4459_v21  ;;  %v8618_v29 = vcombine.low %v1675_v12, %v1679_v41  ;;  %v8622_v27 = vrot.slane %v8610_v49, %v7653_v57  ;;  %v2839_v16 = vrot.slane %v8464_v26, %v7653_v57 }
 0x1b6   : > { %v2545_v62 = vmul.f32 %v2405_v53, %v7666_v35  ;;  %v2549_v38 = vmul.f32 %v2421_v48, %v7666_v35  ;;  %v2855_v45 = vrot.slane %v8473_v44, %v7653_v57  ;;  %v8632_v42 = vrot.slane %v10723_v52, %v7653_v57 }
 0x1b7   : > { %10721 = vst [vmem:[#allocation89_spill] sm:$0xff] %v8618_v29  ;;  %10722 = vst [vmem:[#allocation90_spill] sm:$0xff] %v8622_v27  ;;  %v5675_v21 = vadd.f32 %v5643_v43, %v5171_v56  ;;  %v2005_v12 = vmul.f32 %v8618_v29, %v8622_v27  ;;  %v2883_v34 = vmul.f32 %v2839_v16, %v7686_v30 }
 0x1b8   : > { %v3621_v41 = vrot.slane %v8497_v32, %v7653_v57  ;;  %v7058_v7 = vcombine.low %v2545_v62, %v2549_v38  ;;  %v2887_v53 = vmul.f32 %v2855_v45, %v7686_v30  ;;  %v3637_v48 = vrot.slane %v8507_v36, %v7653_v57  ;;  %v10725_v38 = vld [vmem:[#allocation29_spill] sm:$0xff] }
 0x1b9   : > { %v4055_v49 = vrot.slane %v8513_v63, %v7653_v57  ;;  %v6387_v52 = vadd.f32 %v7176_v10, %v5675_v21  ;;  %v2037_v11 = vadd.f32 %v2005_v12, %v1533_v37  ;;  %v4071_v56 = vrot.slane %v8519_v14, %v7653_v57 }
 0x1ba   : > { %v3761_v43 = vmul.f32 %v3621_v41, %v7686_v30  ;;  %v8647_v16 = vcombine.low %v2883_v34, %v2887_v53  ;;  %v3765_v29 = vmul.f32 %v3637_v48, %v7686_v30  ;;  %v8653_v45 = vrot.slane %v10725_v38, %v7653_v57  ;;  %v10728_v53 = vld [vmem:[#allocation33_spill] sm:$0xff] }
 0x1bb   : > { %v4099_v62 = vmul.f32 %v4055_v49, %v7716_v8  ;;  %6750 = vmatprep.subr.mxu0 %v6387_v52  ;;  %v2741_v27 = vadd.f32 %v7058_v7, %v2037_v11  ;;  %v4103_v10 = vmul.f32 %v4071_v56, %v7716_v8  ;;  %v4837_v37 = vrot.slane %v8538_v22, %v7653_v57 }
 0x1bc   : > { %10724 = vst [vmem:[#allocation91_spill] sm:$0xff] %v8647_v16  ;;  %10726 = vst [vmem:[#allocation92_spill] sm:$0xff] %v8653_v45  ;;  %v4853_v21 = vrot.slane %v8542_v33, %v7653_v57  ;;  %v3213_v12 = vmul.f32 %v8647_v16, %v8632_v42  ;;  %v7098_v34 = vcombine.low %v3761_v43, %v3765_v29 }
 0x1bd   : > { %v5271_v49 = vrot.slane %v8550_v3, %v7653_v57  ;;  %v5287_v41 = vrot.slane %v8559_v4, %v7653_v57  ;;  %v8666_v52 = vcombine.low %v4099_v62, %v4103_v10  ;;  %v4977_v11 = vmul.f32 %v4837_v37, %v7716_v8 }
 0x1be   : > { %v4981_v7 = vmul.f32 %v4853_v21, %v7716_v8  ;;  %v8672_v48 = vrot.slane %v10728_v53, %v7653_v57  ;;  %v3245_v56 = vadd.f32 %v3213_v12, %v2741_v27  ;;  %v6053_v43 = vrot.slane %v8576_v28, %v7653_v57 }
 0x1bf   : > { %10727 = vst [vmem:[#allocation93_spill] sm:$0xff] %v8666_v52  ;;  %v5315_v16 = vmul.f32 %v5271_v49, %v7740_v24  ;;  %v5319_v29 = vmul.f32 %v5287_v41, %v7740_v24  ;;  %v4429_v62 = vmul.f32 %v8666_v52, %v8653_v45  ;;  %v6069_v37 = vrot.slane %v8580_v46, %v7653_v57 }
 0x1c0   : > { %10729 = vst [vmem:[#allocation94_spill] sm:$0xff] %v8672_v48  ;;  %v7138_v10 = vcombine.low %v4977_v11, %v4981_v7  ;;  %v8683_v21 = vmul.f32 0.33333334, %v7610_v2  ;;  %v3957_v53 = vadd.f32 %v7098_v34, %v3245_v56  ;;  %v6193_v27 = vmul.f32 %v6053_v43, %v7740_v24  ;;  %v10733_v43 = vld [vmem:[#allocation49_spill] sm:$0xff] }
 0x1c1   : > { %v8685_v38 = vcombine.low %v5315_v16, %v5319_v29  ;;  %v1619_v12 = vrot.slane %v8447_v55, %v7591_v47  ;;  %v6197_v49 = vmul.f32 %v6069_v37, %v7740_v24  ;;  %v1635_v11 = vrot.slane %v8452_v61, %v7591_v47 }
 0x1c2   : > { %10730 = vst [vmem:[#allocation95_spill] sm:$0xff] %v8683_v21  ;;  %v8693_v41 = vrot.slane %v8683_v21, %v7653_v57  ;;  %v1886_v7 = vmul.f32 0.33333334, %v7650_v54  ;;  %v4461_v52 = vadd.f32 %v4429_v62, %v3957_v53  ;;  %v2393_v56 = vrot.slane %v8456_v9, %v7591_v47 }
 0x1c3   : > { %10731 = vst [vmem:[#allocation96_spill] sm:$0xff] %v8685_v38  ;;  %v5645_v16 = vmul.f32 %v8685_v38, %v8672_v48  ;;  %v1672_v34 = vmul.f32 %v1619_v12, %v7650_v54  ;;  %v7178_v29 = vcombine.low %v6193_v27, %v6197_v49  ;;  %v1676_v21 = vmul.f32 %v1635_v11, %v7650_v54 }
 0x1c4   : > { %10732 = vst [vmem:[#allocation97_spill] sm:$0xff] %v8693_v41  ;;  %v1530_v37 = vmul.f32 %v10733_v43, %v8693_v41  ;;  %v8707_v45 = vadd.f32 %v1886_v7, %v7610_v2  ;;  %v5173_v24 = vadd.f32 %v7138_v10, %v4461_v52  ;;  %v2409_v53 = vrot.slane %v8460_v60, %v7591_v47  ;;  %v10736_v2 = vld [vmem:[#allocation16_spill] sm:$0xff]  ;;  %v10737_v43 = vld [vmem:[#allocation30_spill] sm:$0xff] }
 0x1c5   : > { %v2542_v62 = vmul.f32 %v2393_v56, %v7650_v54  ;;  %v2827_v12 = vrot.slane %v8464_v26, %v7591_v47  ;;  %v8714_v38 = vcombine.low %v1672_v34, %v1676_v21  ;;  %v2843_v49 = vrot.slane %v8473_v44, %v7591_v47 }
 0x1c6   : > { %10734 = vst [vmem:[#allocation98_spill] sm:$0xff] %v8707_v45  ;;  %v8718_v27 = vrot.slane %v8707_v45, %v7653_v57  ;;  %v3094_v11 = vmul.f32 0.33333334, %v10736_v2  ;;  %v5677_v52 = vadd.f32 %v5645_v16, %v5173_v24  ;;  %v2546_v10 = vmul.f32 %v2409_v53, %v7650_v54 }
 0x1c7   : > { %10735 = vst [vmem:[#allocation99_spill] sm:$0xff] %v8714_v38  ;;  %v2880_v7 = vmul.f32 %v2827_v12, %v10736_v2  ;;  %v3609_v56 = vrot.slane %v8497_v32, %v7591_v47  ;;  %v2884_v34 = vmul.f32 %v2843_v49, %v10736_v2  ;;  %v3625_v48 = vrot.slane %v8507_v36, %v7591_v47 }
 0x1c8   : > { %v2002_v21 = vmul.f32 %v8714_v38, %v8718_v27  ;;  %v8731_v45 = vadd.f32 %v3094_v11, %v10737_v43  ;;  %v6389_v41 = vadd.f32 %v7178_v29, %v5677_v52  ;;  %v7055_v24 = vcombine.low %v2542_v62, %v2546_v10  ;;  %v10741_v29 = vld [vmem:[#allocation19_spill] sm:$0xff] }
 0x1c9   : > { %v3758_v16 = vmul.f32 %v3609_v56, %v10736_v2  ;;  %v4043_v53 = vrot.slane %v8513_v63, %v7591_v47  ;;  %v8738_v54 = vcombine.low %v2880_v7, %v2884_v34  ;;  %v3762_v43 = vmul.f32 %v3625_v48, %v10736_v2 }
 0x1ca   : > { %10738 = vst [vmem:[#allocation30_spill] sm:$0xff] %v8731_v45  ;;  %v2034_v12 = vadd.f32 %v2002_v21, %v1530_v37  ;;  %v8742_v38 = vrot.slane %v8731_v45, %v7653_v57  ;;  %6821 = vmatprep.subr.mxu1 %v6389_v41  ;;  %v4059_v49 = vrot.slane %v8519_v14, %v7591_v47  ;;  %v4310_v11 = vmul.f32 0.33333334, %v10741_v29  ;;  %v10742_v41 = vld [vmem:[#allocation34_spill] sm:$0xff] }
 0x1cb   : > { %10739 = vst [vmem:[#allocation100_spill] sm:$0xff] %v8738_v54  ;;  %v4096_v62 = vmul.f32 %v4043_v53, %v10741_v29  ;;  %v4825_v52 = vrot.slane %v8538_v22, %v7591_v47  ;;  %v7095_v7 = vcombine.low %v3758_v16, %v3762_v43  ;;  %v4841_v56 = vrot.slane %v8542_v33, %v7591_v47  ;;  %v10744_v16 = vld [vmem:[#allocation41_spill] sm:$0xff] }
 0x1cc   : > { %10740 = vst [vmem:[#allocation101_spill] sm:$0xff] %v8742_v38  ;;  %v2738_v37 = vadd.f32 %v7055_v24, %v2034_v12  ;;  %v3210_v10 = vmul.f32 %v8738_v54, %v8742_v38  ;;  %v4100_v48 = vmul.f32 %v4059_v49, %v10741_v29  ;;  %v8757_v21 = vadd.f32 %v4310_v11, %v10742_v41  ;;  %v10747_v11 = vld [vmem:[#allocation22_spill] sm:$0xff] }
 0x1cd   : > { %v4974_v34 = vmul.f32 %v4825_v52, %v10741_v29  ;;  %v5259_v53 = vrot.slane %v8550_v3, %v7591_v47  ;;  %v4978_v24 = vmul.f32 %v4841_v56, %v10741_v29  ;;  %v5275_v12 = vrot.slane %v8559_v4, %v7591_v47 }
 0x1ce   : > { %10743 = vst [vmem:[#allocation34_spill] sm:$0xff] %v8757_v21  ;;  %v3242_v45 = vadd.f32 %v3210_v10, %v2738_v37  ;;  %v8767_v43 = vrot.slane %v10744_v16, %v7653_v57  ;;  %v8769_v54 = vcombine.low %v4096_v62, %v4100_v48  ;;  %v8773_v49 = vrot.slane %v8757_v21, %v7653_v57  ;;  %v10748_v16 = vld [vmem:[#allocation13_spill] sm:$0xff] }
 0x1cf   : > { %v5312_v52 = vmul.f32 %v5259_v53, %v10747_v11  ;;  %v6041_v37 = vrot.slane %v8576_v28, %v7591_v47  ;;  %v7135_v56 = vcombine.low %v4974_v34, %v4978_v24  ;;  %v5316_v41 = vmul.f32 %v5275_v12, %v10747_v11 }
 0x1d0   : > { %10745 = vst [vmem:[#allocation102_spill] sm:$0xff] %v8769_v54  ;;  %10746 = vst [vmem:[#allocation103_spill] sm:$0xff] %v8773_v49  ;;  %v3954_v10 = vadd.f32 %v7095_v7, %v3242_v45  ;;  %v6057_v38 = vrot.slane %v8580_v46, %v7591_v47  ;;  %v4426_v62 = vmul.f32 %v8769_v54, %v8773_v49  ;;  %v8785_v21 = vmul.f32 0.33333334, %v10748_v16 }
 0x1d1   : > { %v6190_v48 = vmul.f32 %v6041_v37, %v10747_v11  ;;  %v1627_v53 = vrot.slane %v8447_v55, %v7605_v59  ;;  %v8789_v29 = vcombine.low %v5312_v52, %v5316_v41  ;;  %v1643_v7 = vrot.slane %v8452_v61, %v7605_v59 }
 0x1d2   : > { %10749 = vst [vmem:[#allocation22_spill] sm:$0xff] %v8785_v21  ;;  %v6194_v45 = vmul.f32 %v6057_v38, %v10747_v11  ;;  %v1888_v34 = vmul.f32 0.33333334, %v7663_v6  ;;  %v4458_v24 = vadd.f32 %v4426_v62, %v3954_v10  ;;  %v8797_v12 = vrot.slane %v8785_v21, %v7653_v57  ;;  %v10752_v10 = vld [vmem:[#allocation51_spill] sm:$0xff] }
 0x1d3   : > { %10750 = vst [vmem:[#allocation13_spill] sm:$0xff] %v8789_v29  ;;  %v1674_v37 = vmul.f32 %v1627_v53, %v7663_v6  ;;  %v2401_v54 = vrot.slane %v8456_v9, %v7605_v59  ;;  %v5642_v55 = vmul.f32 %v8789_v29, %v8767_v43  ;;  %v1678_v38 = vmul.f32 %v1643_v7, %v7663_v6  ;;  %v10779_v29 = vld [vmem:[#allocation83_spill] sm:$0xff] }
 0x1d4   : > { %v7175_v52 = vcombine.low %v6190_v48, %v6194_v45  ;;  %v8806_v61 = vadd.f32 %v1888_v34, %v10748_v16  ;;  %v5170_v41 = vadd.f32 %v7135_v56, %v4458_v24  ;;  %v1532_v62 = vmul.f32 %v10752_v10, %v8797_v12 }
 0x1d5   : > { %v2417_v21 = vrot.slane %v8460_v60, %v7605_v59  ;;  %v2544_v53 = vmul.f32 %v2401_v54, %v7663_v6  ;;  %v8813_v49 = vcombine.low %v1674_v37, %v1678_v38  ;;  %v2835_v48 = vrot.slane %v8464_v26, %v7605_v59 }
 0x1d6   : > { %10751 = vst [vmem:[#allocation104_spill] sm:$0xff] %v8806_v61  ;;  %v8817_v9 = vrot.slane %v8806_v61, %v7653_v57  ;;  %v2851_v16 = vrot.slane %v8473_v44, %v7605_v59  ;;  %v5674_v56 = vadd.f32 %v5642_v55, %v5170_v41  ;;  %v3096_v7 = vmul.f32 0.33333334, %v7679_v19  ;;  %v10754_v55 = vld [vmem:[#allocation35_spill] sm:$0xff] }
 0x1d7   : > { %10753 = vst [vmem:[#allocation105_spill] sm:$0xff] %v8813_v49  ;;  %v2548_v45 = vmul.f32 %v2417_v21, %v7663_v6  ;;  %v3617_v54 = vrot.slane %v8497_v32, %v7605_v59  ;;  %v2882_v34 = vmul.f32 %v2835_v48, %v7679_v19  ;;  %v3633_v26 = vrot.slane %v8507_v36, %v7605_v59 }
 0x1d8   : > { %v2004_v60 = vmul.f32 %v8813_v49, %v8817_v9  ;;  %v2886_v24 = vmul.f32 %v2851_v16, %v7679_v19  ;;  %v6386_v37 = vadd.f32 %v7175_v52, %v5674_v56  ;;  %v8834_v38 = vadd.f32 %v3096_v7, %v10754_v55 }
 0x1d9   : > { %v7057_v44 = vcombine.low %v2544_v53, %v2548_v45  ;;  %v3760_v21 = vmul.f32 %v3617_v54, %v7679_v19  ;;  %v3764_v32 = vmul.f32 %v3633_v26, %v7679_v19  ;;  %v4051_v48 = vrot.slane %v8513_v63, %v7605_v59 }
 0x1da   : > { %10755 = vst [vmem:[#allocation35_spill] sm:$0xff] %v8834_v38  ;;  %v2036_v41 = vadd.f32 %v2004_v60, %v1532_v62  ;;  %v8837_v10 = vcombine.low %v2882_v34, %v2886_v24  ;;  %6751 = vmatpush1.msra.mxu0 %v6386_v37  ;;  %v8844_v16 = vrot.slane %v8834_v38, %v7653_v57  ;;  %v4312_v52 = vmul.f32 0.33333334, %v7696_v40  ;;  %v10757_v60 = vld [vmem:[#allocation39_spill] sm:$0xff] }
 0x1db   : > { %v4067_v36 = vrot.slane %v8519_v14, %v7605_v59  ;;  %v4833_v62 = vrot.slane %v8538_v22, %v7605_v59  ;;  %v7097_v56 = vcombine.low %v3760_v21, %v3764_v32  ;;  %v4098_v45 = vmul.f32 %v4051_v48, %v7696_v40 }
 0x1dc   : > { %10756 = vst [vmem:[#allocation106_spill] sm:$0xff] %v8837_v10  ;;  %v2740_v53 = vadd.f32 %v7057_v44, %v2036_v41  ;;  %v4849_v63 = vrot.slane %v8542_v33, %v7605_v59  ;;  %v3212_v7 = vmul.f32 %v8837_v10, %v8844_v16  ;;  %v8858_v34 = vadd.f32 %v4312_v52, %v10757_v60  ;;  %v10759_v33 = vld [vmem:[#allocation42_spill] sm:$0xff] }
 0x1dd   : > { %v4102_v54 = vmul.f32 %v4067_v36, %v7696_v40  ;;  %v4976_v14 = vmul.f32 %v4833_v62, %v7696_v40  ;;  %v5267_v22 = vrot.slane %v8550_v3, %v7605_v59  ;;  %v5283_v26 = vrot.slane %v8559_v4, %v7605_v59 }
 0x1de   : > { %10758 = vst [vmem:[#allocation39_spill] sm:$0xff] %v8858_v34  ;;  %v4980_v24 = vmul.f32 %v4849_v63, %v7696_v40  ;;  %v8868_v37 = vrot.slane %v10759_v33, %v7653_v57  ;;  %v3244_v44 = vadd.f32 %v3212_v7, %v2740_v53  ;;  %v8874_v21 = vrot.slane %v8858_v34, %v7653_v57  ;;  %v10761_v53 = vld [vmem:[#allocation67_spill] sm:$0xff] }
 0x1df   : > { %v8870_v55 = vcombine.low %v4098_v45, %v4102_v54  ;;  %v6049_v41 = vrot.slane %v8576_v28, %v7605_v59  ;;  %v5314_v3 = vmul.f32 %v5267_v22, %v7726_v13  ;;  %v5318_v48 = vmul.f32 %v5283_v26, %v7726_v13 }
 0x1e0   : > { %v7137_v32 = vcombine.low %v4976_v14, %v4980_v24  ;;  %v6065_v4 = vrot.slane %v8580_v46, %v7605_v59  ;;  %v3956_v36 = vadd.f32 %v7097_v56, %v3244_v44  ;;  %v1527_v45 = vmul.f32 %v10761_v53, %v8419_v17 }
 0x1e1   : > { %10760 = vst [vmem:[#allocation107_spill] sm:$0xff] %v8870_v55  ;;  %v4428_v52 = vmul.f32 %v8870_v55, %v8874_v21  ;;  %v6192_v62 = vmul.f32 %v6049_v41, %v7726_v13  ;;  %v8887_v63 = vcombine.low %v5314_v3, %v5318_v48  ;;  %v1591_v7 = vrot.slane %v8431_v18, %v7602_v58 }
 0x1e2   : > { %v6196_v28 = vmul.f32 %v6065_v4, %v7726_v13  ;;  %v1607_v54 = vrot.slane %v8442_v25, %v7602_v58  ;;  %v2365_v56 = vrot.slane %v8100_v51, %v7602_v58  ;;  %v2381_v60 = vrot.slane %v8119_v15, %v7602_v58 }
 0x1e3   : > { %10762 = vst [vmem:[#allocation108_spill] sm:$0xff] %v8887_v63  ;;  %v4460_v46 = vadd.f32 %v4428_v52, %v3956_v36  ;;  %v2799_v17 = vrot.slane %v10701_v31, %v7602_v58  ;;  %v5644_v14 = vmul.f32 %v8887_v63, %v8868_v37  ;;  %v1665_v22 = vmul.f32 %v1591_v7, %v7660_v5 }
 0x1e4   : > { %v7177_v24 = vcombine.low %v6192_v62, %v6196_v28  ;;  %v1669_v26 = vmul.f32 %v1607_v54, %v7660_v5  ;;  %v2535_v41 = vmul.f32 %v2365_v56, %v7660_v5  ;;  %v2539_v3 = vmul.f32 %v2381_v60, %v7660_v5  ;;  %v10764_v62 = vld [vmem:[#allocation57_spill] sm:$0xff] }
 0x1e5   : > { %v5172_v44 = vadd.f32 %v7137_v32, %v4460_v46  ;;  %v2815_v48 = vrot.slane %v10703_v1, %v7602_v58  ;;  %v2873_v36 = vmul.f32 %v2799_v17, %v10670_v50  ;;  %v3581_v52 = vrot.slane %v8132_v0, %v7602_v58  ;;  %v10765_v46 = vld [vmem:[#allocation36_spill] sm:$0xff]  ;;  %v10766_v60 = vld [vmem:[#allocation81_spill] sm:$0xff] }
 0x1e6   : > { %v8908_v4 = vcombine.low %v1665_v22, %v1669_v26  ;;  %v3597_v28 = vrot.slane %v10764_v62, %v7602_v58  ;;  %v7052_v54 = vcombine.low %v2535_v41, %v2539_v3  ;;  %v4015_v56 = vrot.slane %v10765_v46, %v7602_v58  ;;  %v10767_v26 = vld [vmem:[#allocation37_spill] sm:$0xff]  ;;  %v10770_v41 = vld [vmem:[#allocation60_spill] sm:$0xff] }
 0x1e7   : > { %v5676_v7 = vadd.f32 %v5644_v14, %v5172_v44  ;;  %v2877_v32 = vmul.f32 %v2815_v48, %v10670_v50  ;;  %v3751_v22 = vmul.f32 %v3581_v52, %v10670_v50  ;;  %v4031_v63 = vrot.slane %v10767_v26, %v7602_v58  ;;  %v10769_v14 = vld [vmem:[#allocation20_spill] sm:$0xff] }
 0x1e8   : > { %10763 = vst [vmem:[#allocation109_spill] sm:$0xff] %v8908_v4  ;;  %v1999_v53 = vmul.f32 %v8908_v4, %v10766_v60  ;;  %v3755_v17 = vmul.f32 %v3597_v28, %v10670_v50  ;;  %v4089_v44 = vmul.f32 %v4015_v56, %v10769_v14  ;;  %v4797_v3 = vrot.slane %v10770_v41, %v7602_v58  ;;  %v10771_v60 = vld [vmem:[#allocation61_spill] sm:$0xff]  ;;  %v10772_v28 = vld [vmem:[#allocation32_spill] sm:$0xff] }
 0x1e9   : > { %v6388_v55 = vadd.f32 %v7177_v24, %v5676_v7  ;;  %v8924_v33 = vcombine.low %v2873_v36, %v2877_v32  ;;  %v4093_v10 = vmul.f32 %v4031_v63, %v10769_v14  ;;  %v4813_v52 = vrot.slane %v10771_v60, %v7602_v58  ;;  %v10773_v36 = vld [vmem:[#allocation38_spill] sm:$0xff]  ;;  %v10774_v32 = vld [vmem:[#allocation40_spill] sm:$0xff] }
 0x1ea   : > { %v2031_v48 = vadd.f32 %v1999_v53, %v1527_v45  ;;  %v7092_v34 = vcombine.low %v3751_v22, %v3755_v17  ;;  %v4967_v24 = vmul.f32 %v4797_v3, %v10769_v14  ;;  %v5231_v7 = vrot.slane %v10773_v36, %v7602_v58  ;;  %v10776_v63 = vld [vmem:[#allocation64_spill] sm:$0xff]  ;;  %v10777_v3 = vld [vmem:[#allocation65_spill] sm:$0xff] }
 0x1eb   : > { %10768 = vst [vmem:[#allocation57_spill] sm:$0xff] %v8924_v33  ;;  %6822 = vmatpush1.msra.mxu1 %v6388_v55  ;;  %v3207_v4 = vmul.f32 %v8924_v33, %v10772_v28  ;;  %v5247_v56 = vrot.slane %v10774_v32, %v7602_v58  ;;  %v8939_v53 = vcombine.low %v4089_v44, %v4093_v10  ;;  %v10778_v33 = vld [vmem:[#allocation44_spill] sm:$0xff] }
 0x1ec   : > { %v2735_v49 = vadd.f32 %v7052_v54, %v2031_v48  ;;  %v4971_v45 = vmul.f32 %v4813_v52, %v10769_v14  ;;  %v6013_v22 = vrot.slane %v10776_v63, %v7602_v58  ;;  %v5305_v55 = vmul.f32 %v5231_v7, %v7734_v20 }
 0x1ed   : > { %10775 = vst [vmem:[#allocation36_spill] sm:$0xff] %v8939_v53  ;;  %v5309_v17 = vmul.f32 %v5247_v56, %v7734_v20  ;;  %v6029_v28 = vrot.slane %v10777_v3, %v7602_v58  ;;  %v1529_v38 = vmul.f32 %v10778_v33, %v8596_v23  ;;  %v4423_v10 = vmul.f32 %v8939_v53, %v10779_v29 }
 0x1ee   : > { %v3239_v61 = vadd.f32 %v3207_v4, %v2735_v49  ;;  %v7132_v54 = vcombine.low %v4967_v24, %v4971_v45  ;;  %v6183_v44 = vmul.f32 %v6013_v22, %v7734_v20  ;;  %v1599_v7 = vrot.slane %v8431_v18, %v7653_v57 }
 0x1ef   : > { %v8953_v48 = vcombine.low %v5305_v55, %v5309_v17  ;;  %v6187_v52 = vmul.f32 %v6029_v28, %v7734_v20  ;;  %v1615_v56 = vrot.slane %v8442_v25, %v7653_v57  ;;  %v2373_v23 = vrot.slane %v8100_v51, %v7653_v57 }
 0x1f0   : > { %v3951_v14 = vadd.f32 %v7092_v34, %v3239_v61  ;;  %v2389_v29 = vrot.slane %v8119_v15, %v7653_v57  ;;  %v2807_v49 = vrot.slane %v10701_v31, %v7653_v57  ;;  %v1667_v45 = vmul.f32 %v1599_v7, %v7666_v35 }
 0x1f1   : > { %10780 = vst [vmem:[#allocation81_spill] sm:$0xff] %v8953_v48  ;;  %v5639_v4 = vmul.f32 %v8953_v48, %v8565_v39  ;;  %v7172_v24 = vcombine.low %v6183_v44, %v6187_v52  ;;  %v1671_v22 = vmul.f32 %v1615_v56, %v7666_v35  ;;  %v2537_v61 = vmul.f32 %v2373_v23, %v7666_v35  ;;  %v10782_v56 = vld [vmem:[#allocation90_spill] sm:$0xff] }
 0x1f2   : > { %v4455_v55 = vadd.f32 %v4423_v10, %v3951_v14  ;;  %v2541_v34 = vmul.f32 %v2389_v29, %v7666_v35  ;;  %v2823_v17 = vrot.slane %v10703_v1, %v7653_v57  ;;  %v2875_v33 = vmul.f32 %v2807_v49, %v7686_v30 }
 0x1f3   : > { %v8974_v28 = vcombine.low %v1667_v45, %v1671_v22  ;;  %v3589_v39 = vrot.slane %v8132_v0, %v7653_v57  ;;  %v3605_v44 = vrot.slane %v10764_v62, %v7653_v57  ;;  %v4023_v10 = vrot.slane %v10765_v46, %v7653_v57 }
 0x1f4   : > { %v5167_v52 = vadd.f32 %v7132_v54, %v4455_v55  ;;  %v7054_v7 = vcombine.low %v2537_v61, %v2541_v34  ;;  %v2879_v14 = vmul.f32 %v2823_v17, %v7686_v30  ;;  %v4039_v45 = vrot.slane %v10767_v26, %v7653_v57 }
 0x1f5   : > { %10781 = vst [vmem:[#allocation37_spill] sm:$0xff] %v8974_v28  ;;  %v2001_v23 = vmul.f32 %v8974_v28, %v10782_v56  ;;  %v3753_v29 = vmul.f32 %v3589_v39, %v7686_v30  ;;  %v3757_v49 = vmul.f32 %v3605_v44, %v7686_v30  ;;  %v4091_v54 = vmul.f32 %v4023_v10, %v7716_v8 }
 0x1f6   : > { %v5671_v22 = vadd.f32 %v5639_v4, %v5167_v52  ;;  %v8990_v48 = vcombine.low %v2875_v33, %v2879_v14  ;;  %v4805_v55 = vrot.slane %v10770_v41, %v7653_v57  ;;  %v4095_v17 = vmul.f32 %v4039_v45, %v7716_v8  ;;  %v10787_v45 = vld [vmem:[#allocation66_spill] sm:$0xff] }
 0x1f7   : > { %v2033_v61 = vadd.f32 %v2001_v23, %v1529_v38  ;;  %v7094_v34 = vcombine.low %v3753_v29, %v3757_v49  ;;  %v4821_v39 = vrot.slane %v10771_v60, %v7653_v57  ;;  %v5239_v33 = vrot.slane %v10773_v36, %v7653_v57  ;;  %v10785_v23 = vld [vmem:[#allocation24_spill] sm:$0xff]  ;;  %v10786_v49 = vld [vmem:[#allocation97_spill] sm:$0xff] }
 0x1f8   : > { %10783 = vst [vmem:[#allocation60_spill] sm:$0xff] %v8990_v48  ;;  %v6383_v56 = vadd.f32 %v7172_v24, %v5671_v22  ;;  %v3209_v44 = vmul.f32 %v8990_v48, %v8632_v42  ;;  %v4969_v4 = vmul.f32 %v4805_v55, %v7716_v8  ;;  %v9003_v14 = vcombine.low %v4091_v54, %v4095_v17  ;;  %v10788_v54 = vld [vmem:[#allocation92_spill] sm:$0xff] }
 0x1f9   : > { %v2737_v52 = vadd.f32 %v7054_v7, %v2033_v61  ;;  %v4973_v38 = vmul.f32 %v4821_v39, %v7716_v8  ;;  %v5255_v10 = vrot.slane %v10774_v32, %v7653_v57  ;;  %v5307_v29 = vmul.f32 %v5239_v33, %v10785_v23 }
 0x1fa   : > { %10784 = vst [vmem:[#allocation61_spill] sm:$0xff] %v9003_v14  ;;  %6752 = vmatprep.subr.mxu0 %v6383_v56  ;;  %v6021_v24 = vrot.slane %v10776_v63, %v7653_v57  ;;  %v6037_v42 = vrot.slane %v10777_v3, %v7653_v57  ;;  %v1526_v22 = vmul.f32 %v10787_v45, %v10786_v49 }
 0x1fb   : > { %v3241_v7 = vadd.f32 %v3209_v44, %v2737_v52  ;;  %v4425_v55 = vmul.f32 %v9003_v14, %v10788_v54  ;;  %v7134_v61 = vcombine.low %v4969_v4, %v4973_v38  ;;  %v5311_v17 = vmul.f32 %v5255_v10, %v10785_v23  ;;  %v10790_v38 = vld [vmem:[#allocation14_spill] sm:$0xff] }
 0x1fc   : > { %v6185_v39 = vmul.f32 %v6021_v24, %v10785_v23  ;;  %v6189_v56 = vmul.f32 %v6037_v42, %v10785_v23  ;;  %v1587_v33 = vrot.slane %v8431_v18, %v7591_v47  ;;  %v1603_v48 = vrot.slane %v8442_v25, %v7591_v47  ;;  %v10791_v54 = vld [vmem:[#allocation94_spill] sm:$0xff] }
 0x1fd   : > { %v3953_v28 = vadd.f32 %v7094_v34, %v3241_v7  ;;  %v9024_v53 = vcombine.low %v5307_v29, %v5311_v17  ;;  %v2361_v44 = vrot.slane %v8100_v51, %v7591_v47  ;;  %v2377_v4 = vrot.slane %v8119_v15, %v7591_v47 }
 0x1fe   : > { %v7174_v52 = vcombine.low %v6185_v39, %v6189_v56  ;;  %v1664_v10 = vmul.f32 %v1587_v33, %v10790_v38  ;;  %v1668_v24 = vmul.f32 %v1603_v48, %v10790_v38  ;;  %v2795_v42 = vrot.slane %v10701_v31, %v7591_v47 }
 0x1ff   : > { %10789 = vst [vmem:[#allocation32_spill] sm:$0xff] %v9024_v53  ;;  %v4457_v49 = vadd.f32 %v4425_v55, %v3953_v28  ;;  %v5641_v34 = vmul.f32 %v9024_v53, %v10791_v54  ;;  %v2534_v29 = vmul.f32 %v2361_v44, %v10790_v38  ;;  %v2538_v7 = vmul.f32 %v2377_v4, %v10790_v38 }
 0x200   : > { %v9038_v17 = vcombine.low %v1664_v10, %v1668_v24  ;;  %v2811_v39 = vrot.slane %v10703_v1, %v7591_v47  ;;  %v2872_v56 = vmul.f32 %v2795_v42, %v10736_v2  ;;  %v3577_v48 = vrot.slane %v8132_v0, %v7591_v47 }
 0x201   : > { %v5169_v33 = vadd.f32 %v7134_v61, %v4457_v49  ;;  %v7051_v45 = vcombine.low %v2534_v29, %v2538_v7  ;;  %v3593_v28 = vrot.slane %v10764_v62, %v7591_v47  ;;  %v4011_v55 = vrot.slane %v10765_v46, %v7591_v47  ;;  %v10793_v49 = vld [vmem:[#allocation19_spill] sm:$0xff] }
 0x202   : > { %10792 = vst [vmem:[#allocation38_spill] sm:$0xff] %v9038_v17  ;;  %v1998_v44 = vmul.f32 %v9038_v17, %v8718_v27  ;;  %v2876_v4 = vmul.f32 %v2811_v39, %v10736_v2  ;;  %v3750_v10 = vmul.f32 %v3577_v48, %v10736_v2  ;;  %v4027_v24 = vrot.slane %v10767_v26, %v7591_v47 }
 0x203   : > { %v5673_v42 = vadd.f32 %v5641_v34, %v5169_v33  ;;  %v3754_v61 = vmul.f32 %v3593_v28, %v10736_v2  ;;  %v4088_v54 = vmul.f32 %v4011_v55, %v10793_v49  ;;  %v4793_v29 = vrot.slane %v10770_v41, %v7591_v47  ;;  %v10795_v28 = vld [vmem:[#allocation101_spill] sm:$0xff] }
 0x204   : > { %v2030_v7 = vadd.f32 %v1998_v44, %v1526_v22  ;;  %v9059_v53 = vcombine.low %v2872_v56, %v2876_v4  ;;  %v4092_v27 = vmul.f32 %v4027_v24, %v10793_v49  ;;  %v4809_v39 = vrot.slane %v10771_v60, %v7591_v47 }
 0x205   : > { %v6385_v48 = vadd.f32 %v7174_v52, %v5673_v42  ;;  %v7091_v17 = vcombine.low %v3750_v10, %v3754_v61  ;;  %v4966_v14 = vmul.f32 %v4793_v29, %v10793_v49  ;;  %v5227_v34 = vrot.slane %v10773_v36, %v7591_v47  ;;  %v10797_v10 = vld [vmem:[#allocation103_spill] sm:$0xff] }
 0x206   : > { %10794 = vst [vmem:[#allocation40_spill] sm:$0xff] %v9059_v53  ;;  %v2734_v33 = vadd.f32 %v7051_v45, %v2030_v7  ;;  %v3206_v55 = vmul.f32 %v9059_v53, %v10795_v28  ;;  %v9069_v2 = vcombine.low %v4088_v54, %v4092_v27  ;;  %v4970_v22 = vmul.f32 %v4809_v39, %v10793_v49  ;;  %v10798_v61 = vld [vmem:[#allocation43_spill] sm:$0xff]  ;;  %v10828_v53 = vld [vmem:[#allocation28_spill] sm:$0xff] }
 0x207   : > { %6823 = vmatprep.subr.mxu1 %v6385_v48  ;;  %v5243_v56 = vrot.slane %v10774_v32, %v7591_v47  ;;  %v5304_v52 = vmul.f32 %v5227_v34, %v10747_v11  ;;  %v6009_v44 = vrot.slane %v10776_v63, %v7591_v47  ;;  %v6025_v4 = vrot.slane %v10777_v3, %v7591_v47 }
 0x208   : > { %10796 = vst [vmem:[#allocation64_spill] sm:$0xff] %v9069_v2  ;;  %v3238_v45 = vadd.f32 %v3206_v55, %v2734_v33  ;;  %v4422_v24 = vmul.f32 %v9069_v2, %v10797_v10  ;;  %v7131_v42 = vcombine.low %v4966_v14, %v4970_v22  ;;  %v1528_v54 = vmul.f32 %v10798_v61, %v8797_v12 }
 0x209   : > { %v5308_v29 = vmul.f32 %v5243_v56, %v10747_v11  ;;  %v6182_v7 = vmul.f32 %v6009_v44, %v10747_v11  ;;  %v6186_v27 = vmul.f32 %v6025_v4, %v10747_v11  ;;  %v1595_v39 = vrot.slane %v8431_v18, %v7605_v59 }
 0x20a   : > { %v3950_v48 = vadd.f32 %v7091_v17, %v3238_v45  ;;  %v1611_v34 = vrot.slane %v8442_v25, %v7605_v59  ;;  %v2369_v33 = vrot.slane %v8100_v51, %v7605_v59  ;;  %v2385_v14 = vrot.slane %v8119_v15, %v7605_v59 }
 0x20b   : > { %v9094_v12 = vcombine.low %v5304_v52, %v5308_v29  ;;  %v7171_v28 = vcombine.low %v6182_v7, %v6186_v27  ;;  %v1666_v55 = vmul.f32 %v1595_v39, %v7663_v6  ;;  %v2803_v22 = vrot.slane %v10701_v31, %v7605_v59 }
 0x20c   : > { %v4454_v56 = vadd.f32 %v4422_v24, %v3950_v48  ;;  %v1670_v18 = vmul.f32 %v1611_v34, %v7663_v6  ;;  %v2536_v17 = vmul.f32 %v2369_v33, %v7663_v6  ;;  %v2540_v25 = vmul.f32 %v2385_v14, %v7663_v6 }
 0x20d   : > { %10799 = vst [vmem:[#allocation65_spill] sm:$0xff] %v9094_v12  ;;  %v5638_v51 = vmul.f32 %v9094_v12, %v8767_v43  ;;  %v2819_v15 = vrot.slane %v10703_v1, %v7605_v59  ;;  %v2874_v52 = vmul.f32 %v2803_v22, %v7679_v19  ;;  %v3585_v44 = vrot.slane %v8132_v0, %v7605_v59 }
 0x20e   : > { %v5166_v4 = vadd.f32 %v7131_v42, %v4454_v56  ;;  %v9109_v31 = vcombine.low %v1666_v55, %v1670_v18  ;;  %v7053_v45 = vcombine.low %v2536_v17, %v2540_v25  ;;  %v3601_v10 = vrot.slane %v10764_v62, %v7605_v59  ;;  %v10803_v25 = vld [vmem:[#allocation78_spill] sm:$0xff] }
 0x20f   : > { %v2878_v24 = vmul.f32 %v2819_v15, %v7679_v19  ;;  %v3752_v29 = vmul.f32 %v3585_v44, %v7679_v19  ;;  %v4019_v43 = vrot.slane %v10765_v46, %v7605_v59  ;;  %v4035_v1 = vrot.slane %v10767_v26, %v7605_v59  ;;  %v10805_v44 = vld [vmem:[#allocation31_spill] sm:$0xff] }
 0x210   : > { %10800 = vst [vmem:[#allocation83_spill] sm:$0xff] %v9109_v31  ;;  %v5670_v7 = vadd.f32 %v5638_v51, %v5166_v4  ;;  %v2000_v0 = vmul.f32 %v9109_v31, %v8817_v9  ;;  %v3756_v42 = vmul.f32 %v3601_v10, %v7679_v19  ;;  %v4801_v27 = vrot.slane %v10770_v41, %v7605_v59  ;;  %v10806_v4 = vld [vmem:[#allocation53_spill] sm:$0xff]  ;;  %v10807_v10 = vld [vmem:[#allocation54_spill] sm:$0xff] }
 0x211   : > { %v9124_v62 = vcombine.low %v2874_v52, %v2878_v24  ;;  %v4090_v39 = vmul.f32 %v4019_v43, %v7696_v40  ;;  %v4094_v48 = vmul.f32 %v4035_v1, %v7696_v40  ;;  %v4817_v46 = vrot.slane %v10771_v60, %v7605_v59  ;;  %v10804_v52 = vld [vmem:[#allocation50_spill] sm:$0xff]  ;;  %v10827_v31 = vld [vmem:[#allocation89_spill] sm:$0xff] }
 0x212   : > { %v6382_v34 = vadd.f32 %v7171_v28, %v5670_v7  ;;  %v2032_v26 = vadd.f32 %v2000_v0, %v1528_v54  ;;  %v7093_v33 = vcombine.low %v3752_v29, %v3756_v42  ;;  %v4968_v14 = vmul.f32 %v4801_v27, %v7696_v40  ;;  %v10809_v7 = vld [vmem:[#allocation25_spill] sm:$0xff]  ;;  %v10810_v42 = vld [vmem:[#allocation82_spill] sm:$0xff] }
 0x213   : > { %10801 = vst [vmem:[#allocation90_spill] sm:$0xff] %v9124_v62  ;;  %v3208_v9 = vmul.f32 %v9124_v62, %v8844_v16  ;;  %v9133_v55 = vcombine.low %v4090_v39, %v4094_v48  ;;  %v4972_v41 = vmul.f32 %v4817_v46, %v7696_v40  ;;  %v5235_v22 = vrot.slane %v10773_v36, %v7605_v59  ;;  %v10811_v46 = vld [vmem:[#allocation55_spill] sm:$0xff] }
 0x214   : > { %6753 = vmatpush1.msra.mxu0 %v6382_v34  ;;  %v2736_v56 = vadd.f32 %v7053_v45, %v2032_v26  ;;  %v5251_v60 = vrot.slane %v10774_v32, %v7605_v59  ;;  %v6017_v54 = vrot.slane %v10776_v63, %v7605_v59  ;;  %v6033_v28 = vrot.slane %v10777_v3, %v7605_v59 }
 0x215   : > { %10802 = vst [vmem:[#allocation97_spill] sm:$0xff] %v9133_v55  ;;  %v4424_v16 = vmul.f32 %v9133_v55, %v8874_v21  ;;  %v7133_v18 = vcombine.low %v4968_v14, %v4972_v41  ;;  %v5306_v17 = vmul.f32 %v5235_v22, %v7726_v13  ;;  %v9149_v36 = vrot.slane %v10803_v25, %v7605_v59  ;;  %v10812_v14 = vld [vmem:[#allocation84_spill] sm:$0xff]  ;;  %v10822_v25 = vld [vmem:[#allocation63_spill] sm:$0xff] }
 0x216   : > { %v3240_v51 = vadd.f32 %v3208_v9, %v2736_v56  ;;  %v5310_v15 = vmul.f32 %v5251_v60, %v7726_v13  ;;  %v6184_v32 = vmul.f32 %v6017_v54, %v7726_v13  ;;  %v6188_v63 = vmul.f32 %v6033_v28, %v7726_v13  ;;  %v10813_v41 = vld [vmem:[#allocation56_spill] sm:$0xff] }
 0x217   : > { %v1507_v3 = vmul.f32 %v10804_v52, %v9149_v36  ;;  %v9158_v21 = vrot.slane %v10805_v44, %v7605_v59  ;;  %v9162_v45 = vcombine.high %v10806_v4, %v10806_v4  ;;  %v9166_v24 = vcombine.high %v10807_v10, %v10807_v10  ;;  %v10820_v52 = vld [vmem:[#allocation62_spill] sm:$0xff] }
 0x218   : > { %v3952_v29 = vadd.f32 %v7093_v33, %v3240_v51  ;;  %v9168_v43 = vcombine.low %v5306_v17, %v5310_v15  ;;  %v7173_v1 = vcombine.low %v6184_v32, %v6188_v63  ;;  %v9172_v0 = vrot.slane %v10809_v7, %v7605_v59  ;;  %v10815_v15 = vld [vmem:[#allocation58_spill] sm:$0xff] }
 0x219   : > { %v1979_v27 = vmul.f32 %v10810_v42, %v9158_v21  ;;  %v2333_v39 = vrot.slane %v9162_v45, %v7602_v58  ;;  %v2349_v48 = vrot.slane %v9166_v24, %v7602_v58  ;;  %v9182_v34 = vcombine.high %v10811_v46, %v10811_v46 }
 0x21a   : > { %10808 = vst [vmem:[#allocation92_spill] sm:$0xff] %v9168_v43  ;;  %v4456_v26 = vadd.f32 %v4424_v16, %v3952_v29  ;;  %v5640_v33 = vmul.f32 %v9168_v43, %v8868_v37  ;;  %v3187_v9 = vmul.f32 %v10812_v14, %v9172_v0  ;;  %v9190_v22 = vcombine.high %v10813_v41, %v10813_v41  ;;  %v10814_v37 = vld [vmem:[#allocation26_spill] sm:$0xff]  ;;  %v10816_v29 = vld [vmem:[#allocation59_spill] sm:$0xff] }
 0x21b   : > { %v2027_v56 = vadd.f32 %v1979_v27, %v1507_v3  ;;  %v2527_v60 = vmul.f32 %v2333_v39, %v7660_v5  ;;  %v2531_v54 = vmul.f32 %v2349_v48, %v7660_v5  ;;  %v3549_v28 = vrot.slane %v9182_v34, %v7602_v58 }
 0x21c   : > { %v5168_v17 = vadd.f32 %v7133_v18, %v4456_v26  ;;  %v3565_v16 = vrot.slane %v9190_v22, %v7602_v58  ;;  %v9200_v51 = vrot.slane %v10814_v37, %v7605_v59  ;;  %v9204_v32 = vcombine.high %v10815_v15, %v10815_v15  ;;  %v10817_v18 = vld [vmem:[#allocation27_spill] sm:$0xff]  ;;  %v10818_v37 = vld [vmem:[#allocation85_spill] sm:$0xff] }
 0x21d   : > { %v7048_v63 = vcombine.low %v2527_v60, %v2531_v54  ;;  %v3743_v3 = vmul.f32 %v3549_v28, %v10670_v50  ;;  %v9209_v27 = vcombine.high %v10816_v29, %v10816_v29  ;;  %v9213_v39 = vrot.slane %v10817_v18, %v7605_v59  ;;  %v10819_v28 = vld [vmem:[#allocation87_spill] sm:$0xff] }
 0x21e   : > { %v5672_v48 = vadd.f32 %v5640_v33, %v5168_v17  ;;  %v3747_v26 = vmul.f32 %v3565_v16, %v10670_v50  ;;  %v4403_v14 = vmul.f32 %v10818_v37, %v9200_v51  ;;  %v4765_v7 = vrot.slane %v9204_v32, %v7602_v58  ;;  %v10821_v16 = vld [vmem:[#allocation20_spill] sm:$0xff] }
 0x21f   : > { %v2731_v60 = vadd.f32 %v7048_v63, %v2027_v56  ;;  %v4781_v54 = vrot.slane %v9209_v27, %v7602_v58  ;;  %v5619_v42 = vmul.f32 %v10819_v28, %v9213_v39  ;;  %v9226_v18 = vcombine.high %v10820_v52, %v10820_v52  ;;  %v10823_v28 = vld [vmem:[#allocation86_spill] sm:$0xff] }
 0x220   : > { %v6384_v33 = vadd.f32 %v7173_v1, %v5672_v48  ;;  %v7088_v17 = vcombine.low %v3743_v3, %v3747_v26  ;;  %v4959_v44 = vmul.f32 %v4765_v7, %v10821_v16  ;;  %v9231_v37 = vcombine.high %v10822_v25, %v10822_v25  ;;  %v10824_v7 = vld [vmem:[#allocation88_spill] sm:$0xff] }
 0x221   : > { %v3235_v43 = vadd.f32 %v3187_v9, %v2731_v60  ;;  %v4963_v56 = vmul.f32 %v4781_v54, %v10821_v16  ;;  %v5981_v63 = vrot.slane %v9226_v18, %v7602_v58  ;;  %v9238_v55 = vrot.slane %v10823_v28, %v7605_v59  ;;  %v10826_v28 = vld [vmem:[#allocation52_spill] sm:$0xff] }
 0x222   : > { %6824 = vmatpush1.msra.mxu1 %v6384_v33  ;;  %v5997_v1 = vrot.slane %v9231_v37, %v7602_v58  ;;  %v9244_v3 = vrot.slane %v10824_v7, %v7605_v59  ;;  %v2341_v9 = vrot.slane %v9162_v45, %v7653_v57  ;;  %v2357_v48 = vrot.slane %v9166_v24, %v7653_v57 }
 0x223   : > { %v3947_v26 = vadd.f32 %v7088_v17, %v3235_v43  ;;  %v7128_v60 = vcombine.low %v4959_v44, %v4963_v56  ;;  %v6175_v54 = vmul.f32 %v5981_v63, %v7734_v20  ;;  %v1509_v33 = vmul.f32 %v10826_v28, %v9238_v55 }
 0x224   : > { %10825 = vst [vmem:[#allocation94_spill] sm:$0xff] %v9244_v3  ;;  %v6179_v62 = vmul.f32 %v5997_v1, %v7734_v20  ;;  %v1981_v61 = vmul.f32 %v10827_v31, %v9244_v3  ;;  %v2529_v7 = vmul.f32 %v2341_v9, %v7666_v35  ;;  %v2533_v12 = vmul.f32 %v2357_v48, %v7666_v35  ;;  %v10829_v1 = vld [vmem:[#allocation29_spill] sm:$0xff] }
 0x225   : > { %v4451_v2 = vadd.f32 %v4403_v14, %v3947_v26  ;;  %v9260_v16 = vrot.slane %v10828_v53, %v7605_v59  ;;  %v3557_v44 = vrot.slane %v9182_v34, %v7653_v57  ;;  %v3573_v43 = vrot.slane %v9190_v22, %v7653_v57  ;;  %v10830_v14 = vld [vmem:[#allocation91_spill] sm:$0xff]  ;;  %v10831_v35 = vld [vmem:[#allocation93_spill] sm:$0xff] }
 0x226   : > { %v7168_v17 = vcombine.low %v6175_v54, %v6179_v62  ;;  %v2029_v56 = vadd.f32 %v1981_v61, %v1509_v33  ;;  %v7050_v63 = vcombine.low %v2529_v7, %v2533_v12  ;;  %v9268_v31 = vrot.slane %v10829_v1, %v7605_v59 }
 0x227   : > { %v5163_v9 = vadd.f32 %v7128_v60, %v4451_v2  ;;  %v3189_v48 = vmul.f32 %v10830_v14, %v9260_v16  ;;  %v3745_v26 = vmul.f32 %v3557_v44, %v7686_v30  ;;  %v3749_v53 = vmul.f32 %v3573_v43, %v7686_v30  ;;  %v10832_v2 = vld [vmem:[#allocation33_spill] sm:$0xff] }
 0x228   : > { %v2733_v28 = vadd.f32 %v7050_v63, %v2029_v56  ;;  %v4405_v3 = vmul.f32 %v10831_v35, %v9268_v31  ;;  %v4773_v61 = vrot.slane %v9204_v32, %v7653_v57  ;;  %v4789_v12 = vrot.slane %v9209_v27, %v7653_v57  ;;  %v10833_v35 = vld [vmem:[#allocation96_spill] sm:$0xff] }
 0x229   : > { %v5667_v62 = vadd.f32 %v5619_v42, %v5163_v9  ;;  %v7090_v7 = vcombine.low %v3745_v26, %v3749_v53  ;;  %v9282_v60 = vrot.slane %v10832_v2, %v7605_v59  ;;  %v5989_v54 = vrot.slane %v9226_v18, %v7653_v57  ;;  %v10834_v9 = vld [vmem:[#allocation95_spill] sm:$0xff] }
 0x22a   : > { %v3237_v33 = vadd.f32 %v3189_v48, %v2733_v28  ;;  %v4961_v44 = vmul.f32 %v4773_v61, %v7716_v8  ;;  %v4965_v43 = vmul.f32 %v4789_v12, %v7716_v8  ;;  %v6005_v56 = vrot.slane %v9231_v37, %v7653_v57  ;;  %v10836_v48 = vld [vmem:[#allocation98_spill] sm:$0xff] }
 0x22b   : > { %v6379_v63 = vadd.f32 %v7168_v17, %v5667_v62  ;;  %v5621_v42 = vmul.f32 %v10833_v35, %v9282_v60  ;;  %v6177_v53 = vmul.f32 %v5989_v54, %v10785_v23  ;;  %v9295_v26 = vrot.slane %v10834_v9, %v7605_v59  ;;  %v10838_v17 = vld [vmem:[#allocation49_spill] sm:$0xff]  ;;  %v10839_v9 = vld [vmem:[#allocation30_spill] sm:$0xff]  ;;  %v10842_v35 = vld [vmem:[#allocation100_spill] sm:$0xff] }
 0x22c   : > { %v3949_v2 = vadd.f32 %v7090_v7, %v3237_v33  ;;  %v7130_v1 = vcombine.low %v4961_v44, %v4965_v43  ;;  %v6181_v28 = vmul.f32 %v6005_v56, %v10785_v23  ;;  %v9300_v61 = vrot.slane %v10836_v48, %v7605_v59  ;;  %v10841_v43 = vld [vmem:[#allocation99_spill] sm:$0xff] }
 0x22d   : > { %10835 = vst [vmem:[#allocation19_spill] sm:$0xff] %v9295_v26  ;;  %6754 = vmatprep.subr.mxu0 %v6379_v63  ;;  %v1506_v12 = vmul.f32 %v10838_v17, %v9295_v26  ;;  %v2329_v62 = vrot.slane %v9162_v45, %v7591_v47  ;;  %v2345_v54 = vrot.slane %v9166_v24, %v7591_v47 }
 0x22e   : > { %10837 = vst [vmem:[#allocation101_spill] sm:$0xff] %v9300_v61  ;;  %v9310_v7 = vrot.slane %v10839_v9, %v7605_v59  ;;  %v4453_v33 = vadd.f32 %v4405_v3, %v3949_v2  ;;  %v7170_v44 = vcombine.low %v6177_v53, %v6181_v28  ;;  %v1978_v56 = vmul.f32 %v10841_v43, %v9300_v61  ;;  %v10843_v3 = vld [vmem:[#allocation16_spill] sm:$0xff]  ;;  %v10844_v53 = vld [vmem:[#allocation34_spill] sm:$0xff] }
 0x22f   : > { %v3545_v63 = vrot.slane %v9182_v34, %v7591_v47  ;;  %v2526_v17 = vmul.f32 %v2329_v62, %v10790_v38  ;;  %v2530_v48 = vmul.f32 %v2345_v54, %v10790_v38  ;;  %v3561_v23 = vrot.slane %v9190_v22, %v7591_v47  ;;  %v10846_v38 = vld [vmem:[#allocation102_spill] sm:$0xff] }
 0x230   : > { %10840 = vst [vmem:[#allocation103_spill] sm:$0xff] %v9310_v7  ;;  %v3186_v14 = vmul.f32 %v10842_v35, %v9310_v7  ;;  %v5165_v9 = vadd.f32 %v7130_v1, %v4453_v33  ;;  %v2026_v26 = vadd.f32 %v1978_v56, %v1506_v12  ;;  %v9325_v28 = vrot.slane %v10844_v53, %v7605_v59  ;;  %v10847_v12 = vld [vmem:[#allocation41_spill] sm:$0xff]  ;;  %v10849_v7 = vld [vmem:[#allocation22_spill] sm:$0xff] }
 0x231   : > { %v3742_v2 = vmul.f32 %v3545_v63, %v10843_v3  ;;  %v7047_v43 = vcombine.low %v2526_v17, %v2530_v48  ;;  %v3746_v61 = vmul.f32 %v3561_v23, %v10843_v3  ;;  %v4761_v62 = vrot.slane %v9204_v32, %v7591_v47  ;;  %v10848_v3 = vld [vmem:[#allocation13_spill] sm:$0xff] }
 0x232   : > { %10845 = vst [vmem:[#allocation53_spill] sm:$0xff] %v9325_v28  ;;  %v4777_v54 = vrot.slane %v9209_v27, %v7591_v47  ;;  %v5669_v35 = vadd.f32 %v5621_v42, %v5165_v9  ;;  %v4402_v1 = vmul.f32 %v10846_v38, %v9325_v28  ;;  %v9336_v33 = vrot.slane %v10847_v12, %v7605_v59 }
 0x233   : > { %v5977_v56 = vrot.slane %v9226_v18, %v7591_v47  ;;  %v2730_v48 = vadd.f32 %v7047_v43, %v2026_v26  ;;  %v7087_v17 = vcombine.low %v3742_v2, %v3746_v61  ;;  %v4958_v23 = vmul.f32 %v4761_v62, %v10793_v49  ;;  %v10850_v26 = vld [vmem:[#allocation104_spill] sm:$0xff] }
 0x234   : > { %v4962_v63 = vmul.f32 %v4777_v54, %v10793_v49  ;;  %v6381_v53 = vadd.f32 %v7170_v44, %v5669_v35  ;;  %v5618_v42 = vmul.f32 %v10848_v3, %v9336_v33  ;;  %v5993_v9 = vrot.slane %v9231_v37, %v7591_v47  ;;  %v10852_v54 = vld [vmem:[#allocation51_spill] sm:$0xff] }
 0x235   : > { %v6174_v38 = vmul.f32 %v5977_v56, %v10747_v11  ;;  %v3234_v12 = vadd.f32 %v3186_v14, %v2730_v48  ;;  %v9349_v8 = vrot.slane %v10849_v7, %v7605_v59  ;;  %v9353_v61 = vrot.slane %v10850_v26, %v7605_v59  ;;  %v10851_v14 = vld [vmem:[#allocation35_spill] sm:$0xff]  ;;  %v10853_v48 = vld [vmem:[#allocation105_spill] sm:$0xff] }
 0x236   : > { %v7127_v28 = vcombine.low %v4958_v23, %v4962_v63  ;;  %6825 = vmatprep.subr.mxu1 %v6381_v53  ;;  %v6178_v35 = vmul.f32 %v5993_v9, %v10747_v11  ;;  %v2337_v44 = vrot.slane %v9162_v45, %v7605_v59  ;;  %v2353_v43 = vrot.slane %v9166_v24, %v7605_v59  ;;  %v10854_v24 = vld [vmem:[#allocation106_spill] sm:$0xff] }
 0x237   : > { %v9362_v2 = vrot.slane %v10851_v14, %v7605_v59  ;;  %v3946_v62 = vadd.f32 %v7087_v17, %v3234_v12  ;;  %v1508_v56 = vmul.f32 %v10852_v54, %v9349_v8  ;;  %v1980_v23 = vmul.f32 %v10853_v48, %v9353_v61  ;;  %v10855_v48 = vld [vmem:[#allocation39_spill] sm:$0xff] }
 0x238   : > { %v3553_v53 = vrot.slane %v9182_v34, %v7605_v59  ;;  %v7167_v63 = vcombine.low %v6174_v38, %v6178_v35  ;;  %v2528_v45 = vmul.f32 %v2337_v44, %v7663_v6  ;;  %v2532_v9 = vmul.f32 %v2353_v43, %v7663_v6  ;;  %v10856_v44 = vld [vmem:[#allocation42_spill] sm:$0xff] }
 0x239   : > { %v3188_v3 = vmul.f32 %v10854_v24, %v9362_v2  ;;  %v4450_v14 = vadd.f32 %v4402_v1, %v3946_v62  ;;  %v2028_v26 = vadd.f32 %v1980_v23, %v1508_v56  ;;  %v3569_v12 = vrot.slane %v9190_v22, %v7605_v59  ;;  %v10857_v56 = vld [vmem:[#allocation107_spill] sm:$0xff] }
 0x23a   : > { %v3744_v17 = vmul.f32 %v3553_v53, %v7679_v19  ;;  %v7049_v54 = vcombine.low %v2528_v45, %v2532_v9  ;;  %v9379_v7 = vrot.slane %v10855_v48, %v7605_v59  ;;  %v4769_v38 = vrot.slane %v9204_v32, %v7605_v59 }
 0x23b   : > { %v4785_v34 = vrot.slane %v9209_v27, %v7605_v59  ;;  %v5162_v35 = vadd.f32 %v7127_v28, %v4450_v14  ;;  %v3748_v1 = vmul.f32 %v3569_v12, %v7679_v19  ;;  %v9388_v43 = vrot.slane %v10856_v44, %v7605_v59  ;;  %v10858_v28 = vld [vmem:[#allocation108_spill] sm:$0xff] }
 0x23c   : > { %v5985_v22 = vrot.slane %v9226_v18, %v7605_v59  ;;  %v2732_v62 = vadd.f32 %v7049_v54, %v2028_v26  ;;  %v4404_v23 = vmul.f32 %v10857_v56, %v9379_v7  ;;  %v4960_v53 = vmul.f32 %v4769_v38, %v7696_v40  ;;  %v10859_v26 = vld [vmem:[#allocation67_spill] sm:$0xff] }
 0x23d   : > { %v4964_v32 = vmul.f32 %v4785_v34, %v7696_v40  ;;  %v5666_v45 = vadd.f32 %v5618_v42, %v5162_v35  ;;  %v7089_v27 = vcombine.low %v3744_v17, %v3748_v1  ;;  %v5620_v14 = vmul.f32 %v10858_v28, %v9388_v43  ;;  %v10860_v34 = vld [vmem:[#allocation109_spill] sm:$0xff] }
 0x23e   : > { %v6001_v9 = vrot.slane %v9231_v37, %v7605_v59  ;;  %v3236_v12 = vadd.f32 %v3188_v3, %v2732_v62  ;;  %v6176_v18 = vmul.f32 %v5985_v22, %v7726_v13  ;;  %v1503_v54 = vmul.f32 %v10859_v26, %v9149_v36  ;;  %v10861_v3 = vld [vmem:[#allocation57_spill] sm:$0xff] }
 0x23f   : > { %v7129_v44 = vcombine.low %v4960_v53, %v4964_v32  ;;  %v6378_v56 = vadd.f32 %v7167_v63, %v5666_v45  ;;  %v1975_v42 = vmul.f32 %v10860_v34, %v9158_v21  ;;  %v2301_v17 = vrot.slane %v10806_v4, %v7602_v58 }
 0x240   : > { %v6180_v38 = vmul.f32 %v6001_v9, %v7726_v13  ;;  %v3948_v35 = vadd.f32 %v7089_v27, %v3236_v12  ;;  %v2317_v37 = vrot.slane %v10807_v10, %v7602_v58  ;;  %v3183_v1 = vmul.f32 %v10861_v3, %v9172_v0  ;;  %v10862_v27 = vld [vmem:[#allocation36_spill] sm:$0xff] }
 0x241   : > { %v3517_v22 = vrot.slane %v10811_v46, %v7602_v58  ;;  %6755 = vmatpush1.msra.mxu0 %v6378_v56  ;;  %v2023_v63 = vadd.f32 %v1975_v42, %v1503_v54  ;;  %v2519_v62 = vmul.f32 %v2301_v17, %v7660_v5  ;;  %v3533_v21 = vrot.slane %v10813_v41, %v7602_v58 }
 0x242   : > { %v7169_v36 = vcombine.low %v6176_v18, %v6180_v38  ;;  %v4452_v53 = vadd.f32 %v4404_v23, %v3948_v35  ;;  %v2523_v32 = vmul.f32 %v2317_v37, %v7660_v5  ;;  %v4399_v9 = vmul.f32 %v10862_v27, %v9200_v51  ;;  %v10863_v18 = vld [vmem:[#allocation81_spill] sm:$0xff]  ;;  %v10864_v35 = vld [vmem:[#allocation20_spill] sm:$0xff] }
 0x243   : > { %v3735_v45 = vmul.f32 %v3517_v22, %v10670_v50  ;;  %v3739_v0 = vmul.f32 %v3533_v21, %v10670_v50  ;;  %v4733_v56 = vrot.slane %v10815_v15, %v7602_v58  ;;  %v4749_v12 = vrot.slane %v10816_v29, %v7602_v58  ;;  %v10865_v21 = vld [vmem:[#allocation44_spill] sm:$0xff] }
 0x244   : > { %v5615_v54 = vmul.f32 %v10863_v18, %v9213_v39  ;;  %v5164_v38 = vadd.f32 %v7129_v44, %v4452_v53  ;;  %v7044_v23 = vcombine.low %v2519_v62, %v2523_v32  ;;  %v5949_v42 = vrot.slane %v10820_v52, %v7602_v58  ;;  %v10866_v53 = vld [vmem:[#allocation94_spill] sm:$0xff]  ;;  %v10867_v32 = vld [vmem:[#allocation37_spill] sm:$0xff] }
 0x245   : > { %v5965_v17 = vrot.slane %v10822_v25, %v7602_v58  ;;  %v7084_v51 = vcombine.low %v3735_v45, %v3739_v0  ;;  %v4951_v37 = vmul.f32 %v4733_v56, %v10864_v35  ;;  %v4955_v22 = vmul.f32 %v4749_v12, %v10864_v35 }
 0x246   : > { %v1505_v27 = vmul.f32 %v10865_v21, %v9238_v55  ;;  %v5668_v3 = vadd.f32 %v5620_v14, %v5164_v38  ;;  %v2727_v28 = vadd.f32 %v7044_v23, %v2023_v63  ;;  %v6167_v39 = vmul.f32 %v5949_v42, %v7734_v20  ;;  %v10868_v55 = vld [vmem:[#allocation60_spill] sm:$0xff]  ;;  %v10869_v38 = vld [vmem:[#allocation15_spill] sm:$0xff] }
 0x247   : > { %v6171_v44 = vmul.f32 %v5965_v17, %v7734_v20  ;;  %v7124_v62 = vcombine.low %v4951_v37, %v4955_v22  ;;  %v1977_v18 = vmul.f32 %v10867_v32, %v10866_v53  ;;  %v2309_v45 = vrot.slane %v10806_v4, %v7653_v57  ;;  %v10872_v53 = vld [vmem:[#allocation21_spill] sm:$0xff] }
 0x248   : > { %v2325_v0 = vrot.slane %v10807_v10, %v7653_v57  ;;  %v6380_v56 = vadd.f32 %v7169_v36, %v5668_v3  ;;  %v3231_v12 = vadd.f32 %v3183_v1, %v2727_v28  ;;  %v3185_v14 = vmul.f32 %v10868_v55, %v9260_v16  ;;  %v10870_v3 = vld [vmem:[#allocation61_spill] sm:$0xff] }
 0x249   : > { %v7164_v34 = vcombine.low %v6167_v39, %v6171_v44  ;;  %v2025_v63 = vadd.f32 %v1977_v18, %v1505_v27  ;;  %v2521_v23 = vmul.f32 %v2309_v45, %v10869_v38  ;;  %v3525_v17 = vrot.slane %v10811_v46, %v7653_v57  ;;  %v10871_v18 = vld [vmem:[#allocation32_spill] sm:$0xff] }
 0x24a   : > { %v2525_v42 = vmul.f32 %v2325_v0, %v10869_v38  ;;  %6826 = vmatpush1.msra.mxu1 %v6380_v56  ;;  %v3943_v37 = vadd.f32 %v7084_v51, %v3231_v12  ;;  %v3541_v22 = vrot.slane %v10813_v41, %v7653_v57  ;;  %v4401_v28 = vmul.f32 %v10870_v3, %v9268_v31 }
 0x24b   : > { %v4741_v1 = vrot.slane %v10815_v15, %v7653_v57  ;;  %v3737_v36 = vmul.f32 %v3525_v17, %v7686_v30  ;;  %v4757_v27 = vrot.slane %v10816_v29, %v7653_v57  ;;  %v5617_v39 = vmul.f32 %v10871_v18, %v9282_v60  ;;  %v10875_v60 = vld [vmem:[#allocation24_spill] sm:$0xff] }
 0x24c   : > { %v7046_v16 = vcombine.low %v2521_v23, %v2525_v42  ;;  %v4447_v44 = vadd.f32 %v4399_v9, %v3943_v37  ;;  %v3741_v51 = vmul.f32 %v3541_v22, %v7686_v30  ;;  %v5957_v31 = vrot.slane %v10820_v52, %v7653_v57  ;;  %v10873_v23 = vld [vmem:[#allocation19_spill] sm:$0xff]  ;;  %v10874_v42 = vld [vmem:[#allocation66_spill] sm:$0xff]  ;;  %v10876_v37 = vld [vmem:[#allocation101_spill] sm:$0xff] }
 0x24d   : > { %v4953_v45 = vmul.f32 %v4741_v1, %v10872_v53  ;;  %v4957_v56 = vmul.f32 %v4757_v27, %v10872_v53  ;;  %v5973_v12 = vrot.slane %v10822_v25, %v7653_v57  ;;  %v1502_v17 = vmul.f32 %v10874_v42, %v10873_v23  ;;  %v10877_v22 = vld [vmem:[#allocation38_spill] sm:$0xff]  ;;  %v10878_v23 = vld [vmem:[#allocation103_spill] sm:$0xff] }
 0x24e   : > { %v2729_v0 = vadd.f32 %v7046_v16, %v2025_v63  ;;  %v5159_v3 = vadd.f32 %v7124_v62, %v4447_v44  ;;  %v7086_v55 = vcombine.low %v3737_v36, %v3741_v51  ;;  %v6169_v9 = vmul.f32 %v5957_v31, %v10875_v60  ;;  %v10879_v62 = vld [vmem:[#allocation40_spill] sm:$0xff]  ;;  %v10880_v31 = vld [vmem:[#allocation14_spill] sm:$0xff] }
 0x24f   : > { %v1974_v18 = vmul.f32 %v10877_v22, %v10876_v37  ;;  %v7126_v32 = vcombine.low %v4953_v45, %v4957_v56  ;;  %v6173_v21 = vmul.f32 %v5973_v12, %v10875_v60  ;;  %v2297_v63 = vrot.slane %v10806_v4, %v7591_v47 }
 0x250   : > { %v3233_v1 = vadd.f32 %v3185_v14, %v2729_v0  ;;  %v5663_v16 = vadd.f32 %v5615_v54, %v5159_v3  ;;  %v2313_v26 = vrot.slane %v10807_v10, %v7591_v47  ;;  %v3182_v36 = vmul.f32 %v10879_v62, %v10878_v23  ;;  %v10881_v3 = vld [vmem:[#allocation53_spill] sm:$0xff] }
 0x251   : > { %v2022_v27 = vadd.f32 %v1974_v18, %v1502_v17  ;;  %v7166_v51 = vcombine.low %v6169_v9, %v6173_v21  ;;  %v2518_v42 = vmul.f32 %v2297_v63, %v10880_v31  ;;  %v3513_v14 = vrot.slane %v10811_v46, %v7591_v47  ;;  %v10882_v18 = vld [vmem:[#allocation64_spill] sm:$0xff] }
 0x252   : > { %v3945_v44 = vadd.f32 %v7086_v55, %v3233_v1  ;;  %v6375_v45 = vadd.f32 %v7164_v34, %v5663_v16  ;;  %v2522_v0 = vmul.f32 %v2313_v26, %v10880_v31  ;;  %v3529_v54 = vrot.slane %v10813_v41, %v7591_v47  ;;  %v10883_v17 = vld [vmem:[#allocation16_spill] sm:$0xff]  ;;  %v10884_v26 = vld [vmem:[#allocation65_spill] sm:$0xff] }
 0x253   : > { %v4398_v56 = vmul.f32 %v10882_v18, %v10881_v3  ;;  %v3734_v37 = vmul.f32 %v3513_v14, %v10883_v17  ;;  %v4729_v21 = vrot.slane %v10815_v15, %v7591_v47  ;;  %v4745_v55 = vrot.slane %v10816_v29, %v7591_v47 }
 0x254   : > { %v4449_v12 = vadd.f32 %v4401_v28, %v3945_v44  ;;  %6756 = vmatprep.subr.mxu0 %v6375_v45  ;;  %v7043_v9 = vcombine.low %v2518_v42, %v2522_v0  ;;  %v3738_v34 = vmul.f32 %v3529_v54, %v10883_v17  ;;  %v5614_v1 = vmul.f32 %v10884_v26, %v9336_v33  ;;  %v10885_v45 = vld [vmem:[#allocation43_spill] sm:$0xff] }
 0x255   : > { %v5945_v63 = vrot.slane %v10820_v52, %v7591_v47  ;;  %v4950_v28 = vmul.f32 %v4729_v21, %v10793_v49  ;;  %v4954_v23 = vmul.f32 %v4745_v55, %v10793_v49  ;;  %v5961_v44 = vrot.slane %v10822_v25, %v7591_v47 }
 0x256   : > { %v5161_v16 = vadd.f32 %v7126_v32, %v4449_v12  ;;  %v2726_v14 = vadd.f32 %v7043_v9, %v2022_v27  ;;  %v7083_v3 = vcombine.low %v3734_v37, %v3738_v34  ;;  %v1504_v0 = vmul.f32 %v10885_v45, %v9349_v8  ;;  %v10886_v32 = vld [vmem:[#allocation83_spill] sm:$0xff]  ;;  %v10887_v37 = vld [vmem:[#allocation90_spill] sm:$0xff] }
 0x257   : > { %v6166_v42 = vmul.f32 %v5945_v63, %v10747_v11  ;;  %v7123_v33 = vcombine.low %v4950_v28, %v4954_v23  ;;  %v6170_v26 = vmul.f32 %v5961_v44, %v10747_v11  ;;  %v1976_v12 = vmul.f32 %v10886_v32, %v9353_v61  ;;  %v10908_v32 = vld [vmem:[#allocation80_spill] sm:$0xff] }
 0x258   : > { %v5665_v54 = vadd.f32 %v5617_v39, %v5161_v16  ;;  %v3230_v21 = vadd.f32 %v3182_v36, %v2726_v14  ;;  %v2305_v55 = vrot.slane %v10806_v4, %v7605_v59  ;;  %v2321_v27 = vrot.slane %v10807_v10, %v7605_v59  ;;  %v10888_v36 = vld [vmem:[#allocation97_spill] sm:$0xff]  ;;  %v10889_v14 = vld [vmem:[#allocation92_spill] sm:$0xff] }
 0x259   : > { %v3184_v9 = vmul.f32 %v10887_v37, %v9362_v2  ;;  %v7163_v63 = vcombine.low %v6166_v42, %v6170_v26  ;;  %v2024_v8 = vadd.f32 %v1976_v12, %v1504_v0  ;;  %v3521_v39 = vrot.slane %v10811_v46, %v7605_v59 }
 0x25a   : > { %v6377_v34 = vadd.f32 %v7166_v51, %v5665_v54  ;;  %v3942_v16 = vadd.f32 %v7083_v3, %v3230_v21  ;;  %v2520_v28 = vmul.f32 %v2305_v55, %v7663_v6  ;;  %v2524_v61 = vmul.f32 %v2321_v27, %v7663_v6  ;;  %v10891_v27 = vld [vmem:[#allocation31_spill] sm:$0xff] }
 0x25b   : > { %v3537_v4 = vrot.slane %v10813_v41, %v7605_v59  ;;  %v3736_v10 = vmul.f32 %v3521_v39, %v7679_v19  ;;  %v4400_v2 = vmul.f32 %v10888_v36, %v9379_v7  ;;  %v4737_v51 = vrot.slane %v10815_v15, %v7605_v59 }
 0x25c   : > { %6827 = vmatprep.subr.mxu1 %v6377_v34  ;;  %v4753_v46 = vrot.slane %v10816_v29, %v7605_v59  ;;  %v4446_v26 = vadd.f32 %v4398_v56, %v3942_v16  ;;  %v7045_v23 = vcombine.low %v2520_v28, %v2524_v61  ;;  %v5616_v3 = vmul.f32 %v10889_v14, %v9388_v43  ;;  %v10890_v56 = vld [vmem:[#allocation78_spill] sm:$0xff] }
 0x25d   : > { %v3740_v44 = vmul.f32 %v3537_v4, %v7679_v19  ;;  %v4952_v41 = vmul.f32 %v4737_v51, %v7696_v40  ;;  %v5953_v7 = vrot.slane %v10820_v52, %v7605_v59  ;;  %v5969_v15 = vrot.slane %v10822_v25, %v7605_v59  ;;  %v10892_v25 = vld [vmem:[#allocation50_spill] sm:$0xff] }
 0x25e   : > { %v4956_v42 = vmul.f32 %v4753_v46, %v7696_v40  ;;  %v5158_v0 = vadd.f32 %v7123_v33, %v4446_v26  ;;  %v2728_v54 = vadd.f32 %v7045_v23, %v2024_v8  ;;  %v9538_v12 = vrot.slane %v10890_v56, %v7602_v58  ;;  %v10893_v8 = vld [vmem:[#allocation68_spill] sm:$0xff]  ;;  %v10894_v61 = vld [vmem:[#allocation82_spill] sm:$0xff]  ;;  %v10896_v46 = vld [vmem:[#allocation25_spill] sm:$0xff] }
 0x25f   : > { %v7085_v29 = vcombine.low %v3736_v10, %v3740_v44  ;;  %v6168_v43 = vmul.f32 %v5953_v7, %v7726_v13  ;;  %v6172_v55 = vmul.f32 %v5969_v15, %v7726_v13  ;;  %v9544_v34 = vrot.slane %v10891_v27, %v7602_v58  ;;  %v10895_v10 = vld [vmem:[#allocation69_spill] sm:$0xff]  ;;  %v10897_v44 = vld [vmem:[#allocation72_spill] sm:$0xff] }
 0x260   : > { %v7125_v21 = vcombine.low %v4952_v41, %v4956_v42  ;;  %v5662_v52 = vadd.f32 %v5614_v1, %v5158_v0  ;;  %v3232_v39 = vadd.f32 %v3184_v9, %v2728_v54  ;;  %v1483_v33 = vmul.f32 %v10892_v25, %v9538_v12  ;;  %v10898_v15 = vld [vmem:[#allocation84_spill] sm:$0xff]  ;;  %v10899_v54 = vld [vmem:[#allocation73_spill] sm:$0xff]  ;;  %v10904_v25 = vld [vmem:[#allocation27_spill] sm:$0xff] }
 0x261   : > { %v9550_v16 = vcombine.high %v10893_v8, %v10893_v8  ;;  %v7165_v28 = vcombine.low %v6168_v43, %v6172_v55  ;;  %v1955_v4 = vmul.f32 %v10894_v61, %v9544_v34  ;;  %v9556_v51 = vcombine.high %v10895_v10, %v10895_v10  ;;  %v10903_v61 = vld [vmem:[#allocation85_spill] sm:$0xff] }
 0x262   : > { %v9560_v26 = vrot.slane %v10896_v46, %v7602_v58  ;;  %v6374_v1 = vadd.f32 %v7163_v63, %v5662_v52  ;;  %v3944_v9 = vadd.f32 %v7085_v29, %v3232_v39  ;;  %v9566_v41 = vcombine.high %v10897_v44, %v10897_v44  ;;  %v10900_v52 = vld [vmem:[#allocation26_spill] sm:$0xff] }
 0x263   : > { %v2269_v23 = vrot.slane %v9550_v16, %v7602_v58  ;;  %v2019_v42 = vadd.f32 %v1955_v4, %v1483_v33  ;;  %v2285_v7 = vrot.slane %v9556_v51, %v7602_v58  ;;  %v9574_v43 = vcombine.high %v10899_v54, %v10899_v54 }
 0x264   : > { %v3163_v0 = vmul.f32 %v10898_v15, %v9560_v26  ;;  %6757 = vmatpush1.msra.mxu0 %v6374_v1  ;;  %v4448_v63 = vadd.f32 %v4400_v2, %v3944_v9  ;;  %v3485_v55 = vrot.slane %v9566_v41, %v7602_v58  ;;  %v9581_v39 = vrot.slane %v10900_v52, %v7602_v58  ;;  %v10901_v15 = vld [vmem:[#allocation76_spill] sm:$0xff] }
 0x265   : > { %v2511_v29 = vmul.f32 %v2269_v23, %v7660_v5  ;;  %v2515_v33 = vmul.f32 %v2285_v7, %v7660_v5  ;;  %v3501_v4 = vrot.slane %v9574_v43, %v7602_v58  ;;  %v9588_v46 = vcombine.high %v10901_v15, %v10901_v15  ;;  %v10902_v1 = vld [vmem:[#allocation48_spill] sm:$0xff] }
 0x266   : > { %v9592_v2 = vcombine.high %v10902_v1, %v10902_v1  ;;  %v5160_v9 = vadd.f32 %v7125_v21, %v4448_v63  ;;  %v3727_v23 = vmul.f32 %v3485_v55, %v10670_v50  ;;  %v4379_v52 = vmul.f32 %v10903_v61, %v9581_v39  ;;  %v10906_v21 = vld [vmem:[#allocation87_spill] sm:$0xff] }
 0x267   : > { %v9599_v7 = vrot.slane %v10904_v25, %v7602_v58  ;;  %v7040_v14 = vcombine.low %v2511_v29, %v2515_v33  ;;  %v3731_v27 = vmul.f32 %v3501_v4, %v10670_v50  ;;  %v4701_v56 = vrot.slane %v9588_v46, %v7602_v58  ;;  %v10907_v55 = vld [vmem:[#allocation79_spill] sm:$0xff] }
 0x268   : > { %v4717_v36 = vrot.slane %v9592_v2, %v7602_v58  ;;  %v5664_v37 = vadd.f32 %v5616_v3, %v5160_v9  ;;  %v9610_v61 = vcombine.high %v10907_v55, %v10907_v55  ;;  %v9614_v25 = vcombine.high %v10908_v32, %v10908_v32 }
 0x269   : > { %10905 = vst [vmem:[#allocation54_spill] sm:$0xff] %v9599_v7  ;;  %v5595_v63 = vmul.f32 %v10906_v21, %v9599_v7  ;;  %v2723_v29 = vadd.f32 %v7040_v14, %v2019_v42  ;;  %v7080_v33 = vcombine.low %v3727_v23, %v3731_v27  ;;  %v4943_v4 = vmul.f32 %v4701_v56, %v10864_v35  ;;  %v10909_v21 = vld [vmem:[#allocation86_spill] sm:$0xff]  ;;  %v10911_v14 = vld [vmem:[#allocation88_spill] sm:$0xff] }
 0x26a   : > { %v4947_v45 = vmul.f32 %v4717_v36, %v10864_v35  ;;  %v6376_v18 = vadd.f32 %v7165_v28, %v5664_v37  ;;  %v5917_v3 = vrot.slane %v9610_v61, %v7602_v58  ;;  %v5933_v9 = vrot.slane %v9614_v25, %v7602_v58  ;;  %v10913_v28 = vld [vmem:[#allocation52_spill] sm:$0xff] }
 0x26b   : > { %v9624_v62 = vrot.slane %v10909_v21, %v7602_v58  ;;  %v3227_v22 = vadd.f32 %v3163_v0, %v2723_v29  ;;  %v9628_v27 = vrot.slane %v10911_v14, %v7602_v58  ;;  %v2277_v36 = vrot.slane %v9550_v16, %v7653_v57  ;;  %v10915_v14 = vld [vmem:[#allocation28_spill] sm:$0xff] }
 0x26c   : > { %v7120_v7 = vcombine.low %v4943_v4, %v4947_v45  ;;  %6828 = vmatpush1.msra.mxu1 %v6376_v18  ;;  %v6159_v37 = vmul.f32 %v5917_v3, %v7734_v20  ;;  %v6163_v56 = vmul.f32 %v5933_v9, %v7734_v20  ;;  %v2293_v23 = vrot.slane %v9556_v51, %v7653_v57  ;;  %v10914_v45 = vld [vmem:[#allocation89_spill] sm:$0xff] }
 0x26d   : > { %10910 = vst [vmem:[#allocation55_spill] sm:$0xff] %v9624_v62  ;;  %10912 = vst [vmem:[#allocation56_spill] sm:$0xff] %v9628_v27  ;;  %v1485_v42 = vmul.f32 %v10913_v28, %v9624_v62  ;;  %v3939_v0 = vadd.f32 %v7080_v33, %v3227_v22  ;;  %v1957_v29 = vmul.f32 %v10914_v45, %v9628_v27  ;;  %v10916_v33 = vld [vmem:[#allocation91_spill] sm:$0xff]  ;;  %v10919_v62 = vld [vmem:[#allocation93_spill] sm:$0xff] }
 0x26e   : > { %v2513_v4 = vmul.f32 %v2277_v36, %v10869_v38  ;;  %v9643_v21 = vrot.slane %v10915_v14, %v7602_v58  ;;  %v7160_v18 = vcombine.low %v6159_v37, %v6163_v56  ;;  %v2517_v3 = vmul.f32 %v2293_v23, %v10869_v38  ;;  %v10917_v36 = vld [vmem:[#allocation29_spill] sm:$0xff] }
 0x26f   : > { %v3493_v9 = vrot.slane %v9566_v41, %v7653_v57  ;;  %v3509_v28 = vrot.slane %v9574_v43, %v7653_v57  ;;  %v4443_v20 = vadd.f32 %v4379_v52, %v3939_v0  ;;  %v2021_v22 = vadd.f32 %v1957_v29, %v1485_v42  ;;  %v10920_v0 = vld [vmem:[#allocation33_spill] sm:$0xff] }
 0x270   : > { %v3165_v45 = vmul.f32 %v10916_v33, %v9643_v21  ;;  %v9654_v27 = vrot.slane %v10917_v36, %v7602_v58  ;;  %v7042_v14 = vcombine.low %v2513_v4, %v2517_v3  ;;  %v4709_v23 = vrot.slane %v9588_v46, %v7653_v57 }
 0x271   : > { %v3729_v37 = vmul.f32 %v3493_v9, %v7686_v30  ;;  %v3733_v56 = vmul.f32 %v3509_v28, %v7686_v30  ;;  %v5155_v38 = vadd.f32 %v7120_v7, %v4443_v20  ;;  %v4725_v42 = vrot.slane %v9592_v2, %v7653_v57  ;;  %v10922_v7 = vld [vmem:[#allocation96_spill] sm:$0xff] }
 0x272   : > { %10918 = vst [vmem:[#allocation58_spill] sm:$0xff] %v9654_v27  ;;  %v4381_v52 = vmul.f32 %v10919_v62, %v9654_v27  ;;  %v9666_v29 = vrot.slane %v10920_v0, %v7602_v58  ;;  %v2725_v36 = vadd.f32 %v7042_v14, %v2021_v22  ;;  %v4945_v3 = vmul.f32 %v4709_v23, %v10872_v53  ;;  %v10923_v14 = vld [vmem:[#allocation95_spill] sm:$0xff] }
 0x273   : > { %v7082_v4 = vcombine.low %v3729_v37, %v3733_v56  ;;  %v5925_v28 = vrot.slane %v9610_v61, %v7653_v57  ;;  %v5659_v9 = vadd.f32 %v5595_v63, %v5155_v38  ;;  %v4949_v20 = vmul.f32 %v4725_v42, %v10872_v53  ;;  %v10925_v37 = vld [vmem:[#allocation98_spill] sm:$0xff] }
 0x274   : > { %10921 = vst [vmem:[#allocation59_spill] sm:$0xff] %v9666_v29  ;;  %v5597_v62 = vmul.f32 %v10922_v7, %v9666_v29  ;;  %v5941_v33 = vrot.slane %v9614_v25, %v7653_v57  ;;  %v3229_v27 = vadd.f32 %v3165_v45, %v2725_v36  ;;  %v9679_v22 = vrot.slane %v10923_v14, %v7602_v58  ;;  %v10927_v45 = vld [vmem:[#allocation49_spill] sm:$0xff] }
 0x275   : > { %v6161_v0 = vmul.f32 %v5925_v28, %v10875_v60  ;;  %v9683_v56 = vrot.slane %v10925_v37, %v7602_v58  ;;  %v6371_v38 = vadd.f32 %v7160_v18, %v5659_v9  ;;  %v7122_v63 = vcombine.low %v4945_v3, %v4949_v20  ;;  %v10928_v28 = vld [vmem:[#allocation99_spill] sm:$0xff]  ;;  %v10929_v3 = vld [vmem:[#allocation30_spill] sm:$0xff] }
 0x276   : > { %10924 = vst [vmem:[#allocation62_spill] sm:$0xff] %v9679_v22  ;;  %v6165_v23 = vmul.f32 %v5941_v33, %v10875_v60  ;;  %v2265_v42 = vrot.slane %v9550_v16, %v7591_v47  ;;  %v3941_v7 = vadd.f32 %v7082_v4, %v3229_v27  ;;  %v1482_v36 = vmul.f32 %v10927_v45, %v9679_v22  ;;  %v10931_v45 = vld [vmem:[#allocation100_spill] sm:$0xff] }
 0x277   : > { %10926 = vst [vmem:[#allocation63_spill] sm:$0xff] %v9683_v56  ;;  %v1954_v29 = vmul.f32 %v10928_v28, %v9683_v56  ;;  %v2281_v14 = vrot.slane %v9556_v51, %v7591_v47  ;;  %6758 = vmatprep.subr.mxu0 %v6371_v38  ;;  %v9697_v33 = vrot.slane %v10929_v3, %v7602_v58 }
 0x278   : > { %v7162_v37 = vcombine.low %v6161_v0, %v6165_v23  ;;  %v2510_v18 = vmul.f32 %v2265_v42, %v10880_v31  ;;  %v3481_v27 = vrot.slane %v9566_v41, %v7591_v47  ;;  %v4445_v4 = vadd.f32 %v4381_v52, %v3941_v7  ;;  %v10932_v23 = vld [vmem:[#allocation34_spill] sm:$0xff] }
 0x279   : > { %10930 = vst [vmem:[#allocation20_spill] sm:$0xff] %v9697_v33  ;;  %v2018_v9 = vadd.f32 %v1954_v29, %v1482_v36  ;;  %v2514_v20 = vmul.f32 %v2281_v14, %v10880_v31  ;;  %v3497_v28 = vrot.slane %v9574_v43, %v7591_v47  ;;  %v3162_v38 = vmul.f32 %v10931_v45, %v9697_v33  ;;  %v10933_v14 = vld [vmem:[#allocation12_spill] sm:$0xff]  ;;  %v10934_v36 = vld [vmem:[#allocation17_spill] sm:$0xff] }
 0x27a   : > { %v3726_v0 = vmul.f32 %v3481_v27, %v10883_v17  ;;  %v9709_v42 = vrot.slane %v10932_v23, %v7602_v58  ;;  %v4697_v3 = vrot.slane %v9588_v46, %v7591_v47  ;;  %v5157_v56 = vadd.f32 %v7122_v63, %v4445_v4  ;;  %v10935_v31 = vld [vmem:[#allocation77_spill] sm:$0xff]  ;;  %v10937_v27 = vld [vmem:[#allocation102_spill] sm:$0xff] }
 0x27b   : > { %v7039_v52 = vcombine.low %v2510_v18, %v2514_v20  ;;  %v3730_v29 = vmul.f32 %v3497_v28, %v10883_v17  ;;  %v4713_v7 = vrot.slane %v9592_v2, %v7591_v47  ;;  %v10936_v45 = vcombine.high %v10934_v36, %v10935_v31  ;;  %v10938_v17 = vld [vmem:[#allocation41_spill] sm:$0xff] }
 0x27c   : > { %v4378_v23 = vmul.f32 %v10937_v27, %v9709_v42  ;;  %v4942_v60 = vmul.f32 %v4697_v3, %v10793_v49  ;;  %v5913_v63 = vrot.slane %v9610_v61, %v7591_v47  ;;  %v5661_v18 = vadd.f32 %v5597_v62, %v5157_v56  ;;  %v10940_v56 = vld [vmem:[#allocation104_spill] sm:$0xff] }
 0x27d   : > { %v9720_v33 = vrot.slane %v10936_v45, %v10933_v14  ;;  %v2722_v4 = vadd.f32 %v7039_v52, %v2018_v9  ;;  %v7079_v28 = vcombine.low %v3726_v0, %v3730_v29  ;;  %v4946_v20 = vmul.f32 %v4713_v7, %v10793_v49  ;;  %v10939_v14 = vld [vmem:[#allocation22_spill] sm:$0xff]  ;;  %v10941_v52 = vld [vmem:[#allocation51_spill] sm:$0xff] }
 0x27e   : > { %v9730_v22 = vrot.slane %v10938_v17, %v7602_v58  ;;  %v5929_v31 = vrot.slane %v9614_v25, %v7591_v47  ;;  %v6158_v45 = vmul.f32 %v5913_v63, %v10747_v11  ;;  %v9737_v3 = vrot.slane %v10939_v14, %v7602_v58 }
 0x27f   : > { %v6373_v36 = vadd.f32 %v7162_v37, %v5661_v18  ;;  %v3226_v27 = vadd.f32 %v3162_v38, %v2722_v4  ;;  %v7119_v62 = vcombine.low %v4942_v60, %v4946_v20  ;;  %v9741_v9 = vrot.slane %v10940_v56, %v7602_v58  ;;  %v10942_v37 = vld [vmem:[#allocation105_spill] sm:$0xff]  ;;  %v10943_v38 = vld [vmem:[#allocation35_spill] sm:$0xff] }
 0x280   : > { %v6162_v0 = vmul.f32 %v5929_v31, %v10747_v11  ;;  %v1484_v29 = vmul.f32 %v10941_v52, %v9737_v3  ;;  %v2273_v7 = vrot.slane %v9550_v16, %v7605_v59  ;;  %v2289_v63 = vrot.slane %v9556_v51, %v7605_v59 }
 0x281   : > { %6829 = vmatprep.subr.mxu1 %v6373_v36  ;;  %v3938_v17 = vadd.f32 %v7079_v28, %v3226_v27  ;;  %v1956_v60 = vmul.f32 %v10942_v37, %v9741_v9  ;;  %v9754_v18 = vrot.slane %v10943_v38, %v7602_v58  ;;  %v3489_v4 = vrot.slane %v9566_v41, %v7605_v59  ;;  %v10944_v27 = vld [vmem:[#allocation13_spill] sm:$0xff] }
 0x282   : > { %v7159_v20 = vcombine.low %v6158_v45, %v6162_v0  ;;  %v2512_v31 = vmul.f32 %v2273_v7, %v7663_v6  ;;  %v2516_v16 = vmul.f32 %v2289_v63, %v7663_v6  ;;  %v3505_v51 = vrot.slane %v9574_v43, %v7605_v59 }
 0x283   : > { %v4442_v36 = vadd.f32 %v4378_v23, %v3938_v17  ;;  %v5594_v28 = vmul.f32 %v10944_v27, %v9730_v22  ;;  %v2020_v37 = vadd.f32 %v1956_v60, %v1484_v29  ;;  %v3728_v52 = vmul.f32 %v3489_v4, %v7679_v19  ;;  %v10945_v60 = vld [vmem:[#allocation42_spill] sm:$0xff] }
 0x284   : > { %v7041_v38 = vcombine.low %v2512_v31, %v2516_v16  ;;  %v3164_v56 = vmul.f32 %v10854_v24, %v9754_v18  ;;  %v3732_v41 = vmul.f32 %v3505_v51, %v7679_v19  ;;  %v4705_v45 = vrot.slane %v9588_v46, %v7605_v59  ;;  %v10969_v24 = vld [vmem:[#allocation32_spill] sm:$0xff] }
 0x285   : > { %v5154_v0 = vadd.f32 %v7119_v62, %v4442_v36  ;;  %v9772_v43 = vrot.slane %v10855_v48, %v7602_v58  ;;  %v4721_v17 = vrot.slane %v9592_v2, %v7605_v59  ;;  %v5921_v23 = vrot.slane %v9610_v61, %v7605_v59  ;;  %v10946_v62 = vld [vmem:[#allocation107_spill] sm:$0xff]  ;;  %v10957_v48 = vld [vmem:[#allocation54_spill] sm:$0xff] }
 0x286   : > { %v2724_v29 = vadd.f32 %v7041_v38, %v2020_v37  ;;  %v7081_v7 = vcombine.low %v3728_v52, %v3732_v41  ;;  %v4944_v63 = vmul.f32 %v4705_v45, %v7696_v40  ;;  %v9781_v4 = vrot.slane %v10945_v60, %v7602_v58  ;;  %v10947_v52 = vld [vmem:[#allocation67_spill] sm:$0xff]  ;;  %v10948_v38 = vld [vmem:[#allocation109_spill] sm:$0xff] }
 0x287   : > { %v5658_v46 = vadd.f32 %v5594_v28, %v5154_v0  ;;  %v4380_v31 = vmul.f32 %v10946_v62, %v9772_v43  ;;  %v4948_v16 = vmul.f32 %v4721_v17, %v7696_v40  ;;  %v5937_v2 = vrot.slane %v9614_v25, %v7605_v59  ;;  %v10949_v62 = vld [vmem:[#allocation108_spill] sm:$0xff] }
 0x288   : > { %v3228_v51 = vadd.f32 %v3164_v56, %v2724_v29  ;;  %v6160_v61 = vmul.f32 %v5921_v23, %v7726_v13  ;;  %v1479_v37 = vmul.f32 %v10947_v52, %v9538_v12  ;;  %v1951_v36 = vmul.f32 %v10948_v38, %v9544_v34 }
 0x289   : > { %v6370_v41 = vadd.f32 %v7159_v20, %v5658_v46  ;;  %v7121_v45 = vcombine.low %v4944_v63, %v4948_v16  ;;  %v6164_v28 = vmul.f32 %v5937_v2, %v7726_v13  ;;  %v2237_v0 = vrot.slane %v10893_v8, %v7602_v58  ;;  %v10950_v46 = vld [vmem:[#allocation57_spill] sm:$0xff] }
 0x28a   : > { %v3940_v17 = vadd.f32 %v7081_v7, %v3228_v51  ;;  %v5596_v25 = vmul.f32 %v10949_v62, %v9781_v4  ;;  %v2015_v56 = vadd.f32 %v1951_v36, %v1479_v37  ;;  %v2253_v23 = vrot.slane %v10895_v10, %v7602_v58  ;;  %v10951_v37 = vld [vmem:[#allocation36_spill] sm:$0xff]  ;;  %v10954_v62 = vld [vmem:[#allocation23_spill] sm:$0xff] }
 0x28b   : > { %6759 = vmatpush1.msra.mxu0 %v6370_v41  ;;  %v7161_v12 = vcombine.low %v6160_v61, %v6164_v28  ;;  %v2503_v29 = vmul.f32 %v2237_v0, %v7660_v5  ;;  %v3453_v34 = vrot.slane %v10897_v44, %v7602_v58  ;;  %v3469_v20 = vrot.slane %v10899_v54, %v7602_v58 }
 0x28c   : > { %v4444_v63 = vadd.f32 %v4380_v31, %v3940_v17  ;;  %v2507_v7 = vmul.f32 %v2253_v23, %v7660_v5  ;;  %v3159_v16 = vmul.f32 %v10950_v46, %v9560_v26  ;;  %v4669_v2 = vrot.slane %v10901_v15, %v7602_v58  ;;  %v10953_v46 = vld [vmem:[#allocation44_spill] sm:$0xff] }
 0x28d   : > { %v3719_v51 = vmul.f32 %v3453_v34, %v10670_v50  ;;  %v3723_v61 = vmul.f32 %v3469_v20, %v10670_v50  ;;  %v4375_v36 = vmul.f32 %v10951_v37, %v9581_v39  ;;  %v4685_v41 = vrot.slane %v10902_v1, %v7602_v58  ;;  %v10952_v20 = vld [vmem:[#allocation55_spill] sm:$0xff] }
 0x28e   : > { %v5156_v28 = vadd.f32 %v7121_v45, %v4444_v63  ;;  %v7036_v31 = vcombine.low %v2503_v29, %v2507_v7  ;;  %v4935_v0 = vmul.f32 %v4669_v2, %v10864_v35  ;;  %v5885_v26 = vrot.slane %v10907_v55, %v7602_v58  ;;  %v10955_v45 = vld [vmem:[#allocation56_spill] sm:$0xff]  ;;  %v10956_v29 = vld [vmem:[#allocation37_spill] sm:$0xff] }
 0x28f   : > { %v7076_v17 = vcombine.low %v3719_v51, %v3723_v61  ;;  %v4939_v23 = vmul.f32 %v4685_v41, %v10864_v35  ;;  %v5901_v34 = vrot.slane %v10908_v32, %v7602_v58  ;;  %v1481_v52 = vmul.f32 %v10953_v46, %v10952_v20  ;;  %v10958_v20 = vld [vmem:[#allocation81_spill] sm:$0xff] }
 0x290   : > { %v5660_v39 = vadd.f32 %v5596_v25, %v5156_v28  ;;  %v2719_v37 = vadd.f32 %v7036_v31, %v2015_v56  ;;  %v6151_v38 = vmul.f32 %v5885_v26, %v10954_v62  ;;  %v1953_v63 = vmul.f32 %v10956_v29, %v10955_v45  ;;  %v10959_v31 = vld [vmem:[#allocation15_spill] sm:$0xff] }
 0x291   : > { %v7116_v7 = vcombine.low %v4935_v0, %v4939_v23  ;;  %v6155_v2 = vmul.f32 %v5901_v34, %v10954_v62  ;;  %v2245_v51 = vrot.slane %v10893_v8, %v7653_v57  ;;  %v2261_v61 = vrot.slane %v10895_v10, %v7653_v57  ;;  %v10960_v34 = vld [vmem:[#allocation60_spill] sm:$0xff] }
 0x292   : > { %v6372_v41 = vadd.f32 %v7161_v12, %v5660_v39  ;;  %v3223_v60 = vadd.f32 %v3159_v16, %v2719_v37  ;;  %v5591_v25 = vmul.f32 %v10958_v20, %v10957_v48  ;;  %v2017_v56 = vadd.f32 %v1953_v63, %v1481_v52  ;;  %v10961_v16 = vld [vmem:[#allocation58_spill] sm:$0xff]  ;;  %v10962_v37 = vld [vmem:[#allocation61_spill] sm:$0xff] }
 0x293   : > { %v7156_v28 = vcombine.low %v6151_v38, %v6155_v2  ;;  %v2505_v26 = vmul.f32 %v2245_v51, %v10959_v31  ;;  %v2509_v45 = vmul.f32 %v2261_v61, %v10959_v31  ;;  %v3461_v0 = vrot.slane %v10897_v44, %v7653_v57 }
 0x294   : > { %6830 = vmatpush1.msra.mxu1 %v6372_v41  ;;  %v3935_v23 = vadd.f32 %v7076_v17, %v3223_v60  ;;  %v3161_v29 = vmul.f32 %v10960_v34, %v9643_v21  ;;  %v3477_v12 = vrot.slane %v10899_v54, %v7653_v57  ;;  %v4677_v48 = vrot.slane %v10901_v15, %v7653_v57  ;;  %v10965_v34 = vld [vmem:[#allocation24_spill] sm:$0xff] }
 0x295   : > { %v7038_v52 = vcombine.low %v2505_v26, %v2509_v45  ;;  %v3721_v38 = vmul.f32 %v3461_v0, %v7686_v30  ;;  %v4377_v39 = vmul.f32 %v10962_v37, %v10961_v16  ;;  %v4693_v63 = vrot.slane %v10902_v1, %v7653_v57  ;;  %v10963_v26 = vld [vmem:[#allocation62_spill] sm:$0xff] }
 0x296   : > { %v4439_v2 = vadd.f32 %v4375_v36, %v3935_v23  ;;  %v3725_v60 = vmul.f32 %v3477_v12, %v7686_v30  ;;  %v4937_v21 = vmul.f32 %v4677_v48, %v10872_v53  ;;  %v5893_v17 = vrot.slane %v10907_v55, %v7653_v57  ;;  %v10964_v45 = vld [vmem:[#allocation66_spill] sm:$0xff]  ;;  %v10966_v23 = vld [vmem:[#allocation63_spill] sm:$0xff] }
 0x297   : > { %v2721_v51 = vadd.f32 %v7038_v52, %v2017_v56  ;;  %v4941_v61 = vmul.f32 %v4693_v63, %v10872_v53  ;;  %v5909_v41 = vrot.slane %v10908_v32, %v7653_v57  ;;  %v1478_v0 = vmul.f32 %v10964_v45, %v10963_v26  ;;  %v10967_v12 = vld [vmem:[#allocation38_spill] sm:$0xff]  ;;  %v10968_v63 = vld [vmem:[#allocation59_spill] sm:$0xff] }
 0x298   : > { %v5151_v16 = vadd.f32 %v7116_v7, %v4439_v2  ;;  %v7078_v37 = vcombine.low %v3721_v38, %v3725_v60  ;;  %v6153_v36 = vmul.f32 %v5893_v17, %v10965_v34  ;;  %v1950_v20 = vmul.f32 %v10967_v12, %v10966_v23  ;;  %v10970_v60 = vld [vmem:[#allocation14_spill] sm:$0xff]  ;;  %v10974_v23 = vld [vmem:[#allocation64_spill] sm:$0xff] }
 0x299   : > { %v3225_v48 = vadd.f32 %v3161_v29, %v2721_v51  ;;  %v7118_v46 = vcombine.low %v4937_v21, %v4941_v61  ;;  %v6157_v27 = vmul.f32 %v5909_v41, %v10965_v34  ;;  %v2233_v56 = vrot.slane %v10893_v8, %v7591_v47  ;;  %v10971_v61 = vld [vmem:[#allocation20_spill] sm:$0xff] }
 0x29a   : > { %v5655_v52 = vadd.f32 %v5591_v25, %v5151_v16  ;;  %v5593_v14 = vmul.f32 %v10969_v24, %v10968_v63  ;;  %v2014_v53 = vadd.f32 %v1950_v20, %v1478_v0  ;;  %v2249_v7 = vrot.slane %v10895_v10, %v7591_v47  ;;  %v10972_v41 = vld [vmem:[#allocation40_spill] sm:$0xff] }
 0x29b   : > { %v3937_v38 = vadd.f32 %v7078_v37, %v3225_v48  ;;  %v7158_v2 = vcombine.low %v6153_v36, %v6157_v27  ;;  %v2502_v17 = vmul.f32 %v2233_v56, %v10970_v60  ;;  %v3449_v29 = vrot.slane %v10897_v44, %v7591_v47  ;;  %v10973_v0 = vld [vmem:[#allocation16_spill] sm:$0xff] }
 0x29c   : > { %v6367_v21 = vadd.f32 %v7156_v28, %v5655_v52  ;;  %v2506_v51 = vmul.f32 %v2249_v7, %v10970_v60  ;;  %v3158_v25 = vmul.f32 %v10972_v41, %v10971_v61  ;;  %v3465_v26 = vrot.slane %v10899_v54, %v7591_v47 }
 0x29d   : > { %v4441_v20 = vadd.f32 %v4377_v39, %v3937_v38  ;;  %v3718_v16 = vmul.f32 %v3449_v29, %v10973_v0  ;;  %v4665_v27 = vrot.slane %v10901_v15, %v7591_v47  ;;  %v4681_v37 = vrot.slane %v10902_v1, %v7591_v47 }
 0x29e   : > { %6760 = vmatprep.subr.mxu0 %v6367_v21  ;;  %v7035_v36 = vcombine.low %v2502_v17, %v2506_v51  ;;  %v3722_v28 = vmul.f32 %v3465_v26, %v10973_v0  ;;  %v4374_v48 = vmul.f32 %v10974_v23, %v9709_v42  ;;  %v5881_v56 = vrot.slane %v10907_v55, %v7591_v47  ;;  %v10975_v21 = vld [vmem:[#allocation43_spill] sm:$0xff] }
 0x29f   : > { %v5153_v52 = vadd.f32 %v7118_v46, %v4441_v20  ;;  %v4934_v39 = vmul.f32 %v4665_v27, %v10793_v49  ;;  %v4938_v63 = vmul.f32 %v4681_v37, %v10793_v49  ;;  %v5897_v7 = vrot.slane %v10908_v32, %v7591_v47  ;;  %v10976_v46 = vld [vmem:[#allocation83_spill] sm:$0xff]  ;;  %v10977_v37 = vld [vmem:[#allocation65_spill] sm:$0xff] }
 0x2a0   : > { %v2718_v38 = vadd.f32 %v7035_v36, %v2014_v53  ;;  %v7075_v29 = vcombine.low %v3718_v16, %v3722_v28  ;;  %v6150_v17 = vmul.f32 %v5881_v56, %v10747_v11  ;;  %v1480_v51 = vmul.f32 %v10975_v21, %v9737_v3 }
 0x2a1   : > { %v5657_v61 = vadd.f32 %v5593_v14, %v5153_v52  ;;  %v7115_v42 = vcombine.low %v4934_v39, %v4938_v63  ;;  %v6154_v26 = vmul.f32 %v5897_v7, %v10747_v11  ;;  %v1952_v20 = vmul.f32 %v10976_v46, %v9741_v9 }
 0x2a2   : > { %v3222_v27 = vadd.f32 %v3158_v25, %v2718_v38  ;;  %v5590_v23 = vmul.f32 %v10977_v37, %v9730_v22  ;;  %v2241_v53 = vrot.slane %v10893_v8, %v7605_v59  ;;  %v2257_v16 = vrot.slane %v10895_v10, %v7605_v59  ;;  %v10978_v8 = vld [vmem:[#allocation90_spill] sm:$0xff]  ;;  %v10979_v38 = vld [vmem:[#allocation97_spill] sm:$0xff] }
 0x2a3   : > { %v6369_v36 = vadd.f32 %v7158_v2, %v5657_v61  ;;  %v7155_v28 = vcombine.low %v6150_v17, %v6154_v26  ;;  %v2016_v3 = vadd.f32 %v1952_v20, %v1480_v51  ;;  %v3457_v14 = vrot.slane %v10897_v44, %v7605_v59 }
 0x2a4   : > { %v3934_v56 = vadd.f32 %v7075_v29, %v3222_v27  ;;  %v2504_v52 = vmul.f32 %v2241_v53, %v7663_v6  ;;  %v2508_v9 = vmul.f32 %v2257_v16, %v7663_v6  ;;  %v3473_v22 = vrot.slane %v10899_v54, %v7605_v59  ;;  %v10981_v53 = vld [vmem:[#allocation31_spill] sm:$0xff] }
 0x2a5   : > { %6831 = vmatprep.subr.mxu1 %v6369_v36  ;;  %v3160_v25 = vmul.f32 %v10978_v8, %v9754_v18  ;;  %v3720_v10 = vmul.f32 %v3457_v14, %v7679_v19  ;;  %v4673_v2 = vrot.slane %v10901_v15, %v7605_v59  ;;  %v4689_v44 = vrot.slane %v10902_v1, %v7605_v59 }
 0x2a6   : > { %v4438_v39 = vadd.f32 %v4374_v48, %v3934_v56  ;;  %v7037_v63 = vcombine.low %v2504_v52, %v2508_v9  ;;  %v3724_v7 = vmul.f32 %v3473_v22, %v7679_v19  ;;  %v4376_v29 = vmul.f32 %v10979_v38, %v9772_v43  ;;  %v10980_v48 = vld [vmem:[#allocation78_spill] sm:$0xff] }
 0x2a7   : > { %v4936_v54 = vmul.f32 %v4673_v2, %v7696_v40  ;;  %v4940_v17 = vmul.f32 %v4689_v44, %v7696_v40  ;;  %v5889_v18 = vrot.slane %v10907_v55, %v7605_v59  ;;  %v5905_v15 = vrot.slane %v10908_v32, %v7605_v59  ;;  %v10982_v32 = vld [vmem:[#allocation92_spill] sm:$0xff]  ;;  %v10984_v52 = vld [vmem:[#allocation50_spill] sm:$0xff]  ;;  %v10986_v2 = vld [vmem:[#allocation47_spill] sm:$0xff] }
 0x2a8   : > { %v5150_v51 = vadd.f32 %v7115_v42, %v4438_v39  ;;  %v2720_v61 = vadd.f32 %v7037_v63, %v2016_v3  ;;  %v7077_v1 = vcombine.low %v3720_v10, %v3724_v7  ;;  %v9926_v26 = vrot.slane %v10980_v48, %v7591_v47  ;;  %v10983_v3 = vld [vmem:[#allocation46_spill] sm:$0xff] }
 0x2a9   : > { %v7117_v20 = vcombine.low %v4936_v54, %v4940_v17  ;;  %v6152_v43 = vmul.f32 %v5889_v18, %v7726_v13  ;;  %v6156_v27 = vmul.f32 %v5905_v15, %v7726_v13  ;;  %v9932_v16 = vrot.slane %v10981_v53, %v7591_v47  ;;  %v10985_v22 = vld [vmem:[#allocation82_spill] sm:$0xff]  ;;  %v10988_v17 = vld [vmem:[#allocation25_spill] sm:$0xff]  ;;  %v10989_v15 = vld [vmem:[#allocation71_spill] sm:$0xff] }
 0x2aa   : > { %v5654_v55 = vadd.f32 %v5590_v23, %v5150_v51  ;;  %v3224_v36 = vadd.f32 %v3160_v25, %v2720_v61  ;;  %v5592_v42 = vmul.f32 %v10982_v32, %v9781_v4  ;;  %v9938_v14 = vcombine.high %v10983_v3, %v10983_v3  ;;  %v10987_v39 = vld [vmem:[#allocation70_spill] sm:$0xff] }
 0x2ab   : > { %v7157_v56 = vcombine.low %v6152_v43, %v6156_v27  ;;  %v1459_v9 = vmul.f32 %v10984_v52, %v9926_v26  ;;  %v1931_v10 = vmul.f32 %v10985_v22, %v9932_v16  ;;  %v9946_v44 = vcombine.high %v10986_v2, %v10986_v2  ;;  %v10990_v48 = vld [vmem:[#allocation26_spill] sm:$0xff]  ;;  %v10992_v52 = vld [vmem:[#allocation75_spill] sm:$0xff]  ;;  %v10993_v22 = vld [vmem:[#allocation84_spill] sm:$0xff] }
 0x2ac   : > { %v6366_v23 = vadd.f32 %v7155_v28, %v5654_v55  ;;  %v3936_v25 = vadd.f32 %v7077_v1, %v3224_v36  ;;  %v2205_v4 = vrot.slane %v9938_v14, %v7602_v58  ;;  %v9952_v63 = vcombine.high %v10987_v39, %v10987_v39  ;;  %v10991_v55 = vld [vmem:[#allocation74_spill] sm:$0xff] }
 0x2ad   : > { %v2011_v7 = vadd.f32 %v1931_v10, %v1459_v9  ;;  %v2221_v54 = vrot.slane %v9946_v44, %v7602_v58  ;;  %v9958_v18 = vrot.slane %v10988_v17, %v7591_v47  ;;  %v9962_v51 = vcombine.high %v10989_v15, %v10989_v15 }
 0x2ae   : > { %6761 = vmatpush1.msra.mxu0 %v6366_v23  ;;  %v4440_v28 = vadd.f32 %v4376_v29, %v3936_v25  ;;  %v2495_v61 = vmul.f32 %v2205_v4, %v7660_v5  ;;  %v3421_v1 = vrot.slane %v9952_v63, %v7602_v58  ;;  %v9969_v43 = vrot.slane %v10990_v48, %v7591_v47  ;;  %v10994_v25 = vld [vmem:[#allocation85_spill] sm:$0xff] }
 0x2af   : > { %v2499_v27 = vmul.f32 %v2221_v54, %v7660_v5  ;;  %v3437_v53 = vrot.slane %v9962_v51, %v7602_v58  ;;  %v9976_v36 = vcombine.high %v10991_v55, %v10991_v55  ;;  %v9980_v29 = vcombine.high %v10992_v52, %v10992_v52 }
 0x2b0   : > { %v5152_v9 = vadd.f32 %v7117_v20, %v4440_v28  ;;  %v3139_v10 = vmul.f32 %v10993_v22, %v9958_v18  ;;  %v3711_v23 = vmul.f32 %v3421_v1, %v10670_v50  ;;  %v4355_v4 = vmul.f32 %v10994_v25, %v9969_v43  ;;  %v10995_v20 = vld [vmem:[#allocation27_spill] sm:$0xff]  ;;  %v10996_v22 = vld [vmem:[#allocation45_spill] sm:$0xff] }
 0x2b1   : > { %v7032_v54 = vcombine.low %v2495_v61, %v2499_v27  ;;  %v3715_v17 = vmul.f32 %v3437_v53, %v10670_v50  ;;  %v4637_v48 = vrot.slane %v9976_v36, %v7602_v58  ;;  %v4653_v32 = vrot.slane %v9980_v29, %v7602_v58 }
 0x2b2   : > { %v5656_v38 = vadd.f32 %v5592_v42, %v5152_v9  ;;  %v9994_v28 = vrot.slane %v10995_v20, %v7591_v47  ;;  %v9998_v1 = vcombine.high %v10996_v22, %v10996_v22  ;;  %v10002_v61 = vcombine.high %v9720_v33, %v9720_v33  ;;  %v10997_v20 = vld [vmem:[#allocation86_spill] sm:$0xff] }
 0x2b3   : > { %v2715_v27 = vadd.f32 %v7032_v54, %v2011_v7  ;;  %v7072_v53 = vcombine.low %v3711_v23, %v3715_v17  ;;  %v4927_v25 = vmul.f32 %v4637_v48, %v10864_v35  ;;  %v4931_v37 = vmul.f32 %v4653_v32, %v10864_v35  ;;  %v10998_v7 = vld [vmem:[#allocation88_spill] sm:$0xff] }
 0x2b4   : > { %v6368_v8 = vadd.f32 %v7157_v56, %v5656_v38  ;;  %v5853_v42 = vrot.slane %v9998_v1, %v7602_v58  ;;  %v5869_v9 = vrot.slane %v10002_v61, %v7602_v58  ;;  %v10012_v46 = vrot.slane %v10997_v20, %v7591_v47  ;;  %v10999_v54 = vld [vmem:[#allocation52_spill] sm:$0xff] }
 0x2b5   : > { %v3219_v21 = vadd.f32 %v3139_v10, %v2715_v27  ;;  %v7112_v41 = vcombine.low %v4927_v25, %v4931_v37  ;;  %v10016_v23 = vrot.slane %v10998_v7, %v7591_v47  ;;  %v2213_v32 = vrot.slane %v9938_v14, %v7653_v57  ;;  %v11000_v37 = vld [vmem:[#allocation89_spill] sm:$0xff]  ;;  %v11001_v20 = vld [vmem:[#allocation28_spill] sm:$0xff] }
 0x2b6   : > { %6832 = vmatpush1.msra.mxu1 %v6368_v8  ;;  %v6143_v38 = vmul.f32 %v5853_v42, %v10954_v62  ;;  %v6147_v56 = vmul.f32 %v5869_v9, %v10954_v62  ;;  %v1461_v17 = vmul.f32 %v10999_v54, %v10012_v46  ;;  %v2229_v48 = vrot.slane %v9946_v44, %v7653_v57 }
 0x2b7   : > { %v3931_v10 = vadd.f32 %v7072_v53, %v3219_v21  ;;  %v1933_v27 = vmul.f32 %v11000_v37, %v10016_v23  ;;  %v2497_v25 = vmul.f32 %v2213_v32, %v10959_v31  ;;  %v10031_v7 = vrot.slane %v11001_v20, %v7591_v47  ;;  %v11002_v53 = vld [vmem:[#allocation91_spill] sm:$0xff]  ;;  %v11003_v32 = vld [vmem:[#allocation29_spill] sm:$0xff] }
 0x2b8   : > { %v7152_v8 = vcombine.low %v6143_v38, %v6147_v56  ;;  %v2501_v42 = vmul.f32 %v2229_v48, %v10959_v31  ;;  %v3429_v9 = vrot.slane %v9952_v63, %v7653_v57  ;;  %v3445_v54 = vrot.slane %v9962_v51, %v7653_v57  ;;  %v11005_v31 = vld [vmem:[#allocation87_spill] sm:$0xff] }
 0x2b9   : > { %v4435_v45 = vadd.f32 %v4355_v4, %v3931_v10  ;;  %v2013_v21 = vadd.f32 %v1933_v27, %v1461_v17  ;;  %v3141_v37 = vmul.f32 %v11002_v53, %v10031_v7  ;;  %v10042_v24 = vrot.slane %v11003_v32, %v7591_v47  ;;  %v11006_v17 = vld [vmem:[#allocation93_spill] sm:$0xff] }
 0x2ba   : > { %v7034_v20 = vcombine.low %v2497_v25, %v2501_v42  ;;  %v3713_v38 = vmul.f32 %v3429_v9, %v7686_v30  ;;  %v3717_v56 = vmul.f32 %v3445_v54, %v7686_v30  ;;  %v4645_v48 = vrot.slane %v9976_v36, %v7653_v57  ;;  %v11007_v25 = vld [vmem:[#allocation21_spill] sm:$0xff] }
 0x2bb   : > { %11004 = vst [vmem:[#allocation94_spill] sm:$0xff] %v10042_v24  ;;  %v5147_v12 = vadd.f32 %v7112_v41, %v4435_v45  ;;  %v5571_v4 = vmul.f32 %v11005_v31, %v9994_v28  ;;  %v4357_v10 = vmul.f32 %v11006_v17, %v10042_v24  ;;  %v4661_v27 = vrot.slane %v9980_v29, %v7653_v57  ;;  %v11008_v45 = vld [vmem:[#allocation33_spill] sm:$0xff] }
 0x2bc   : > { %v2717_v53 = vadd.f32 %v7034_v20, %v2013_v21  ;;  %v7074_v32 = vcombine.low %v3713_v38, %v3717_v56  ;;  %v4929_v42 = vmul.f32 %v4645_v48, %v11007_v25  ;;  %v5861_v9 = vrot.slane %v9998_v1, %v7653_v57  ;;  %v11010_v21 = vld [vmem:[#allocation95_spill] sm:$0xff]  ;;  %v11012_v38 = vld [vmem:[#allocation98_spill] sm:$0xff] }
 0x2bd   : > { %v5651_v54 = vadd.f32 %v5571_v4, %v5147_v12  ;;  %v4933_v30 = vmul.f32 %v4661_v27, %v11007_v25  ;;  %v10060_v41 = vrot.slane %v11008_v45, %v7591_v47  ;;  %v5877_v31 = vrot.slane %v10002_v61, %v7653_v57 }
 0x2be   : > { %v3221_v17 = vadd.f32 %v3141_v37, %v2717_v53  ;;  %v6145_v24 = vmul.f32 %v5861_v9, %v10965_v34  ;;  %v10067_v20 = vrot.slane %v11010_v21, %v7591_v47  ;;  %v10071_v56 = vrot.slane %v11012_v38, %v7591_v47  ;;  %v11014_v37 = vld [vmem:[#allocation49_spill] sm:$0xff]  ;;  %v11015_v9 = vld [vmem:[#allocation99_spill] sm:$0xff] }
 0x2bf   : > { %11009 = vst [vmem:[#allocation19_spill] sm:$0xff] %v10060_v41  ;;  %v6363_v12 = vadd.f32 %v7152_v8, %v5651_v54  ;;  %v7114_v48 = vcombine.low %v4929_v42, %v4933_v30  ;;  %v6149_v4 = vmul.f32 %v5877_v31, %v10965_v34  ;;  %v2201_v27 = vrot.slane %v9938_v14, %v7591_v47  ;;  %v11016_v30 = vld [vmem:[#allocation30_spill] sm:$0xff] }
 0x2c0   : > { %11011 = vst [vmem:[#allocation101_spill] sm:$0xff] %v10067_v20  ;;  %11013 = vst [vmem:[#allocation103_spill] sm:$0xff] %v10071_v56  ;;  %v3933_v45 = vadd.f32 %v7074_v32, %v3221_v17  ;;  %v1458_v53 = vmul.f32 %v11014_v37, %v10067_v20  ;;  %v1930_v25 = vmul.f32 %v11015_v9, %v10071_v56  ;;  %v11018_v9 = vld [vmem:[#allocation96_spill] sm:$0xff] }
 0x2c1   : > { %v2217_v21 = vrot.slane %v9946_v44, %v7591_v47  ;;  %6762 = vmatprep.subr.mxu0 %v6363_v12  ;;  %v7154_v38 = vcombine.low %v6145_v24, %v6149_v4  ;;  %v2494_v8 = vmul.f32 %v2201_v27, %v10970_v60  ;;  %v10085_v42 = vrot.slane %v11016_v30, %v7591_v47  ;;  %v11019_v24 = vld [vmem:[#allocation100_spill] sm:$0xff] }
 0x2c2   : > { %v3417_v32 = vrot.slane %v9952_v63, %v7591_v47  ;;  %v4437_v54 = vadd.f32 %v4357_v10, %v3933_v45  ;;  %v2010_v31 = vadd.f32 %v1930_v25, %v1458_v53  ;;  %v3433_v37 = vrot.slane %v9962_v51, %v7591_v47  ;;  %v11020_v45 = vld [vmem:[#allocation34_spill] sm:$0xff] }
 0x2c3   : > { %11017 = vst [vmem:[#allocation53_spill] sm:$0xff] %v10085_v42  ;;  %v2498_v17 = vmul.f32 %v2217_v21, %v10970_v60  ;;  %v5573_v12 = vmul.f32 %v11018_v9, %v10060_v41  ;;  %v3138_v4 = vmul.f32 %v11019_v24, %v10085_v42  ;;  %v4633_v30 = vrot.slane %v9976_v36, %v7591_v47 }
 0x2c4   : > { %v3710_v27 = vmul.f32 %v3417_v32, %v10973_v0  ;;  %v5149_v20 = vadd.f32 %v7114_v48, %v4437_v54  ;;  %v3714_v10 = vmul.f32 %v3433_v37, %v10973_v0  ;;  %v4649_v25 = vrot.slane %v9980_v29, %v7591_v47 }
 0x2c5   : > { %v7031_v56 = vcombine.low %v2494_v8, %v2498_v17  ;;  %v10104_v53 = vrot.slane %v11020_v45, %v7591_v47  ;;  %v4926_v21 = vmul.f32 %v4633_v30, %v10793_v49  ;;  %v5849_v9 = vrot.slane %v9998_v1, %v7591_v47  ;;  %v11021_v8 = vld [vmem:[#allocation102_spill] sm:$0xff] }
 0x2c6   : > { %v5653_v32 = vadd.f32 %v5573_v12, %v5149_v20  ;;  %v7071_v42 = vcombine.low %v3710_v27, %v3714_v10  ;;  %v4930_v48 = vmul.f32 %v4649_v25, %v10793_v49  ;;  %v5865_v17 = vrot.slane %v10002_v61, %v7591_v47  ;;  %v11022_v45 = vld [vmem:[#allocation22_spill] sm:$0xff]  ;;  %v11023_v20 = vld [vmem:[#allocation104_spill] sm:$0xff]  ;;  %v11024_v12 = vld [vmem:[#allocation51_spill] sm:$0xff] }
 0x2c7   : > { %v2714_v24 = vadd.f32 %v7031_v56, %v2010_v31  ;;  %v4354_v54 = vmul.f32 %v11021_v8, %v10104_v53  ;;  %v6142_v37 = vmul.f32 %v5849_v9, %v10747_v11  ;;  %v10117_v0 = vrot.slane %v11022_v45, %v7591_v47 }
 0x2c8   : > { %v6365_v30 = vadd.f32 %v7154_v38, %v5653_v32  ;;  %v7111_v41 = vcombine.low %v4926_v21, %v4930_v48  ;;  %v10121_v56 = vrot.slane %v11023_v20, %v7591_v47  ;;  %v6146_v31 = vmul.f32 %v5865_v17, %v10747_v11  ;;  %v11025_v38 = vld [vmem:[#allocation105_spill] sm:$0xff]  ;;  %v11026_v21 = vld [vmem:[#allocation35_spill] sm:$0xff] }
 0x2c9   : > { %v3218_v60 = vadd.f32 %v3138_v4, %v2714_v24  ;;  %v1460_v27 = vmul.f32 %v11024_v12, %v10117_v0  ;;  %v2209_v10 = vrot.slane %v9938_v14, %v7605_v59  ;;  %v2225_v25 = vrot.slane %v9946_v44, %v7605_v59  ;;  %v11028_v12 = vld [vmem:[#allocation106_spill] sm:$0xff] }
 0x2ca   : > { %6833 = vmatprep.subr.mxu1 %v6365_v30  ;;  %v1932_v4 = vmul.f32 %v11025_v38, %v10121_v56  ;;  %v10134_v32 = vrot.slane %v11026_v21, %v7591_v47  ;;  %v3425_v24 = vrot.slane %v9952_v63, %v7605_v59  ;;  %v7151_v48 = vcombine.low %v6142_v37, %v6146_v31 }
 0x2cb   : > { %v3930_v9 = vadd.f32 %v7071_v42, %v3218_v60  ;;  %v2496_v8 = vmul.f32 %v2209_v10, %v7663_v6  ;;  %v2500_v14 = vmul.f32 %v2225_v25, %v7663_v6  ;;  %v3441_v44 = vrot.slane %v9962_v51, %v7605_v59  ;;  %v11027_v60 = vld [vmem:[#allocation41_spill] sm:$0xff] }
 0x2cc   : > { %v10144_v42 = vrot.slane %v11027_v60, %v7591_v47  ;;  %v2012_v45 = vadd.f32 %v1932_v4, %v1460_v27  ;;  %v3712_v30 = vmul.f32 %v3425_v24, %v7679_v19  ;;  %v3140_v63 = vmul.f32 %v11028_v12, %v10134_v32  ;;  %v11029_v51 = vld [vmem:[#allocation13_spill] sm:$0xff]  ;;  %v11030_v4 = vld [vmem:[#allocation39_spill] sm:$0xff] }
 0x2cd   : > { %v4434_v17 = vadd.f32 %v4354_v54, %v3930_v9  ;;  %v7033_v20 = vcombine.low %v2496_v8, %v2500_v14  ;;  %v3716_v37 = vmul.f32 %v3441_v44, %v7679_v19  ;;  %v4641_v31 = vrot.slane %v9976_v36, %v7605_v59 }
 0x2ce   : > { %v5570_v54 = vmul.f32 %v11029_v51, %v10144_v42  ;;  %v4657_v25 = vrot.slane %v9980_v29, %v7605_v59  ;;  %v5857_v27 = vrot.slane %v9998_v1, %v7605_v59  ;;  %v10160_v21 = vrot.slane %v11030_v4, %v7591_v47  ;;  %v11032_v1 = vld [vmem:[#allocation107_spill] sm:$0xff]  ;;  %v11034_v51 = vld [vmem:[#allocation108_spill] sm:$0xff] }
 0x2cf   : > { %v5146_v10 = vadd.f32 %v7111_v41, %v4434_v17  ;;  %v2716_v9 = vadd.f32 %v7033_v20, %v2012_v45  ;;  %v7073_v38 = vcombine.low %v3712_v30, %v3716_v37  ;;  %v4928_v24 = vmul.f32 %v4641_v31, %v7696_v40  ;;  %v11031_v41 = vld [vmem:[#allocation42_spill] sm:$0xff]  ;;  %v11033_v45 = vld [vmem:[#allocation109_spill] sm:$0xff] }
 0x2d0   : > { %v4932_v36 = vmul.f32 %v4657_v25, %v7696_v40  ;;  %v10166_v14 = vrot.slane %v11031_v41, %v7591_v47  ;;  %v5873_v29 = vrot.slane %v10002_v61, %v7605_v59  ;;  %v4356_v17 = vmul.f32 %v11032_v1, %v10160_v21 }
 0x2d1   : > { %v5650_v8 = vadd.f32 %v5570_v54, %v5146_v10  ;;  %v3220_v44 = vadd.f32 %v3140_v63, %v2716_v9  ;;  %v6144_v60 = vmul.f32 %v5857_v27, %v7726_v13  ;;  %v1927_v30 = vmul.f32 %v11033_v45, %v9932_v16  ;;  %v11035_v63 = vld [vmem:[#allocation67_spill] sm:$0xff] }
 0x2d2   : > { %v7113_v12 = vcombine.low %v4928_v24, %v4932_v36  ;;  %v6148_v37 = vmul.f32 %v5873_v29, %v7726_v13  ;;  %v2173_v31 = vrot.slane %v10983_v3, %v7602_v58  ;;  %v5572_v61 = vmul.f32 %v11034_v51, %v10166_v14 }
 0x2d3   : > { %v6362_v20 = vadd.f32 %v7151_v48, %v5650_v8  ;;  %v3932_v10 = vadd.f32 %v7073_v38, %v3220_v44  ;;  %v1455_v54 = vmul.f32 %v11035_v63, %v9926_v26  ;;  %v2189_v25 = vrot.slane %v10986_v2, %v7602_v58  ;;  %v11036_v8 = vld [vmem:[#allocation57_spill] sm:$0xff] }
 0x2d4   : > { %v7153_v27 = vcombine.low %v6144_v60, %v6148_v37  ;;  %v2487_v16 = vmul.f32 %v2173_v31, %v7660_v5  ;;  %v3389_v48 = vrot.slane %v10987_v39, %v7602_v58  ;;  %v3405_v9 = vrot.slane %v10989_v15, %v7602_v58 }
 0x2d5   : > { %6763 = vmatpush1.msra.mxu0 %v6362_v20  ;;  %v4436_v38 = vadd.f32 %v4356_v17, %v3932_v10  ;;  %v2007_v4 = vadd.f32 %v1927_v30, %v1455_v54  ;;  %v2491_v24 = vmul.f32 %v2189_v25, %v7660_v5  ;;  %v4605_v26 = vrot.slane %v10991_v55, %v7602_v58  ;;  %v11037_v20 = vld [vmem:[#allocation44_spill] sm:$0xff] }
 0x2d6   : > { %v3135_v36 = vmul.f32 %v11036_v8, %v9958_v18  ;;  %v3703_v41 = vmul.f32 %v3389_v48, %v10670_v50  ;;  %v3707_v29 = vmul.f32 %v3405_v9, %v10670_v50  ;;  %v4621_v44 = vrot.slane %v10992_v52, %v7602_v58 }
 0x2d7   : > { %v5148_v1 = vadd.f32 %v7113_v12, %v4436_v38  ;;  %v7028_v60 = vcombine.low %v2487_v16, %v2491_v24  ;;  %v4919_v17 = vmul.f32 %v4605_v26, %v10864_v35  ;;  %v5821_v5 = vrot.slane %v10996_v22, %v7602_v58  ;;  %v11038_v12 = vld [vmem:[#allocation37_spill] sm:$0xff]  ;;  %v11040_v38 = vld [vmem:[#allocation15_spill] sm:$0xff] }
 0x2d8   : > { %v7068_v45 = vcombine.low %v3703_v41, %v3707_v29  ;;  %v4923_v30 = vmul.f32 %v4621_v44, %v10864_v35  ;;  %v5837_v18 = vrot.slane %v9720_v33, %v7602_v58  ;;  %v1457_v37 = vmul.f32 %v11037_v20, %v10012_v46  ;;  %v11039_v46 = vld [vmem:[#allocation36_spill] sm:$0xff]  ;;  %v11041_v26 = vld [vmem:[#allocation81_spill] sm:$0xff]  ;;  %v11043_v44 = vld [vmem:[#allocation18_spill] sm:$0xff] }
 0x2d9   : > { %v5652_v50 = vadd.f32 %v5572_v61, %v5148_v1  ;;  %v2711_v31 = vadd.f32 %v7028_v60, %v2007_v4  ;;  %v6135_v10 = vmul.f32 %v5821_v5, %v10954_v62  ;;  %v1929_v51 = vmul.f32 %v11038_v12, %v10016_v23  ;;  %v11042_v41 = vld [vmem:[#allocation60_spill] sm:$0xff]  ;;  %v11045_v20 = vld [vmem:[#allocation94_spill] sm:$0xff] }
 0x2da   : > { %v7108_v63 = vcombine.low %v4919_v17, %v4923_v30  ;;  %v6139_v54 = vmul.f32 %v5837_v18, %v10954_v62  ;;  %v2181_v25 = vrot.slane %v10983_v3, %v7653_v57  ;;  %v2197_v35 = vrot.slane %v10986_v2, %v7653_v57 }
 0x2db   : > { %v6364_v58 = vadd.f32 %v7153_v27, %v5652_v50  ;;  %v3215_v16 = vadd.f32 %v3135_v36, %v2711_v31  ;;  %v4351_v61 = vmul.f32 %v11039_v46, %v9969_v43  ;;  %v2009_v48 = vadd.f32 %v1929_v51, %v1457_v37  ;;  %v11046_v37 = vld [vmem:[#allocation61_spill] sm:$0xff] }
 0x2dc   : > { %v7148_v9 = vcombine.low %v6135_v10, %v6139_v54  ;;  %v2489_v4 = vmul.f32 %v2181_v25, %v11040_v38  ;;  %v2493_v23 = vmul.f32 %v2197_v35, %v11040_v38  ;;  %v3397_v62 = vrot.slane %v10987_v39, %v7653_v57  ;;  %v11047_v54 = vld [vmem:[#allocation103_spill] sm:$0xff]  ;;  %v11048_v25 = vld [vmem:[#allocation38_spill] sm:$0xff] }
 0x2dd   : > { %6834 = vmatpush1.msra.mxu1 %v6364_v58  ;;  %v3927_v24 = vadd.f32 %v7068_v45, %v3215_v16  ;;  %v5567_v8 = vmul.f32 %v11041_v26, %v9994_v28  ;;  %v3413_v27 = vrot.slane %v10989_v15, %v7653_v57  ;;  %v4613_v43 = vrot.slane %v10991_v55, %v7653_v57  ;;  %v11044_v45 = vld [vmem:[#allocation21_spill] sm:$0xff]  ;;  %v11049_v38 = vld [vmem:[#allocation19_spill] sm:$0xff] }
 0x2de   : > { %v7030_v36 = vcombine.low %v2489_v4, %v2493_v23  ;;  %v3137_v29 = vmul.f32 %v11042_v41, %v10031_v7  ;;  %v3705_v1 = vmul.f32 %v3397_v62, %v11043_v44  ;;  %v4629_v60 = vrot.slane %v10992_v52, %v7653_v57  ;;  %v11050_v4 = vld [vmem:[#allocation32_spill] sm:$0xff]  ;;  %v11051_v62 = vld [vmem:[#allocation101_spill] sm:$0xff] }
 0x2df   : > { %v4431_v17 = vadd.f32 %v4351_v61, %v3927_v24  ;;  %v3709_v5 = vmul.f32 %v3413_v27, %v11043_v44  ;;  %v4921_v28 = vmul.f32 %v4613_v43, %v11044_v45  ;;  %v5829_v30 = vrot.slane %v10996_v22, %v7653_v57  ;;  %v11053_v43 = vld [vmem:[#allocation14_spill] sm:$0xff] }
 0x2e0   : > { %v2713_v18 = vadd.f32 %v7030_v36, %v2009_v48  ;;  %v4353_v50 = vmul.f32 %v11046_v37, %v11045_v20  ;;  %v4925_v31 = vmul.f32 %v4629_v60, %v11044_v45  ;;  %v5845_v7 = vrot.slane %v9720_v33, %v7653_v57  ;;  %v11052_v57 = vld [vmem:[#allocation66_spill] sm:$0xff]  ;;  %v11054_v60 = vld [vmem:[#allocation16_spill] sm:$0xff] }
 0x2e1   : > { %v5143_v10 = vadd.f32 %v7108_v63, %v4431_v17  ;;  %v7070_v12 = vcombine.low %v3705_v1, %v3709_v5  ;;  %v6137_v51 = vmul.f32 %v5829_v30, %v10965_v34  ;;  %v1926_v35 = vmul.f32 %v11048_v25, %v11047_v54  ;;  %v11055_v30 = vld [vmem:[#allocation53_spill] sm:$0xff]  ;;  %v11057_v25 = vld [vmem:[#allocation43_spill] sm:$0xff] }
 0x2e2   : > { %v3217_v58 = vadd.f32 %v3137_v29, %v2713_v18  ;;  %v7110_v16 = vcombine.low %v4921_v28, %v4925_v31  ;;  %v6141_v46 = vmul.f32 %v5845_v7, %v10965_v34  ;;  %v2169_v61 = vrot.slane %v10983_v3, %v7591_v47  ;;  %v11056_v18 = vld [vmem:[#allocation40_spill] sm:$0xff] }
 0x2e3   : > { %v5647_v48 = vadd.f32 %v5567_v8, %v5143_v10  ;;  %v5569_v23 = vmul.f32 %v11050_v4, %v11049_v38  ;;  %v1454_v63 = vmul.f32 %v11052_v57, %v11051_v62  ;;  %v2185_v24 = vrot.slane %v10986_v2, %v7591_v47 }
 0x2e4   : > { %v3929_v26 = vadd.f32 %v7070_v12, %v3217_v58  ;;  %v7150_v27 = vcombine.low %v6137_v51, %v6141_v46  ;;  %v2486_v36 = vmul.f32 %v2169_v61, %v11053_v43  ;;  %v3385_v34 = vrot.slane %v10987_v39, %v7591_v47 }
 0x2e5   : > { %v6359_v41 = vadd.f32 %v7148_v9, %v5647_v48  ;;  %v2006_v29 = vadd.f32 %v1926_v35, %v1454_v63  ;;  %v2490_v8 = vmul.f32 %v2185_v24, %v11053_v43  ;;  %v3401_v44 = vrot.slane %v10989_v15, %v7591_v47 }
 0x2e6   : > { %v4433_v1 = vadd.f32 %v4353_v50, %v3929_v26  ;;  %v3702_v17 = vmul.f32 %v3385_v34, %v11054_v60  ;;  %v4601_v5 = vrot.slane %v10991_v55, %v7591_v47  ;;  %v4617_v45 = vrot.slane %v10992_v52, %v7591_v47 }
 0x2e7   : > { %6764 = vmatprep.subr.mxu0 %v6359_v41  ;;  %v7027_v28 = vcombine.low %v2486_v36, %v2490_v8  ;;  %v3134_v9 = vmul.f32 %v11056_v18, %v11055_v30  ;;  %v3706_v20 = vmul.f32 %v3401_v44, %v11054_v60  ;;  %v5817_v37 = vrot.slane %v10996_v22, %v7591_v47  ;;  %v11063_v18 = vld [vmem:[#allocation92_spill] sm:$0xff] }
 0x2e8   : > { %v5145_v31 = vadd.f32 %v7110_v16, %v4433_v1  ;;  %v4918_v50 = vmul.f32 %v4601_v5, %v10793_v49  ;;  %v4922_v7 = vmul.f32 %v4617_v45, %v10793_v49  ;;  %v5833_v10 = vrot.slane %v9720_v33, %v7591_v47  ;;  %v11058_v16 = vld [vmem:[#allocation83_spill] sm:$0xff]  ;;  %v11059_v49 = vld [vmem:[#allocation64_spill] sm:$0xff] }
 0x2e9   : > { %v2710_v12 = vadd.f32 %v7027_v28, %v2006_v29  ;;  %v7067_v51 = vcombine.low %v3702_v17, %v3706_v20  ;;  %v6134_v54 = vmul.f32 %v5817_v37, %v10747_v11  ;;  %v1456_v35 = vmul.f32 %v11057_v25, %v10117_v0  ;;  %v6478_v37 = vpop.f32.mrf.mxu0 }
 0x2ea   : > { %v5649_v58 = vadd.f32 %v5569_v23, %v5145_v31  ;;  %v7107_v46 = vcombine.low %v4918_v50, %v4922_v7  ;;  %v6138_v61 = vmul.f32 %v5833_v10, %v10747_v11  ;;  %v1928_v48 = vmul.f32 %v11058_v16, %v10121_v56  ;;  %v6549_v50 = vpop.f32.mrf.mxu1  ;;  %v6395_v7 = vpop.permute.xlu0 %6394 }
 0x2eb   : > { %v3214_v38 = vadd.f32 %v3134_v9, %v2710_v12  ;;  %v4350_v4 = vmul.f32 %v11059_v49, %v10104_v53  ;;  %v2177_v47 = vrot.slane %v10983_v3, %v7605_v59  ;;  %v2193_v62 = vrot.slane %v10986_v2, %v7605_v59  ;;  %v6480_v31 = vpop.f32.mrf.mxu0 }
 0x2ec   : > { %v6361_v57 = vadd.f32 %v7150_v27, %v5649_v58  ;;  %v7147_v63 = vcombine.low %v6134_v54, %v6138_v61  ;;  %v2008_v0 = vadd.f32 %v1928_v48, %v1456_v35  ;;  %v3393_v23 = vrot.slane %v10987_v39, %v7605_v59  ;;  %v11060_v39 = vld [vmem:[#allocation90_spill] sm:$0xff]  ;;  %v6551_v54 = vpop.f32.mrf.mxu1 }
 0x2ed   : > { %v3926_v11 = vadd.f32 %v7067_v51, %v3214_v38  ;;  %v2488_v24 = vmul.f32 %v2177_v47, %v7663_v6  ;;  %v2492_v56 = vmul.f32 %v2193_v62, %v7663_v6  ;;  %v3409_v53 = vrot.slane %v10989_v15, %v7605_v59 }
 0x2ee   : > { %6835 = vmatprep.subr.mxu1 %v6361_v57  ;;  %v3704_v3 = vmul.f32 %v3393_v23, %v7679_v19  ;;  %v4609_v2 = vrot.slane %v10991_v55, %v7605_v59  ;;  %v4625_v26 = vrot.slane %v10992_v52, %v7605_v59  ;;  %v3136_v36 = vmul.f32 %v11060_v39, %v10134_v32  ;;  %v11061_v52 = vld [vmem:[#allocation65_spill] sm:$0xff] }
 0x2ef   : > { %v4430_v27 = vadd.f32 %v4350_v4, %v3926_v11  ;;  %v7029_v43 = vcombine.low %v2488_v24, %v2492_v56  ;;  %v3708_v34 = vmul.f32 %v3409_v53, %v7679_v19  ;;  %v5825_v41 = vrot.slane %v10996_v22, %v7605_v59  ;;  %v11062_v22 = vld [vmem:[#allocation97_spill] sm:$0xff] }
 0x2f0   : > { %v4920_v6 = vmul.f32 %v4609_v2, %v7696_v40  ;;  %v4924_v15 = vmul.f32 %v4625_v26, %v7696_v40  ;;  %v5841_v55 = vrot.slane %v9720_v33, %v7605_v59  ;;  %v5566_v8 = vmul.f32 %v11061_v52, %v10144_v42  ;;  %v6729_v59 = vld [vmem:[%s10360_s9] sm:$0xf] }
 0x2f1   : > { %v5142_v29 = vadd.f32 %v7107_v46, %v4430_v27  ;;  %v2712_v44 = vadd.f32 %v7029_v43, %v2008_v0  ;;  %v7069_v1 = vcombine.low %v3704_v3, %v3708_v34  ;;  %v6136_v32 = vmul.f32 %v5825_v41, %v7726_v13 }
 0x2f2   : > { %v7109_v60 = vcombine.low %v4920_v6, %v4924_v15  ;;  %v6140_v19 = vmul.f32 %v5841_v55, %v7726_v13  ;;  %v4352_v30 = vmul.f32 %v11062_v22, %v10160_v21  ;;  %v5568_v13 = vmul.f32 %v11063_v18, %v10166_v14  ;;  %v6649_v21 = vpop.f32.mrf.mxu0  ;;  %v6720_v14 = vpop.f32.mrf.mxu1 }
 0x2f3   : > { %v5646_v17 = vadd.f32 %v5566_v8, %v5142_v29  ;;  %v3216_v5 = vadd.f32 %v3136_v36, %v2712_v44  ;;  %v6479_v12 = vadd.f32 %v6478_v37, %v6395_v7  ;;  %v6481_v51 = vadd.f32 %v6480_v31, %v6395_v7 }
 0x2f4   : > { %v7149_v40 = vcombine.low %v6136_v32, %v6140_v19  ;;  %v6651_v10 = vpop.f32.mrf.mxu0  ;;  %v6722_v38 = vpop.f32.mrf.mxu1  ;;  %v6550_v49 = vadd.f32 %v6549_v50, %v6395_v7  ;;  %v6552_v4 = vadd.f32 %v6551_v54, %v6395_v7 }
 0x2f5   : > { %v6358_v45 = vadd.f32 %v7147_v63, %v5646_v17  ;;  %v3928_v28 = vadd.f32 %v7069_v1, %v3216_v5  ;;  %v6725_v35 = vadd.f32 %v6649_v21, %v6479_v12  ;;  %v6726_v58 = vadd.f32 %v6651_v10, %v6481_v51 }
 0x2f6   : > { %v6727_v62 = vadd.f32 %v6720_v14, %v6550_v49  ;;  %v6728_v57 = vadd.f32 %v6722_v38, %v6552_v4 }
 0x2f7   : > { %6765 = vmatpush1.msra.mxu0 %v6358_v45  ;;  %v4432_v33 = vadd.f32 %v4352_v30, %v3928_v28 }
 0x2f8   : > { %7187 = vmatmul.mubr.msk.f32.vlgmr.msra.gmra.mxu0 %vm6730_vm3, %v6729_v59 }
 0x2f9   : > { %v5144_v42 = vadd.f32 %v7109_v60, %v4432_v33 }
 0x2fb   : > { %v5648_v9 = vadd.f32 %v5568_v13, %v5144_v42 }
 0x2fd   : > { %v6360_v20 = vadd.f32 %v7149_v40, %v5648_v9 }
 0x2ff   : > { %6836 = vmatpush1.msra.mxu1 %v6360_v20 }
 0x300   : > { %7188 = vmatmul.mubr.msk.f32.vlgmr.msra.gmra.mxu1 %vm6730_vm3, %v6729_v59 }
 0x3b8   : > { %v6800_v25 = vpop.f32.mrf.mxu0 }
 0x3b9   : > { %v6876_v61 = vadd.f32 %v6800_v25, %v6725_v35 }
 0x3ba   : > { %v6802_v46 = vpop.f32.mrf.mxu0 }
 0x3bb   : > { %v6877_v16 = vadd.f32 %v6802_v46, %v6726_v58 }
 0x3bd   : > { %v6884_v48 = vcombine.low %v6876_v61, %v6877_v16 }
 0x3bf   : > { %6888 = vst [vmem:[%s375_s27] sm:$0xff] %v6884_v48 }
 0x3c0   : > { %v6871_v47 = vpop.f32.mrf.mxu1 }
 0x3c1   : > { %v6878_v0 = vadd.f32 %v6871_v47, %v6727_v62 }
 0x3c2   : > { %v6873_v63 = vpop.f32.mrf.mxu1 }
 0x3c3   : > { %v6879_v23 = vadd.f32 %v6873_v63, %v6728_v57 }
 0x3c5   : > { %v6885_v11 = vcombine.low %v6878_v0, %v6879_v23 }
 0x3c7   : > { %6889 = vst [vmem:[%s375_s27 + $0x8] sm:$0xff] %v6885_v11 }
 0x3c8   : > { %7300 = shalt.err (!%p7297_p10)
}
 0x3c9   : > { %s7301_s11 = scalar_lea.hbm %s6903_s18, 256  ;;  %s7305_s20 = scalar_lea.hbm %s10361_s10, 512 }
 0x3ca   : > { %p7302_p2 = scmp.ne.s32.totalorder %s6903_s18, %s7301_s11  ;;  %p7306_p7 = scmp.lt.s32.totalorder %s6903_s18, %s10361_s10 }
 0x3cb   : > { %p7307_p5 = scmp.lt.s32.totalorder %s7305_s20, %s7301_s11 }
 0x3cc   : > { %p7303_p4 = pnand %p7302_p2, %p11064_p12 }
 0x3cd   : > { %p7308_p6 = por %p7307_p5, %p7306_p7 }
 0x3ce   : > { %p7304_p9 = pneg %p7303_p4 }
 0x3d0   : > { %p7309_p11 = pnand %p7308_p6, %p7304_p9 }
 0x3d2   : > { %7312 = shalt.err (!%p7309_p11)
}
 0x3d3   : > { %7200 = dma.vmem_to_hbm [thread:$0]  (%p11064_p12), %s6906_s30, 256, %s6903_s18, %s6891_s19  }
 0x3d4 PF: > { %s11065_s29 = sld [smem:[#allocation11_spill]]  ;;  %s6917_s28 = sand.u32 1, %s7339_s13  }
 0x3d5   : > { %p11067_p0 = scmp.ge.s32.totalorder %s7351_s16, 2  ;;  %s6918_s26 = scalar_lea.sflag [#allocation4], %s6917_s28 }
 0x3da   : > { %p11066_p13 = scmp.ne.s32.totalorder %s11065_s29, 0 }
 0x3dc   : > { %p7207_p1 = pnand %p11067_p0, %p11066_p13 }
 0x3de   : > { %p7208_p3 = pneg %p7207_p1 }
 0x3e0   : > { %7334 = dma.done.wait (%p7208_p3), %s6918_s26, 256  }
 0x3e1   : > { %7336 = vsyncadd (%p7208_p3), %s6918_s26, 4294967040  ;;  %s11068_s16 = sld [smem:[#allocation9_spill]]  ;;  %s11071_s13 = smov %s7343_s14 }
 0x3e2   : > { %s11069_s22 = sld [smem:[#allocation8_spill]] }
 0x3e3   : > { %s11070_s15 = sld [smem:[#allocation10_spill]] }
 0x3e7   : > { %p23_p8 = scmp.ge.s32.totalorder %s11068_s16, 4  }
 0x3e8   : > { %s11072_s14 = smov %s11069_s22 }
 0x3e9   :  { %25 = sbr.rel (!%p23_p8) target bundleno = 5 (0x5), region = 105 }
 0x3ee   :  { %6923 = vsyncpa [#allocation3], 1 }
 0x3ef   :  { %6925 = vsyncpa [#allocation3 + $0x1], 1 }
 0x3f0   :  { %6926 = vsyncpa [#allocation4], 1 }
 0x3f1   :  { %6928 = vsyncpa [#allocation4 + $0x1], 1 }

</bundles_post_ra>
